<compile_context>
chip_gen: v5e
topology: v5e:2x2
jax: 0.10.0
libtpu: 0.0.40
codegen_flags: <defaults>
</compile_context>

<pallas_src>
import math

import jax
import jax.numpy as jnp
from jax import lax
from jax.experimental import pallas as pl
from jax.experimental.pallas import tpu as pltpu

SELU_ALPHA = 1.6732632423543772
SELU_SCALE = 1.0507009873554805


def _selu(x):
    # f32 in / f32 out; select-safe (no NaN from the discarded branch).
    return SELU_SCALE * jnp.where(x > 0, x, SELU_ALPHA * (jnp.exp(x) - 1.0))


def _three_row_valid_conv(in_ref, w_ref, b_ref):
    """Valid 3x3 conv + bias + SELU on an H-broadcast image.

    in_ref holds the 3 distinct input rows [top, mid, bot] of the virtual
    image [top, mid, mid, ..., mid, bot].  Returns the 3 distinct output rows
    (f32).  Each unique (row, tap) matmul is computed exactly once and reused
    by every output row that needs it (5 MXU matmuls per dx tap).
    """
    f32 = jnp.float32
    Wo = in_ref.shape[1] - 2
    Cout = w_ref.shape[3]
    acc_t = jnp.zeros((Wo, Cout), f32)
    acc_m = jnp.zeros((Wo, Cout), f32)
    acc_b = jnp.zeros((Wo, Cout), f32)
    for dx in range(3):
        top_s = in_ref[0, pl.ds(dx, Wo), :]          # (Wo, Cin) bf16
        mid_s = in_ref[1, pl.ds(dx, Wo), :]
        bot_s = in_ref[2, pl.ds(dx, Wo), :]
        q_t0 = jnp.dot(top_s, w_ref[0, dx], preferred_element_type=f32)
        q_m0 = jnp.dot(mid_s, w_ref[0, dx], preferred_element_type=f32)
        q_m1 = jnp.dot(mid_s, w_ref[1, dx], preferred_element_type=f32)
        q_m2 = jnp.dot(mid_s, w_ref[2, dx], preferred_element_type=f32)
        q_b2 = jnp.dot(bot_s, w_ref[2, dx], preferred_element_type=f32)
        acc_t += q_t0 + q_m1 + q_m2                  # out row 0 sees (top, mid, mid)
        acc_m += q_m0 + q_m1 + q_m2                  # interior rows see (mid, mid, mid)
        acc_b += q_m0 + q_m1 + q_b2                  # last row sees   (mid, mid, bot)
    bias = b_ref[...]                                # (1, Cout) f32
    return _selu(acc_t + bias), _selu(acc_m + bias), _selu(acc_b + bias)


def _fused_aligner_kernel(x_ref, w1_ref, b1_ref, w2_ref, b2_ref, w3_ref, b3_ref,
                          o_ref, h1_ref, h2_ref):
    """conv(3x3,'same') -> SELU -> conv(3x3) -> SELU -> conv(3x3) -> SELU.

    One batch element per grid step.  Because every H row of the (virtual)
    32-row input image is identical, each conv layer has only three distinct
    output rows; those are the only rows computed.

    x_ref : (L+2, Cin)         bf16  single distinct input row, W zero-padded
    wN_ref: (3, 3, Cin, Cout)  bf16  HWIO weights
    bN_ref: (1, Cout)          f32
    o_ref : (28, L-4, C3)      f32   full-height output block
    h1_ref: (3, L,   H1)       bf16  scratch: distinct rows after conv1+SELU
    h2_ref: (3, L-2, H2)       bf16  scratch: distinct rows after conv2+SELU
    """
    f32 = jnp.float32
    bf16 = jnp.bfloat16

    # ---- conv1 (padding='same') + SELU -------------------------------------
    # Virtual H-padded rows are [0, r, r, ..., r, 0]:
    #   top output row sees (0, r, r), interior rows (r, r, r), bottom (r, r, 0),
    # so the three dy taps reduce to reuse of the same three per-dx matmuls.
    W1 = x_ref.shape[0] - 2
    H1 = w1_ref.shape[3]
    acc1_t = jnp.zeros((W1, H1), f32)
    acc1_m = jnp.zeros((W1, H1), f32)
    acc1_b = jnp.zeros((W1, H1), f32)
    for dx in range(3):
        xs = x_ref[pl.ds(dx, W1), :]                                  # (W1, Cin) bf16
        p0 = jnp.dot(xs, w1_ref[0, dx], preferred_element_type=f32)
        p1 = jnp.dot(xs, w1_ref[1, dx], preferred_element_type=f32)
        p2 = jnp.dot(xs, w1_ref[2, dx], preferred_element_type=f32)
        acc1_t += p1 + p2
        acc1_m += p0 + p1 + p2
        acc1_b += p0 + p1
    bias1 = b1_ref[...]                                               # (1, H1) f32
    h1_ref[0] = _selu(acc1_t + bias1).astype(bf16)
    h1_ref[1] = _selu(acc1_m + bias1).astype(bf16)
    h1_ref[2] = _selu(acc1_b + bias1).astype(bf16)

    # ---- conv2 (valid) + SELU ----------------------------------------------
    top2, mid2, bot2 = _three_row_valid_conv(h1_ref, w2_ref, b2_ref)
    h2_ref[0] = top2.astype(bf16)
    h2_ref[1] = mid2.astype(bf16)
    h2_ref[2] = bot2.astype(bf16)

    # ---- conv3 (valid) + SELU (fused epilogue; Cout is tiny) ---------------
    top3, mid3, bot3 = _three_row_valid_conv(h2_ref, w3_ref, b3_ref)

    # ---- expand the 3 distinct rows back to the full 28-row output ---------
    HF = o_ref.shape[0]                       # 28 (= 32 - 4)
    W3, C3 = top3.shape
    o_ref[0] = top3.astype(o_ref.dtype)
    o_ref[pl.ds(1, HF - 2), :, :] = jnp.broadcast_to(
        mid3[None].astype(o_ref.dtype), (HF - 2, W3, C3))
    o_ref[HF - 1] = bot3.astype(o_ref.dtype)


def latent_space_aligner(x, params, return_gaussian=True):
    """JAX/Pallas equivalent of LatentSpaceAligner.forward.

    x: (B, 32, C) or (B, C, 32) float32 (same convention as the torch module).
    params: HWIO conv weights 'w1'..'w3' and biases 'b1'..'b3' (float32).
    Returns (features_nchw, mean_nchw, std_nchw) if return_gaussian, else just
    features_nchw, in PyTorch NCHW axis order.
    """
    if x.shape[1] == 32:
        x = jnp.swapaxes(x, 1, 2)                                # (B, C, L)
    B, C, L = x.shape

    # torch: x.unsqueeze(2).repeat(1, 1, 32, 1) -> NCHW (B, C, 32, L).
    # Every H row of that image is identical, so we never materialize the
    # repeat: the kernel gets one NHWC row (L, C), zero-padded along W for
    # conv1's padding='same', cast to bf16 (MXU feed; accumulation stays f32).
    x_row = jnp.swapaxes(x, 1, 2).astype(jnp.bfloat16)           # (B, L, C)
    x_row = jnp.pad(x_row, ((0, 0), (1, 1), (0, 0)))             # (B, L+2, C)

    w1 = params["w1"].astype(jnp.bfloat16)
    w2 = params["w2"].astype(jnp.bfloat16)
    w3 = params["w3"].astype(jnp.bfloat16)
    b1 = params["b1"].reshape(1, -1).astype(jnp.float32)
    b2 = params["b2"].reshape(1, -1).astype(jnp.float32)
    b3 = params["b3"].reshape(1, -1).astype(jnp.float32)
    H1, H2, C3 = w1.shape[3], w2.shape[3], w3.shape[3]
    W1, W2, W3 = L, L - 2, L - 4
    HF = 32 - 4                       # the torch forward hard-codes 32 rows

    feats_nhwc = pl.pallas_call(
        _fused_aligner_kernel,
        out_shape=jax.ShapeDtypeStruct((B, HF, W3, C3), jnp.float32),
        grid_spec=pltpu.PrefetchScalarGridSpec(
            num_scalar_prefetch=0,
            grid=(B,),
            in_specs=[
                pl.BlockSpec((None, L + 2, C), lambda i: (i, 0, 0)),
                # Weights / biases: constant index_map -> fetched once and
                # resident in VMEM across the whole grid.
                pl.BlockSpec((3, 3, C, H1), lambda i: (0, 0, 0, 0)),
                pl.BlockSpec((1, H1), lambda i: (0, 0)),
                pl.BlockSpec((3, 3, H1, H2), lambda i: (0, 0, 0, 0)),
                pl.BlockSpec((1, H2), lambda i: (0, 0)),
                pl.BlockSpec((3, 3, H2, C3), lambda i: (0, 0, 0, 0)),
                pl.BlockSpec((1, C3), lambda i: (0, 0)),
            ],
            out_specs=pl.BlockSpec((None, HF, W3, C3), lambda i: (i, 0, 0, 0)),
            scratch_shapes=[
                pltpu.VMEM((3, W1, H1), jnp.bfloat16),   # conv1 distinct rows
                pltpu.VMEM((3, W2, H2), jnp.bfloat16),   # conv2 distinct rows
            ],
        ),
        compiler_params=pltpu.CompilerParams(
            # One batch element per grid step; 'parallel' lets megacore / the
            # two v7x TensorCores split the batch axis.
            dimension_semantics=("parallel",),
            # Right-sized VMEM budget: even at the full model size
            # (Cin=768, hidden=256) the bf16 weight blocks (~4.2 MB, x2 for
            # the default double buffering) + input/output blocks + scratch
            # stay around ~10 MB, so 32 MiB leaves ample headroom and is well
            # below v7x's 64 MiB physical VMEM.
            vmem_limit_bytes=32 * 1024 * 1024,
        ),
    )(x_row, w1, b1, w2, b2, w3, b3)

    features_nchw = jnp.transpose(feats_nhwc, (0, 3, 1, 2))      # (B, C3, 28, L-4)

    if not return_gaussian:
        return features_nchw

    # torch builds a DiagonalGaussianDistribution and then overrides its
    # mean/std with clamps of feature channels (x[:, :4] and x[:, :-4], which
    # both select channels 0..3 when C3 == 8).
    # TODO(synk): the DiagonalGaussianDistribution object itself (sampling /
    #             KL / logvar) is not reproduced; only the overridden clamped
    #             mean/std tensors are returned.
    mean = jnp.clip(features_nchw[:, :4], -1.0, 1.0)
    std = jnp.clip(features_nchw[:, : C3 - 4], 0.0, 1.0)
    return features_nchw, mean, std


def _reference_forward(x, params):
    """Pure-JAX f32 reference of the torch forward (correctness check only)."""
    if x.shape[1] == 32:
        x = jnp.swapaxes(x, 1, 2)
    B, C, L = x.shape
    img = jnp.broadcast_to(jnp.swapaxes(x, 1, 2)[:, None, :, :], (B, 32, L, C))
    dn = ("NHWC", "HWIO", "NHWC")

    def conv(h, w, b, padding):
        y = lax.conv_general_dilated(h, w, (1, 1), padding, dimension_numbers=dn)
        return _selu(y + b.reshape(1, 1, 1, -1))

    h = conv(img.astype(jnp.float32), params["w1"], params["b1"], "SAME")
    h = conv(h, params["w2"], params["b2"], "VALID")
    h = conv(h, params["w3"], params["b3"], "VALID")
    return jnp.transpose(h, (0, 3, 1, 2))


def _uniform_init(key, shape, fan_in):
    bound = 1.0 / math.sqrt(fan_in)
    return jax.random.uniform(key, shape, jnp.float32, -bound, bound)


if __name__ == "__main__":
    key = jax.random.PRNGKey(0)
    kx, kw1, kb1, kw2, kb2, kw3, kb3 = jax.random.split(key, 7)

    B, SEQ = 2, 32                 # the forward hard-codes the 32-row broadcast
    CIN, HID, OUTC = 128, 64, 4    # small stand-ins for (768, 256, 4)

    # Input as the forward implies: (B, 32, hidden) -> transposed internally.
    x = jax.random.normal(kx, (B, SEQ, CIN), jnp.float32)

    params = {
        # conv:  Conv2d(CIN, HID, k=3, padding='same')   (HWIO weights)
        "w1": _uniform_init(kw1, (3, 3, CIN, HID), 9 * CIN),
        "b1": _uniform_init(kb1, (HID,), 9 * CIN),
        # conv2: Conv2d(HID, HID//2, k=3, padding=0)
        "w2": _uniform_init(kw2, (3, 3, HID, HID // 2), 9 * HID),
        "b2": _uniform_init(kb2, (HID // 2,), 9 * HID),
        # conv3: Conv2d(HID//2, 2*OUTC, k=3, padding=0)
        "w3": _uniform_init(kw3, (3, 3, HID // 2, OUTC * 2), 9 * (HID // 2)),
        "b3": _uniform_init(kb3, (OUTC * 2,), 9 * (HID // 2)),
    }

    fwd = jax.jit(lambda xx, pp: latent_space_aligner(xx, pp, True))
    features, mean, std = fwd(x, params)
    jax.block_until_ready((features, mean, std))

    assert features.shape == (B, 2 * OUTC, 28, 28)
    assert mean.shape == (B, OUTC, 28, 28)
    assert std.shape == (B, OUTC, 28, 28)

    # Correctness check against a pure-JAX f32 reference (bf16 MXU tolerance).
    ref = _reference_forward(x, params)
    max_err = float(jnp.max(jnp.abs(features - ref)))
    assert max_err < 5e-2, f"kernel/reference mismatch: max abs err = {max_err}"

    print("KERNEL_OK")
</pallas_src>

<mosaic_0001>
module attributes {stable_mosaic.version = 11 : i64} {
  func.func @_fused_aligner_kernel(%arg0: i32, %arg1: memref<1x34x128xbf16, #tpu.memory_space<vmem>>, %arg2: memref<3x3x128x64xbf16, #tpu.memory_space<vmem>>, %arg3: memref<1x64xf32, #tpu.memory_space<vmem>>, %arg4: memref<3x3x64x32xbf16, #tpu.memory_space<vmem>>, %arg5: memref<1x32xf32, #tpu.memory_space<vmem>>, %arg6: memref<3x3x32x8xbf16, #tpu.memory_space<vmem>>, %arg7: memref<1x8xf32, #tpu.memory_space<vmem>>, %arg8: memref<1x28x28x8xf32, #tpu.memory_space<vmem>>, %arg9: memref<3x32x64xbf16, #tpu.memory_space<vmem>>, %arg10: memref<3x30x32xbf16, #tpu.memory_space<vmem>>) attributes {dimension_semantics = [#tpu.dimension_semantics<parallel>], iteration_bounds = array<i64: 2>, scalar_prefetch = 0 : i64, scratch_operands = 2 : i64, tpu.core_type = #tpu.core_type<tc>, window_params = [{transform_indices = @transform_0, window_bounds = array<i64: 1, 34, 128>}, {pipeline_mode = #tpu.pipeline_mode<synchronous>, transform_indices = @transform_1, window_bounds = array<i64: 3, 3, 128, 64>}, {pipeline_mode = #tpu.pipeline_mode<synchronous>, transform_indices = @transform_2, window_bounds = array<i64: 1, 64>}, {pipeline_mode = #tpu.pipeline_mode<synchronous>, transform_indices = @transform_3, window_bounds = array<i64: 3, 3, 64, 32>}, {pipeline_mode = #tpu.pipeline_mode<synchronous>, transform_indices = @transform_4, window_bounds = array<i64: 1, 32>}, {pipeline_mode = #tpu.pipeline_mode<synchronous>, transform_indices = @transform_5, window_bounds = array<i64: 3, 3, 32, 8>}, {pipeline_mode = #tpu.pipeline_mode<synchronous>, transform_indices = @transform_6, window_bounds = array<i64: 1, 8>}, {transform_indices = @transform_7, window_bounds = array<i64: 1, 28, 28, 8>}]} {
    %cst = arith.constant 0.000000e+00 : f32
    %0 = vector.broadcast %cst : f32 to vector<32x64xf32>
    %cst_0 = arith.constant 0.000000e+00 : f32
    %1 = vector.broadcast %cst_0 : f32 to vector<32x64xf32>
    %cst_1 = arith.constant 0.000000e+00 : f32
    %2 = vector.broadcast %cst_1 : f32 to vector<32x64xf32>
    %c0 = arith.constant 0 : index
    %c0_2 = arith.constant 0 : index
    %c0_3 = arith.constant 0 : index
    %3 = vector.load %arg1[%c0, %c0_2, %c0_3] : memref<1x34x128xbf16, #tpu.memory_space<vmem>>, vector<1x32x128xbf16>
    %4 = vector.shape_cast %3 : vector<1x32x128xbf16> to vector<32x128xbf16>
    %c0_4 = arith.constant 0 : index
    %c0_5 = arith.constant 0 : index
    %c0_6 = arith.constant 0 : index
    %c0_7 = arith.constant 0 : index
    %5 = vector.load %arg2[%c0_4, %c0_5, %c0_6, %c0_7] : memref<3x3x128x64xbf16, #tpu.memory_space<vmem>>, vector<1x1x128x64xbf16>
    %6 = vector.shape_cast %5 : vector<1x1x128x64xbf16> to vector<128x64xbf16>
    %cst_8 = arith.constant dense<0.000000e+00> : vector<32x64xf32>
    %7 = tpu.matmul %4, %6, %cst_8 {dimension_numbers = #tpu.dot_dimension_numbers<[1], [0], [0], [1], [0, 0, 1, 1], [], []>} : vector<32x128xbf16>, vector<128x64xbf16>, vector<32x64xf32> -> vector<32x64xf32>
    %c1 = arith.constant 1 : index
    %c0_9 = arith.constant 0 : index
    %c0_10 = arith.constant 0 : index
    %c0_11 = arith.constant 0 : index
    %8 = vector.load %arg2[%c1, %c0_9, %c0_10, %c0_11] : memref<3x3x128x64xbf16, #tpu.memory_space<vmem>>, vector<1x1x128x64xbf16>
    %9 = vector.shape_cast %8 : vector<1x1x128x64xbf16> to vector<128x64xbf16>
    %cst_12 = arith.constant dense<0.000000e+00> : vector<32x64xf32>
    %10 = tpu.matmul %4, %9, %cst_12 {dimension_numbers = #tpu.dot_dimension_numbers<[1], [0], [0], [1], [0, 0, 1, 1], [], []>} : vector<32x128xbf16>, vector<128x64xbf16>, vector<32x64xf32> -> vector<32x64xf32>
    %c2 = arith.constant 2 : index
    %c0_13 = arith.constant 0 : index
    %c0_14 = arith.constant 0 : index
    %c0_15 = arith.constant 0 : index
    %11 = vector.load %arg2[%c2, %c0_13, %c0_14, %c0_15] : memref<3x3x128x64xbf16, #tpu.memory_space<vmem>>, vector<1x1x128x64xbf16>
    %12 = vector.shape_cast %11 : vector<1x1x128x64xbf16> to vector<128x64xbf16>
    %cst_16 = arith.constant dense<0.000000e+00> : vector<32x64xf32>
    %13 = tpu.matmul %4, %12, %cst_16 {dimension_numbers = #tpu.dot_dimension_numbers<[1], [0], [0], [1], [0, 0, 1, 1], [], []>} : vector<32x128xbf16>, vector<128x64xbf16>, vector<32x64xf32> -> vector<32x64xf32>
    %14 = arith.addf %10, %13 : vector<32x64xf32>
    %15 = arith.addf %0, %14 : vector<32x64xf32>
    %16 = arith.addf %7, %10 : vector<32x64xf32>
    %17 = arith.addf %16, %13 : vector<32x64xf32>
    %18 = arith.addf %1, %17 : vector<32x64xf32>
    %19 = arith.addf %7, %10 : vector<32x64xf32>
    %20 = arith.addf %2, %19 : vector<32x64xf32>
    %c0_17 = arith.constant 0 : index
    %c1_18 = arith.constant 1 : index
    %c0_19 = arith.constant 0 : index
    %21 = vector.load %arg1[%c0_17, %c1_18, %c0_19] : memref<1x34x128xbf16, #tpu.memory_space<vmem>>, vector<1x32x128xbf16>
    %22 = vector.shape_cast %21 : vector<1x32x128xbf16> to vector<32x128xbf16>
    %c0_20 = arith.constant 0 : index
    %c1_21 = arith.constant 1 : index
    %c0_22 = arith.constant 0 : index
    %c0_23 = arith.constant 0 : index
    %23 = vector.load %arg2[%c0_20, %c1_21, %c0_22, %c0_23] : memref<3x3x128x64xbf16, #tpu.memory_space<vmem>>, vector<1x1x128x64xbf16>
    %24 = vector.shape_cast %23 : vector<1x1x128x64xbf16> to vector<128x64xbf16>
    %cst_24 = arith.constant dense<0.000000e+00> : vector<32x64xf32>
    %25 = tpu.matmul %22, %24, %cst_24 {dimension_numbers = #tpu.dot_dimension_numbers<[1], [0], [0], [1], [0, 0, 1, 1], [], []>} : vector<32x128xbf16>, vector<128x64xbf16>, vector<32x64xf32> -> vector<32x64xf32>
    %c1_25 = arith.constant 1 : index
    %c1_26 = arith.constant 1 : index
    %c0_27 = arith.constant 0 : index
    %c0_28 = arith.constant 0 : index
    %26 = vector.load %arg2[%c1_25, %c1_26, %c0_27, %c0_28] : memref<3x3x128x64xbf16, #tpu.memory_space<vmem>>, vector<1x1x128x64xbf16>
    %27 = vector.shape_cast %26 : vector<1x1x128x64xbf16> to vector<128x64xbf16>
    %cst_29 = arith.constant dense<0.000000e+00> : vector<32x64xf32>
    %28 = tpu.matmul %22, %27, %cst_29 {dimension_numbers = #tpu.dot_dimension_numbers<[1], [0], [0], [1], [0, 0, 1, 1], [], []>} : vector<32x128xbf16>, vector<128x64xbf16>, vector<32x64xf32> -> vector<32x64xf32>
    %c2_30 = arith.constant 2 : index
    %c1_31 = arith.constant 1 : index
    %c0_32 = arith.constant 0 : index
    %c0_33 = arith.constant 0 : index
    %29 = vector.load %arg2[%c2_30, %c1_31, %c0_32, %c0_33] : memref<3x3x128x64xbf16, #tpu.memory_space<vmem>>, vector<1x1x128x64xbf16>
    %30 = vector.shape_cast %29 : vector<1x1x128x64xbf16> to vector<128x64xbf16>
    %cst_34 = arith.constant dense<0.000000e+00> : vector<32x64xf32>
    %31 = tpu.matmul %22, %30, %cst_34 {dimension_numbers = #tpu.dot_dimension_numbers<[1], [0], [0], [1], [0, 0, 1, 1], [], []>} : vector<32x128xbf16>, vector<128x64xbf16>, vector<32x64xf32> -> vector<32x64xf32>
    %32 = arith.addf %28, %31 : vector<32x64xf32>
    %33 = arith.addf %15, %32 : vector<32x64xf32>
    %34 = arith.addf %25, %28 : vector<32x64xf32>
    %35 = arith.addf %34, %31 : vector<32x64xf32>
    %36 = arith.addf %18, %35 : vector<32x64xf32>
    %37 = arith.addf %25, %28 : vector<32x64xf32>
    %38 = arith.addf %20, %37 : vector<32x64xf32>
    %c0_35 = arith.constant 0 : index
    %c2_36 = arith.constant 2 : index
    %c0_37 = arith.constant 0 : index
    %39 = vector.load %arg1[%c0_35, %c2_36, %c0_37] : memref<1x34x128xbf16, #tpu.memory_space<vmem>>, vector<1x32x128xbf16>
    %40 = vector.shape_cast %39 : vector<1x32x128xbf16> to vector<32x128xbf16>
    %c0_38 = arith.constant 0 : index
    %c2_39 = arith.constant 2 : index
    %c0_40 = arith.constant 0 : index
    %c0_41 = arith.constant 0 : index
    %41 = vector.load %arg2[%c0_38, %c2_39, %c0_40, %c0_41] : memref<3x3x128x64xbf16, #tpu.memory_space<vmem>>, vector<1x1x128x64xbf16>
    %42 = vector.shape_cast %41 : vector<1x1x128x64xbf16> to vector<128x64xbf16>
    %cst_42 = arith.constant dense<0.000000e+00> : vector<32x64xf32>
    %43 = tpu.matmul %40, %42, %cst_42 {dimension_numbers = #tpu.dot_dimension_numbers<[1], [0], [0], [1], [0, 0, 1, 1], [], []>} : vector<32x128xbf16>, vector<128x64xbf16>, vector<32x64xf32> -> vector<32x64xf32>
    %c1_43 = arith.constant 1 : index
    %c2_44 = arith.constant 2 : index
    %c0_45 = arith.constant 0 : index
    %c0_46 = arith.constant 0 : index
    %44 = vector.load %arg2[%c1_43, %c2_44, %c0_45, %c0_46] : memref<3x3x128x64xbf16, #tpu.memory_space<vmem>>, vector<1x1x128x64xbf16>
    %45 = vector.shape_cast %44 : vector<1x1x128x64xbf16> to vector<128x64xbf16>
    %cst_47 = arith.constant dense<0.000000e+00> : vector<32x64xf32>
    %46 = tpu.matmul %40, %45, %cst_47 {dimension_numbers = #tpu.dot_dimension_numbers<[1], [0], [0], [1], [0, 0, 1, 1], [], []>} : vector<32x128xbf16>, vector<128x64xbf16>, vector<32x64xf32> -> vector<32x64xf32>
    %c2_48 = arith.constant 2 : index
    %c2_49 = arith.constant 2 : index
    %c0_50 = arith.constant 0 : index
    %c0_51 = arith.constant 0 : index
    %47 = vector.load %arg2[%c2_48, %c2_49, %c0_50, %c0_51] : memref<3x3x128x64xbf16, #tpu.memory_space<vmem>>, vector<1x1x128x64xbf16>
    %48 = vector.shape_cast %47 : vector<1x1x128x64xbf16> to vector<128x64xbf16>
    %cst_52 = arith.constant dense<0.000000e+00> : vector<32x64xf32>
    %49 = tpu.matmul %40, %48, %cst_52 {dimension_numbers = #tpu.dot_dimension_numbers<[1], [0], [0], [1], [0, 0, 1, 1], [], []>} : vector<32x128xbf16>, vector<128x64xbf16>, vector<32x64xf32> -> vector<32x64xf32>
    %50 = arith.addf %46, %49 : vector<32x64xf32>
    %51 = arith.addf %33, %50 : vector<32x64xf32>
    %52 = arith.addf %43, %46 : vector<32x64xf32>
    %53 = arith.addf %52, %49 : vector<32x64xf32>
    %54 = arith.addf %36, %53 : vector<32x64xf32>
    %55 = arith.addf %43, %46 : vector<32x64xf32>
    %56 = arith.addf %38, %55 : vector<32x64xf32>
    %c0_53 = arith.constant 0 : index
    %c0_54 = arith.constant 0 : index
    %57 = vector.load %arg3[%c0_53, %c0_54] : memref<1x64xf32, #tpu.memory_space<vmem>>, vector<1x64xf32>
    %58 = vector.broadcast %57 : vector<1x64xf32> to vector<32x64xf32>
    %59 = arith.addf %51, %58 : vector<32x64xf32>
    %cst_55 = arith.constant 0.000000e+00 : f32
    %60 = vector.broadcast %cst_55 : f32 to vector<32x64xf32>
    %61 = arith.cmpf ogt, %59, %60 : vector<32x64xf32>
    %62 = math.exp %59 : vector<32x64xf32>
    %cst_56 = arith.constant 1.000000e+00 : f32
    %63 = vector.broadcast %cst_56 : f32 to vector<32x64xf32>
    %64 = arith.subf %62, %63 : vector<32x64xf32>
    %cst_57 = arith.constant 1.67326319 : f32
    %65 = vector.broadcast %cst_57 : f32 to vector<32x64xf32>
    %66 = arith.mulf %65, %64 : vector<32x64xf32>
    %67 = arith.select %61, %59, %66 : vector<32x64xi1>, vector<32x64xf32>
    %cst_58 = arith.constant 1.05070102 : f32
    %68 = vector.broadcast %cst_58 : f32 to vector<32x64xf32>
    %69 = arith.mulf %68, %67 : vector<32x64xf32>
    %70 = arith.truncf %69 : vector<32x64xf32> to vector<32x64xbf16>
    %c0_59 = arith.constant 0 : index
    %c0_60 = arith.constant 0 : index
    %c0_61 = arith.constant 0 : index
    %71 = vector.load %arg9[%c0_59, %c0_60, %c0_61] : memref<3x32x64xbf16, #tpu.memory_space<vmem>>, vector<1x32x64xbf16>
    %72 = vector.shape_cast %71 : vector<1x32x64xbf16> to vector<32x64xbf16>
    %73 = vector.shape_cast %70 : vector<32x64xbf16> to vector<1x32x64xbf16>
    tpu.vector_store %arg9[%c0_59, %c0_60, %c0_61], %73 {strides = array<i32>} : memref<3x32x64xbf16, #tpu.memory_space<vmem>>, vector<1x32x64xbf16>,
    %74 = vector.broadcast %57 : vector<1x64xf32> to vector<32x64xf32>
    %75 = arith.addf %54, %74 : vector<32x64xf32>
    %cst_62 = arith.constant 0.000000e+00 : f32
    %76 = vector.broadcast %cst_62 : f32 to vector<32x64xf32>
    %77 = arith.cmpf ogt, %75, %76 : vector<32x64xf32>
    %78 = math.exp %75 : vector<32x64xf32>
    %cst_63 = arith.constant 1.000000e+00 : f32
    %79 = vector.broadcast %cst_63 : f32 to vector<32x64xf32>
    %80 = arith.subf %78, %79 : vector<32x64xf32>
    %cst_64 = arith.constant 1.67326319 : f32
    %81 = vector.broadcast %cst_64 : f32 to vector<32x64xf32>
    %82 = arith.mulf %81, %80 : vector<32x64xf32>
    %83 = arith.select %77, %75, %82 : vector<32x64xi1>, vector<32x64xf32>
    %cst_65 = arith.constant 1.05070102 : f32
    %84 = vector.broadcast %cst_65 : f32 to vector<32x64xf32>
    %85 = arith.mulf %84, %83 : vector<32x64xf32>
    %86 = arith.truncf %85 : vector<32x64xf32> to vector<32x64xbf16>
    %c1_66 = arith.constant 1 : index
    %c0_67 = arith.constant 0 : index
    %c0_68 = arith.constant 0 : index
    %87 = vector.load %arg9[%c1_66, %c0_67, %c0_68] : memref<3x32x64xbf16, #tpu.memory_space<vmem>>, vector<1x32x64xbf16>
    %88 = vector.shape_cast %87 : vector<1x32x64xbf16> to vector<32x64xbf16>
    %89 = vector.shape_cast %86 : vector<32x64xbf16> to vector<1x32x64xbf16>
    tpu.vector_store %arg9[%c1_66, %c0_67, %c0_68], %89 {strides = array<i32>} : memref<3x32x64xbf16, #tpu.memory_space<vmem>>, vector<1x32x64xbf16>,
    %90 = vector.broadcast %57 : vector<1x64xf32> to vector<32x64xf32>
    %91 = arith.addf %56, %90 : vector<32x64xf32>
    %cst_69 = arith.constant 0.000000e+00 : f32
    %92 = vector.broadcast %cst_69 : f32 to vector<32x64xf32>
    %93 = arith.cmpf ogt, %91, %92 : vector<32x64xf32>
    %94 = math.exp %91 : vector<32x64xf32>
    %cst_70 = arith.constant 1.000000e+00 : f32
    %95 = vector.broadcast %cst_70 : f32 to vector<32x64xf32>
    %96 = arith.subf %94, %95 : vector<32x64xf32>
    %cst_71 = arith.constant 1.67326319 : f32
    %97 = vector.broadcast %cst_71 : f32 to vector<32x64xf32>
    %98 = arith.mulf %97, %96 : vector<32x64xf32>
    %99 = arith.select %93, %91, %98 : vector<32x64xi1>, vector<32x64xf32>
    %cst_72 = arith.constant 1.05070102 : f32
    %100 = vector.broadcast %cst_72 : f32 to vector<32x64xf32>
    %101 = arith.mulf %100, %99 : vector<32x64xf32>
    %102 = arith.truncf %101 : vector<32x64xf32> to vector<32x64xbf16>
    %c2_73 = arith.constant 2 : index
    %c0_74 = arith.constant 0 : index
    %c0_75 = arith.constant 0 : index
    %103 = vector.load %arg9[%c2_73, %c0_74, %c0_75] : memref<3x32x64xbf16, #tpu.memory_space<vmem>>, vector<1x32x64xbf16>
    %104 = vector.shape_cast %103 : vector<1x32x64xbf16> to vector<32x64xbf16>
    %105 = vector.shape_cast %102 : vector<32x64xbf16> to vector<1x32x64xbf16>
    tpu.vector_store %arg9[%c2_73, %c0_74, %c0_75], %105 {strides = array<i32>} : memref<3x32x64xbf16, #tpu.memory_space<vmem>>, vector<1x32x64xbf16>,
    %cst_76 = arith.constant 0.000000e+00 : f32
    %106 = vector.broadcast %cst_76 : f32 to vector<30x32xf32>
    %cst_77 = arith.constant 0.000000e+00 : f32
    %107 = vector.broadcast %cst_77 : f32 to vector<30x32xf32>
    %cst_78 = arith.constant 0.000000e+00 : f32
    %108 = vector.broadcast %cst_78 : f32 to vector<30x32xf32>
    %c0_79 = arith.constant 0 : index
    %c0_80 = arith.constant 0 : index
    %c0_81 = arith.constant 0 : index
    %109 = vector.load %arg9[%c0_79, %c0_80, %c0_81] : memref<3x32x64xbf16, #tpu.memory_space<vmem>>, vector<1x30x64xbf16>
    %110 = vector.shape_cast %109 : vector<1x30x64xbf16> to vector<30x64xbf16>
    %c1_82 = arith.constant 1 : index
    %c0_83 = arith.constant 0 : index
    %c0_84 = arith.constant 0 : index
    %111 = vector.load %arg9[%c1_82, %c0_83, %c0_84] : memref<3x32x64xbf16, #tpu.memory_space<vmem>>, vector<1x30x64xbf16>
    %112 = vector.shape_cast %111 : vector<1x30x64xbf16> to vector<30x64xbf16>
    %c2_85 = arith.constant 2 : index
    %c0_86 = arith.constant 0 : index
    %c0_87 = arith.constant 0 : index
    %113 = vector.load %arg9[%c2_85, %c0_86, %c0_87] : memref<3x32x64xbf16, #tpu.memory_space<vmem>>, vector<1x30x64xbf16>
    %114 = vector.shape_cast %113 : vector<1x30x64xbf16> to vector<30x64xbf16>
    %c0_88 = arith.constant 0 : index
    %c0_89 = arith.constant 0 : index
    %c0_90 = arith.constant 0 : index
    %c0_91 = arith.constant 0 : index
    %115 = vector.load %arg4[%c0_88, %c0_89, %c0_90, %c0_91] : memref<3x3x64x32xbf16, #tpu.memory_space<vmem>>, vector<1x1x64x32xbf16>
    %116 = vector.shape_cast %115 : vector<1x1x64x32xbf16> to vector<64x32xbf16>
    %cst_92 = arith.constant dense<0.000000e+00> : vector<30x32xf32>
    %117 = tpu.matmul %110, %116, %cst_92 {dimension_numbers = #tpu.dot_dimension_numbers<[1], [0], [0], [1], [0, 0, 1, 1], [], []>} : vector<30x64xbf16>, vector<64x32xbf16>, vector<30x32xf32> -> vector<30x32xf32>
    %c0_93 = arith.constant 0 : index
    %c0_94 = arith.constant 0 : index
    %c0_95 = arith.constant 0 : index
    %c0_96 = arith.constant 0 : index
    %118 = vector.load %arg4[%c0_93, %c0_94, %c0_95, %c0_96] : memref<3x3x64x32xbf16, #tpu.memory_space<vmem>>, vector<1x1x64x32xbf16>
    %119 = vector.shape_cast %118 : vector<1x1x64x32xbf16> to vector<64x32xbf16>
    %cst_97 = arith.constant dense<0.000000e+00> : vector<30x32xf32>
    %120 = tpu.matmul %112, %119, %cst_97 {dimension_numbers = #tpu.dot_dimension_numbers<[1], [0], [0], [1], [0, 0, 1, 1], [], []>} : vector<30x64xbf16>, vector<64x32xbf16>, vector<30x32xf32> -> vector<30x32xf32>
    %c1_98 = arith.constant 1 : index
    %c0_99 = arith.constant 0 : index
    %c0_100 = arith.constant 0 : index
    %c0_101 = arith.constant 0 : index
    %121 = vector.load %arg4[%c1_98, %c0_99, %c0_100, %c0_101] : memref<3x3x64x32xbf16, #tpu.memory_space<vmem>>, vector<1x1x64x32xbf16>
    %122 = vector.shape_cast %121 : vector<1x1x64x32xbf16> to vector<64x32xbf16>
    %cst_102 = arith.constant dense<0.000000e+00> : vector<30x32xf32>
    %123 = tpu.matmul %112, %122, %cst_102 {dimension_numbers = #tpu.dot_dimension_numbers<[1], [0], [0], [1], [0, 0, 1, 1], [], []>} : vector<30x64xbf16>, vector<64x32xbf16>, vector<30x32xf32> -> vector<30x32xf32>
    %c2_103 = arith.constant 2 : index
    %c0_104 = arith.constant 0 : index
    %c0_105 = arith.constant 0 : index
    %c0_106 = arith.constant 0 : index
    %124 = vector.load %arg4[%c2_103, %c0_104, %c0_105, %c0_106] : memref<3x3x64x32xbf16, #tpu.memory_space<vmem>>, vector<1x1x64x32xbf16>
    %125 = vector.shape_cast %124 : vector<1x1x64x32xbf16> to vector<64x32xbf16>
    %cst_107 = arith.constant dense<0.000000e+00> : vector<30x32xf32>
    %126 = tpu.matmul %112, %125, %cst_107 {dimension_numbers = #tpu.dot_dimension_numbers<[1], [0], [0], [1], [0, 0, 1, 1], [], []>} : vector<30x64xbf16>, vector<64x32xbf16>, vector<30x32xf32> -> vector<30x32xf32>
    %c2_108 = arith.constant 2 : index
    %c0_109 = arith.constant 0 : index
    %c0_110 = arith.constant 0 : index
    %c0_111 = arith.constant 0 : index
    %127 = vector.load %arg4[%c2_108, %c0_109, %c0_110, %c0_111] : memref<3x3x64x32xbf16, #tpu.memory_space<vmem>>, vector<1x1x64x32xbf16>
    %128 = vector.shape_cast %127 : vector<1x1x64x32xbf16> to vector<64x32xbf16>
    %cst_112 = arith.constant dense<0.000000e+00> : vector<30x32xf32>
    %129 = tpu.matmul %114, %128, %cst_112 {dimension_numbers = #tpu.dot_dimension_numbers<[1], [0], [0], [1], [0, 0, 1, 1], [], []>} : vector<30x64xbf16>, vector<64x32xbf16>, vector<30x32xf32> -> vector<30x32xf32>
    %130 = arith.addf %117, %123 : vector<30x32xf32>
    %131 = arith.addf %130, %126 : vector<30x32xf32>
    %132 = arith.addf %106, %131 : vector<30x32xf32>
    %133 = arith.addf %120, %123 : vector<30x32xf32>
    %134 = arith.addf %133, %126 : vector<30x32xf32>
    %135 = arith.addf %107, %134 : vector<30x32xf32>
    %136 = arith.addf %120, %123 : vector<30x32xf32>
    %137 = arith.addf %136, %129 : vector<30x32xf32>
    %138 = arith.addf %108, %137 : vector<30x32xf32>
    %c0_113 = arith.constant 0 : index
    %c1_114 = arith.constant 1 : index
    %c0_115 = arith.constant 0 : index
    %139 = vector.load %arg9[%c0_113, %c1_114, %c0_115] : memref<3x32x64xbf16, #tpu.memory_space<vmem>>, vector<1x30x64xbf16>
    %140 = vector.shape_cast %139 : vector<1x30x64xbf16> to vector<30x64xbf16>
    %c1_116 = arith.constant 1 : index
    %c1_117 = arith.constant 1 : index
    %c0_118 = arith.constant 0 : index
    %141 = vector.load %arg9[%c1_116, %c1_117, %c0_118] : memref<3x32x64xbf16, #tpu.memory_space<vmem>>, vector<1x30x64xbf16>
    %142 = vector.shape_cast %141 : vector<1x30x64xbf16> to vector<30x64xbf16>
    %c2_119 = arith.constant 2 : index
    %c1_120 = arith.constant 1 : index
    %c0_121 = arith.constant 0 : index
    %143 = vector.load %arg9[%c2_119, %c1_120, %c0_121] : memref<3x32x64xbf16, #tpu.memory_space<vmem>>, vector<1x30x64xbf16>
    %144 = vector.shape_cast %143 : vector<1x30x64xbf16> to vector<30x64xbf16>
    %c0_122 = arith.constant 0 : index
    %c1_123 = arith.constant 1 : index
    %c0_124 = arith.constant 0 : index
    %c0_125 = arith.constant 0 : index
    %145 = vector.load %arg4[%c0_122, %c1_123, %c0_124, %c0_125] : memref<3x3x64x32xbf16, #tpu.memory_space<vmem>>, vector<1x1x64x32xbf16>
    %146 = vector.shape_cast %145 : vector<1x1x64x32xbf16> to vector<64x32xbf16>
    %cst_126 = arith.constant dense<0.000000e+00> : vector<30x32xf32>
    %147 = tpu.matmul %140, %146, %cst_126 {dimension_numbers = #tpu.dot_dimension_numbers<[1], [0], [0], [1], [0, 0, 1, 1], [], []>} : vector<30x64xbf16>, vector<64x32xbf16>, vector<30x32xf32> -> vector<30x32xf32>
    %c0_127 = arith.constant 0 : index
    %c1_128 = arith.constant 1 : index
    %c0_129 = arith.constant 0 : index
    %c0_130 = arith.constant 0 : index
    %148 = vector.load %arg4[%c0_127, %c1_128, %c0_129, %c0_130] : memref<3x3x64x32xbf16, #tpu.memory_space<vmem>>, vector<1x1x64x32xbf16>
    %149 = vector.shape_cast %148 : vector<1x1x64x32xbf16> to vector<64x32xbf16>
    %cst_131 = arith.constant dense<0.000000e+00> : vector<30x32xf32>
    %150 = tpu.matmul %142, %149, %cst_131 {dimension_numbers = #tpu.dot_dimension_numbers<[1], [0], [0], [1], [0, 0, 1, 1], [], []>} : vector<30x64xbf16>, vector<64x32xbf16>, vector<30x32xf32> -> vector<30x32xf32>
    %c1_132 = arith.constant 1 : index
    %c1_133 = arith.constant 1 : index
    %c0_134 = arith.constant 0 : index
    %c0_135 = arith.constant 0 : index
    %151 = vector.load %arg4[%c1_132, %c1_133, %c0_134, %c0_135] : memref<3x3x64x32xbf16, #tpu.memory_space<vmem>>, vector<1x1x64x32xbf16>
    %152 = vector.shape_cast %151 : vector<1x1x64x32xbf16> to vector<64x32xbf16>
    %cst_136 = arith.constant dense<0.000000e+00> : vector<30x32xf32>
    %153 = tpu.matmul %142, %152, %cst_136 {dimension_numbers = #tpu.dot_dimension_numbers<[1], [0], [0], [1], [0, 0, 1, 1], [], []>} : vector<30x64xbf16>, vector<64x32xbf16>, vector<30x32xf32> -> vector<30x32xf32>
    %c2_137 = arith.constant 2 : index
    %c1_138 = arith.constant 1 : index
    %c0_139 = arith.constant 0 : index
    %c0_140 = arith.constant 0 : index
    %154 = vector.load %arg4[%c2_137, %c1_138, %c0_139, %c0_140] : memref<3x3x64x32xbf16, #tpu.memory_space<vmem>>, vector<1x1x64x32xbf16>
    %155 = vector.shape_cast %154 : vector<1x1x64x32xbf16> to vector<64x32xbf16>
    %cst_141 = arith.constant dense<0.000000e+00> : vector<30x32xf32>
    %156 = tpu.matmul %142, %155, %cst_141 {dimension_numbers = #tpu.dot_dimension_numbers<[1], [0], [0], [1], [0, 0, 1, 1], [], []>} : vector<30x64xbf16>, vector<64x32xbf16>, vector<30x32xf32> -> vector<30x32xf32>
    %c2_142 = arith.constant 2 : index
    %c1_143 = arith.constant 1 : index
    %c0_144 = arith.constant 0 : index
    %c0_145 = arith.constant 0 : index
    %157 = vector.load %arg4[%c2_142, %c1_143, %c0_144, %c0_145] : memref<3x3x64x32xbf16, #tpu.memory_space<vmem>>, vector<1x1x64x32xbf16>
    %158 = vector.shape_cast %157 : vector<1x1x64x32xbf16> to vector<64x32xbf16>
    %cst_146 = arith.constant dense<0.000000e+00> : vector<30x32xf32>
    %159 = tpu.matmul %144, %158, %cst_146 {dimension_numbers = #tpu.dot_dimension_numbers<[1], [0], [0], [1], [0, 0, 1, 1], [], []>} : vector<30x64xbf16>, vector<64x32xbf16>, vector<30x32xf32> -> vector<30x32xf32>
    %160 = arith.addf %147, %153 : vector<30x32xf32>
    %161 = arith.addf %160, %156 : vector<30x32xf32>
    %162 = arith.addf %132, %161 : vector<30x32xf32>
    %163 = arith.addf %150, %153 : vector<30x32xf32>
    %164 = arith.addf %163, %156 : vector<30x32xf32>
    %165 = arith.addf %135, %164 : vector<30x32xf32>
    %166 = arith.addf %150, %153 : vector<30x32xf32>
    %167 = arith.addf %166, %159 : vector<30x32xf32>
    %168 = arith.addf %138, %167 : vector<30x32xf32>
    %c0_147 = arith.constant 0 : index
    %c2_148 = arith.constant 2 : index
    %c0_149 = arith.constant 0 : index
    %169 = vector.load %arg9[%c0_147, %c2_148, %c0_149] : memref<3x32x64xbf16, #tpu.memory_space<vmem>>, vector<1x30x64xbf16>
    %170 = vector.shape_cast %169 : vector<1x30x64xbf16> to vector<30x64xbf16>
    %c1_150 = arith.constant 1 : index
    %c2_151 = arith.constant 2 : index
    %c0_152 = arith.constant 0 : index
    %171 = vector.load %arg9[%c1_150, %c2_151, %c0_152] : memref<3x32x64xbf16, #tpu.memory_space<vmem>>, vector<1x30x64xbf16>
    %172 = vector.shape_cast %171 : vector<1x30x64xbf16> to vector<30x64xbf16>
    %c2_153 = arith.constant 2 : index
    %c2_154 = arith.constant 2 : index
    %c0_155 = arith.constant 0 : index
    %173 = vector.load %arg9[%c2_153, %c2_154, %c0_155] : memref<3x32x64xbf16, #tpu.memory_space<vmem>>, vector<1x30x64xbf16>
    %174 = vector.shape_cast %173 : vector<1x30x64xbf16> to vector<30x64xbf16>
    %c0_156 = arith.constant 0 : index
    %c2_157 = arith.constant 2 : index
    %c0_158 = arith.constant 0 : index
    %c0_159 = arith.constant 0 : index
    %175 = vector.load %arg4[%c0_156, %c2_157, %c0_158, %c0_159] : memref<3x3x64x32xbf16, #tpu.memory_space<vmem>>, vector<1x1x64x32xbf16>
    %176 = vector.shape_cast %175 : vector<1x1x64x32xbf16> to vector<64x32xbf16>
    %cst_160 = arith.constant dense<0.000000e+00> : vector<30x32xf32>
    %177 = tpu.matmul %170, %176, %cst_160 {dimension_numbers = #tpu.dot_dimension_numbers<[1], [0], [0], [1], [0, 0, 1, 1], [], []>} : vector<30x64xbf16>, vector<64x32xbf16>, vector<30x32xf32> -> vector<30x32xf32>
    %c0_161 = arith.constant 0 : index
    %c2_162 = arith.constant 2 : index
    %c0_163 = arith.constant 0 : index
    %c0_164 = arith.constant 0 : index
    %178 = vector.load %arg4[%c0_161, %c2_162, %c0_163, %c0_164] : memref<3x3x64x32xbf16, #tpu.memory_space<vmem>>, vector<1x1x64x32xbf16>
    %179 = vector.shape_cast %178 : vector<1x1x64x32xbf16> to vector<64x32xbf16>
    %cst_165 = arith.constant dense<0.000000e+00> : vector<30x32xf32>
    %180 = tpu.matmul %172, %179, %cst_165 {dimension_numbers = #tpu.dot_dimension_numbers<[1], [0], [0], [1], [0, 0, 1, 1], [], []>} : vector<30x64xbf16>, vector<64x32xbf16>, vector<30x32xf32> -> vector<30x32xf32>
    %c1_166 = arith.constant 1 : index
    %c2_167 = arith.constant 2 : index
    %c0_168 = arith.constant 0 : index
    %c0_169 = arith.constant 0 : index
    %181 = vector.load %arg4[%c1_166, %c2_167, %c0_168, %c0_169] : memref<3x3x64x32xbf16, #tpu.memory_space<vmem>>, vector<1x1x64x32xbf16>
    %182 = vector.shape_cast %181 : vector<1x1x64x32xbf16> to vector<64x32xbf16>
    %cst_170 = arith.constant dense<0.000000e+00> : vector<30x32xf32>
    %183 = tpu.matmul %172, %182, %cst_170 {dimension_numbers = #tpu.dot_dimension_numbers<[1], [0], [0], [1], [0, 0, 1, 1], [], []>} : vector<30x64xbf16>, vector<64x32xbf16>, vector<30x32xf32> -> vector<30x32xf32>
    %c2_171 = arith.constant 2 : index
    %c2_172 = arith.constant 2 : index
    %c0_173 = arith.constant 0 : index
    %c0_174 = arith.constant 0 : index
    %184 = vector.load %arg4[%c2_171, %c2_172, %c0_173, %c0_174] : memref<3x3x64x32xbf16, #tpu.memory_space<vmem>>, vector<1x1x64x32xbf16>
    %185 = vector.shape_cast %184 : vector<1x1x64x32xbf16> to vector<64x32xbf16>
    %cst_175 = arith.constant dense<0.000000e+00> : vector<30x32xf32>
    %186 = tpu.matmul %172, %185, %cst_175 {dimension_numbers = #tpu.dot_dimension_numbers<[1], [0], [0], [1], [0, 0, 1, 1], [], []>} : vector<30x64xbf16>, vector<64x32xbf16>, vector<30x32xf32> -> vector<30x32xf32>
    %c2_176 = arith.constant 2 : index
    %c2_177 = arith.constant 2 : index
    %c0_178 = arith.constant 0 : index
    %c0_179 = arith.constant 0 : index
    %187 = vector.load %arg4[%c2_176, %c2_177, %c0_178, %c0_179] : memref<3x3x64x32xbf16, #tpu.memory_space<vmem>>, vector<1x1x64x32xbf16>
    %188 = vector.shape_cast %187 : vector<1x1x64x32xbf16> to vector<64x32xbf16>
    %cst_180 = arith.constant dense<0.000000e+00> : vector<30x32xf32>
    %189 = tpu.matmul %174, %188, %cst_180 {dimension_numbers = #tpu.dot_dimension_numbers<[1], [0], [0], [1], [0, 0, 1, 1], [], []>} : vector<30x64xbf16>, vector<64x32xbf16>, vector<30x32xf32> -> vector<30x32xf32>
    %190 = arith.addf %177, %183 : vector<30x32xf32>
    %191 = arith.addf %190, %186 : vector<30x32xf32>
    %192 = arith.addf %162, %191 : vector<30x32xf32>
    %193 = arith.addf %180, %183 : vector<30x32xf32>
    %194 = arith.addf %193, %186 : vector<30x32xf32>
    %195 = arith.addf %165, %194 : vector<30x32xf32>
    %196 = arith.addf %180, %183 : vector<30x32xf32>
    %197 = arith.addf %196, %189 : vector<30x32xf32>
    %198 = arith.addf %168, %197 : vector<30x32xf32>
    %c0_181 = arith.constant 0 : index
    %c0_182 = arith.constant 0 : index
    %199 = vector.load %arg5[%c0_181, %c0_182] : memref<1x32xf32, #tpu.memory_space<vmem>>, vector<1x32xf32>
    %200 = vector.broadcast %199 : vector<1x32xf32> to vector<30x32xf32>
    %201 = arith.addf %192, %200 : vector<30x32xf32>
    %cst_183 = arith.constant 0.000000e+00 : f32
    %202 = vector.broadcast %cst_183 : f32 to vector<30x32xf32>
    %203 = arith.cmpf ogt, %201, %202 : vector<30x32xf32>
    %204 = math.exp %201 : vector<30x32xf32>
    %cst_184 = arith.constant 1.000000e+00 : f32
    %205 = vector.broadcast %cst_184 : f32 to vector<30x32xf32>
    %206 = arith.subf %204, %205 : vector<30x32xf32>
    %cst_185 = arith.constant 1.67326319 : f32
    %207 = vector.broadcast %cst_185 : f32 to vector<30x32xf32>
    %208 = arith.mulf %207, %206 : vector<30x32xf32>
    %209 = arith.select %203, %201, %208 : vector<30x32xi1>, vector<30x32xf32>
    %cst_186 = arith.constant 1.05070102 : f32
    %210 = vector.broadcast %cst_186 : f32 to vector<30x32xf32>
    %211 = arith.mulf %210, %209 : vector<30x32xf32>
    %212 = vector.broadcast %199 : vector<1x32xf32> to vector<30x32xf32>
    %213 = arith.addf %195, %212 : vector<30x32xf32>
    %cst_187 = arith.constant 0.000000e+00 : f32
    %214 = vector.broadcast %cst_187 : f32 to vector<30x32xf32>
    %215 = arith.cmpf ogt, %213, %214 : vector<30x32xf32>
    %216 = math.exp %213 : vector<30x32xf32>
    %cst_188 = arith.constant 1.000000e+00 : f32
    %217 = vector.broadcast %cst_188 : f32 to vector<30x32xf32>
    %218 = arith.subf %216, %217 : vector<30x32xf32>
    %cst_189 = arith.constant 1.67326319 : f32
    %219 = vector.broadcast %cst_189 : f32 to vector<30x32xf32>
    %220 = arith.mulf %219, %218 : vector<30x32xf32>
    %221 = arith.select %215, %213, %220 : vector<30x32xi1>, vector<30x32xf32>
    %cst_190 = arith.constant 1.05070102 : f32
    %222 = vector.broadcast %cst_190 : f32 to vector<30x32xf32>
    %223 = arith.mulf %222, %221 : vector<30x32xf32>
    %224 = vector.broadcast %199 : vector<1x32xf32> to vector<30x32xf32>
    %225 = arith.addf %198, %224 : vector<30x32xf32>
    %cst_191 = arith.constant 0.000000e+00 : f32
    %226 = vector.broadcast %cst_191 : f32 to vector<30x32xf32>
    %227 = arith.cmpf ogt, %225, %226 : vector<30x32xf32>
    %228 = math.exp %225 : vector<30x32xf32>
    %cst_192 = arith.constant 1.000000e+00 : f32
    %229 = vector.broadcast %cst_192 : f32 to vector<30x32xf32>
    %230 = arith.subf %228, %229 : vector<30x32xf32>
    %cst_193 = arith.constant 1.67326319 : f32
    %231 = vector.broadcast %cst_193 : f32 to vector<30x32xf32>
    %232 = arith.mulf %231, %230 : vector<30x32xf32>
    %233 = arith.select %227, %225, %232 : vector<30x32xi1>, vector<30x32xf32>
    %cst_194 = arith.constant 1.05070102 : f32
    %234 = vector.broadcast %cst_194 : f32 to vector<30x32xf32>
    %235 = arith.mulf %234, %233 : vector<30x32xf32>
    %236 = arith.truncf %211 : vector<30x32xf32> to vector<30x32xbf16>
    %c0_195 = arith.constant 0 : index
    %c0_196 = arith.constant 0 : index
    %c0_197 = arith.constant 0 : index
    %237 = vector.load %arg10[%c0_195, %c0_196, %c0_197] : memref<3x30x32xbf16, #tpu.memory_space<vmem>>, vector<1x30x32xbf16>
    %238 = vector.shape_cast %237 : vector<1x30x32xbf16> to vector<30x32xbf16>
    %239 = vector.shape_cast %236 : vector<30x32xbf16> to vector<1x30x32xbf16>
    tpu.vector_store %arg10[%c0_195, %c0_196, %c0_197], %239 {strides = array<i32>} : memref<3x30x32xbf16, #tpu.memory_space<vmem>>, vector<1x30x32xbf16>,
    %240 = arith.truncf %223 : vector<30x32xf32> to vector<30x32xbf16>
    %c1_198 = arith.constant 1 : index
    %c0_199 = arith.constant 0 : index
    %c0_200 = arith.constant 0 : index
    %241 = vector.load %arg10[%c1_198, %c0_199, %c0_200] : memref<3x30x32xbf16, #tpu.memory_space<vmem>>, vector<1x30x32xbf16>
    %242 = vector.shape_cast %241 : vector<1x30x32xbf16> to vector<30x32xbf16>
    %243 = vector.shape_cast %240 : vector<30x32xbf16> to vector<1x30x32xbf16>
    tpu.vector_store %arg10[%c1_198, %c0_199, %c0_200], %243 {strides = array<i32>} : memref<3x30x32xbf16, #tpu.memory_space<vmem>>, vector<1x30x32xbf16>,
    %244 = arith.truncf %235 : vector<30x32xf32> to vector<30x32xbf16>
    %c2_201 = arith.constant 2 : index
    %c0_202 = arith.constant 0 : index
    %c0_203 = arith.constant 0 : index
    %245 = vector.load %arg10[%c2_201, %c0_202, %c0_203] : memref<3x30x32xbf16, #tpu.memory_space<vmem>>, vector<1x30x32xbf16>
    %246 = vector.shape_cast %245 : vector<1x30x32xbf16> to vector<30x32xbf16>
    %247 = vector.shape_cast %244 : vector<30x32xbf16> to vector<1x30x32xbf16>
    tpu.vector_store %arg10[%c2_201, %c0_202, %c0_203], %247 {strides = array<i32>} : memref<3x30x32xbf16, #tpu.memory_space<vmem>>, vector<1x30x32xbf16>,
    %cst_204 = arith.constant 0.000000e+00 : f32
    %248 = vector.broadcast %cst_204 : f32 to vector<28x8xf32>
    %cst_205 = arith.constant 0.000000e+00 : f32
    %249 = vector.broadcast %cst_205 : f32 to vector<28x8xf32>
    %cst_206 = arith.constant 0.000000e+00 : f32
    %250 = vector.broadcast %cst_206 : f32 to vector<28x8xf32>
    %c0_207 = arith.constant 0 : index
    %c0_208 = arith.constant 0 : index
    %c0_209 = arith.constant 0 : index
    %251 = vector.load %arg10[%c0_207, %c0_208, %c0_209] : memref<3x30x32xbf16, #tpu.memory_space<vmem>>, vector<1x28x32xbf16>
    %252 = vector.shape_cast %251 : vector<1x28x32xbf16> to vector<28x32xbf16>
    %c1_210 = arith.constant 1 : index
    %c0_211 = arith.constant 0 : index
    %c0_212 = arith.constant 0 : index
    %253 = vector.load %arg10[%c1_210, %c0_211, %c0_212] : memref<3x30x32xbf16, #tpu.memory_space<vmem>>, vector<1x28x32xbf16>
    %254 = vector.shape_cast %253 : vector<1x28x32xbf16> to vector<28x32xbf16>
    %c2_213 = arith.constant 2 : index
    %c0_214 = arith.constant 0 : index
    %c0_215 = arith.constant 0 : index
    %255 = vector.load %arg10[%c2_213, %c0_214, %c0_215] : memref<3x30x32xbf16, #tpu.memory_space<vmem>>, vector<1x28x32xbf16>
    %256 = vector.shape_cast %255 : vector<1x28x32xbf16> to vector<28x32xbf16>
    %c0_216 = arith.constant 0 : index
    %c0_217 = arith.constant 0 : index
    %c0_218 = arith.constant 0 : index
    %c0_219 = arith.constant 0 : index
    %257 = vector.load %arg6[%c0_216, %c0_217, %c0_218, %c0_219] : memref<3x3x32x8xbf16, #tpu.memory_space<vmem>>, vector<1x1x32x8xbf16>
    %258 = vector.shape_cast %257 : vector<1x1x32x8xbf16> to vector<32x8xbf16>
    %cst_220 = arith.constant dense<0.000000e+00> : vector<28x8xf32>
    %259 = tpu.matmul %252, %258, %cst_220 {dimension_numbers = #tpu.dot_dimension_numbers<[1], [0], [0], [1], [0, 0, 1, 1], [], []>} : vector<28x32xbf16>, vector<32x8xbf16>, vector<28x8xf32> -> vector<28x8xf32>
    %c0_221 = arith.constant 0 : index
    %c0_222 = arith.constant 0 : index
    %c0_223 = arith.constant 0 : index
    %c0_224 = arith.constant 0 : index
    %260 = vector.load %arg6[%c0_221, %c0_222, %c0_223, %c0_224] : memref<3x3x32x8xbf16, #tpu.memory_space<vmem>>, vector<1x1x32x8xbf16>
    %261 = vector.shape_cast %260 : vector<1x1x32x8xbf16> to vector<32x8xbf16>
    %cst_225 = arith.constant dense<0.000000e+00> : vector<28x8xf32>
    %262 = tpu.matmul %254, %261, %cst_225 {dimension_numbers = #tpu.dot_dimension_numbers<[1], [0], [0], [1], [0, 0, 1, 1], [], []>} : vector<28x32xbf16>, vector<32x8xbf16>, vector<28x8xf32> -> vector<28x8xf32>
    %c1_226 = arith.constant 1 : index
    %c0_227 = arith.constant 0 : index
    %c0_228 = arith.constant 0 : index
    %c0_229 = arith.constant 0 : index
    %263 = vector.load %arg6[%c1_226, %c0_227, %c0_228, %c0_229] : memref<3x3x32x8xbf16, #tpu.memory_space<vmem>>, vector<1x1x32x8xbf16>
    %264 = vector.shape_cast %263 : vector<1x1x32x8xbf16> to vector<32x8xbf16>
    %cst_230 = arith.constant dense<0.000000e+00> : vector<28x8xf32>
    %265 = tpu.matmul %254, %264, %cst_230 {dimension_numbers = #tpu.dot_dimension_numbers<[1], [0], [0], [1], [0, 0, 1, 1], [], []>} : vector<28x32xbf16>, vector<32x8xbf16>, vector<28x8xf32> -> vector<28x8xf32>
    %c2_231 = arith.constant 2 : index
    %c0_232 = arith.constant 0 : index
    %c0_233 = arith.constant 0 : index
    %c0_234 = arith.constant 0 : index
    %266 = vector.load %arg6[%c2_231, %c0_232, %c0_233, %c0_234] : memref<3x3x32x8xbf16, #tpu.memory_space<vmem>>, vector<1x1x32x8xbf16>
    %267 = vector.shape_cast %266 : vector<1x1x32x8xbf16> to vector<32x8xbf16>
    %cst_235 = arith.constant dense<0.000000e+00> : vector<28x8xf32>
    %268 = tpu.matmul %254, %267, %cst_235 {dimension_numbers = #tpu.dot_dimension_numbers<[1], [0], [0], [1], [0, 0, 1, 1], [], []>} : vector<28x32xbf16>, vector<32x8xbf16>, vector<28x8xf32> -> vector<28x8xf32>
    %c2_236 = arith.constant 2 : index
    %c0_237 = arith.constant 0 : index
    %c0_238 = arith.constant 0 : index
    %c0_239 = arith.constant 0 : index
    %269 = vector.load %arg6[%c2_236, %c0_237, %c0_238, %c0_239] : memref<3x3x32x8xbf16, #tpu.memory_space<vmem>>, vector<1x1x32x8xbf16>
    %270 = vector.shape_cast %269 : vector<1x1x32x8xbf16> to vector<32x8xbf16>
    %cst_240 = arith.constant dense<0.000000e+00> : vector<28x8xf32>
    %271 = tpu.matmul %256, %270, %cst_240 {dimension_numbers = #tpu.dot_dimension_numbers<[1], [0], [0], [1], [0, 0, 1, 1], [], []>} : vector<28x32xbf16>, vector<32x8xbf16>, vector<28x8xf32> -> vector<28x8xf32>
    %272 = arith.addf %259, %265 : vector<28x8xf32>
    %273 = arith.addf %272, %268 : vector<28x8xf32>
    %274 = arith.addf %248, %273 : vector<28x8xf32>
    %275 = arith.addf %262, %265 : vector<28x8xf32>
    %276 = arith.addf %275, %268 : vector<28x8xf32>
    %277 = arith.addf %249, %276 : vector<28x8xf32>
    %278 = arith.addf %262, %265 : vector<28x8xf32>
    %279 = arith.addf %278, %271 : vector<28x8xf32>
    %280 = arith.addf %250, %279 : vector<28x8xf32>
    %c0_241 = arith.constant 0 : index
    %c1_242 = arith.constant 1 : index
    %c0_243 = arith.constant 0 : index
    %281 = vector.load %arg10[%c0_241, %c1_242, %c0_243] : memref<3x30x32xbf16, #tpu.memory_space<vmem>>, vector<1x28x32xbf16>
    %282 = vector.shape_cast %281 : vector<1x28x32xbf16> to vector<28x32xbf16>
    %c1_244 = arith.constant 1 : index
    %c1_245 = arith.constant 1 : index
    %c0_246 = arith.constant 0 : index
    %283 = vector.load %arg10[%c1_244, %c1_245, %c0_246] : memref<3x30x32xbf16, #tpu.memory_space<vmem>>, vector<1x28x32xbf16>
    %284 = vector.shape_cast %283 : vector<1x28x32xbf16> to vector<28x32xbf16>
    %c2_247 = arith.constant 2 : index
    %c1_248 = arith.constant 1 : index
    %c0_249 = arith.constant 0 : index
    %285 = vector.load %arg10[%c2_247, %c1_248, %c0_249] : memref<3x30x32xbf16, #tpu.memory_space<vmem>>, vector<1x28x32xbf16>
    %286 = vector.shape_cast %285 : vector<1x28x32xbf16> to vector<28x32xbf16>
    %c0_250 = arith.constant 0 : index
    %c1_251 = arith.constant 1 : index
    %c0_252 = arith.constant 0 : index
    %c0_253 = arith.constant 0 : index
    %287 = vector.load %arg6[%c0_250, %c1_251, %c0_252, %c0_253] : memref<3x3x32x8xbf16, #tpu.memory_space<vmem>>, vector<1x1x32x8xbf16>
    %288 = vector.shape_cast %287 : vector<1x1x32x8xbf16> to vector<32x8xbf16>
    %cst_254 = arith.constant dense<0.000000e+00> : vector<28x8xf32>
    %289 = tpu.matmul %282, %288, %cst_254 {dimension_numbers = #tpu.dot_dimension_numbers<[1], [0], [0], [1], [0, 0, 1, 1], [], []>} : vector<28x32xbf16>, vector<32x8xbf16>, vector<28x8xf32> -> vector<28x8xf32>
    %c0_255 = arith.constant 0 : index
    %c1_256 = arith.constant 1 : index
    %c0_257 = arith.constant 0 : index
    %c0_258 = arith.constant 0 : index
    %290 = vector.load %arg6[%c0_255, %c1_256, %c0_257, %c0_258] : memref<3x3x32x8xbf16, #tpu.memory_space<vmem>>, vector<1x1x32x8xbf16>
    %291 = vector.shape_cast %290 : vector<1x1x32x8xbf16> to vector<32x8xbf16>
    %cst_259 = arith.constant dense<0.000000e+00> : vector<28x8xf32>
    %292 = tpu.matmul %284, %291, %cst_259 {dimension_numbers = #tpu.dot_dimension_numbers<[1], [0], [0], [1], [0, 0, 1, 1], [], []>} : vector<28x32xbf16>, vector<32x8xbf16>, vector<28x8xf32> -> vector<28x8xf32>
    %c1_260 = arith.constant 1 : index
    %c1_261 = arith.constant 1 : index
    %c0_262 = arith.constant 0 : index
    %c0_263 = arith.constant 0 : index
    %293 = vector.load %arg6[%c1_260, %c1_261, %c0_262, %c0_263] : memref<3x3x32x8xbf16, #tpu.memory_space<vmem>>, vector<1x1x32x8xbf16>
    %294 = vector.shape_cast %293 : vector<1x1x32x8xbf16> to vector<32x8xbf16>
    %cst_264 = arith.constant dense<0.000000e+00> : vector<28x8xf32>
    %295 = tpu.matmul %284, %294, %cst_264 {dimension_numbers = #tpu.dot_dimension_numbers<[1], [0], [0], [1], [0, 0, 1, 1], [], []>} : vector<28x32xbf16>, vector<32x8xbf16>, vector<28x8xf32> -> vector<28x8xf32>
    %c2_265 = arith.constant 2 : index
    %c1_266 = arith.constant 1 : index
    %c0_267 = arith.constant 0 : index
    %c0_268 = arith.constant 0 : index
    %296 = vector.load %arg6[%c2_265, %c1_266, %c0_267, %c0_268] : memref<3x3x32x8xbf16, #tpu.memory_space<vmem>>, vector<1x1x32x8xbf16>
    %297 = vector.shape_cast %296 : vector<1x1x32x8xbf16> to vector<32x8xbf16>
    %cst_269 = arith.constant dense<0.000000e+00> : vector<28x8xf32>
    %298 = tpu.matmul %284, %297, %cst_269 {dimension_numbers = #tpu.dot_dimension_numbers<[1], [0], [0], [1], [0, 0, 1, 1], [], []>} : vector<28x32xbf16>, vector<32x8xbf16>, vector<28x8xf32> -> vector<28x8xf32>
    %c2_270 = arith.constant 2 : index
    %c1_271 = arith.constant 1 : index
    %c0_272 = arith.constant 0 : index
    %c0_273 = arith.constant 0 : index
    %299 = vector.load %arg6[%c2_270, %c1_271, %c0_272, %c0_273] : memref<3x3x32x8xbf16, #tpu.memory_space<vmem>>, vector<1x1x32x8xbf16>
    %300 = vector.shape_cast %299 : vector<1x1x32x8xbf16> to vector<32x8xbf16>
    %cst_274 = arith.constant dense<0.000000e+00> : vector<28x8xf32>
    %301 = tpu.matmul %286, %300, %cst_274 {dimension_numbers = #tpu.dot_dimension_numbers<[1], [0], [0], [1], [0, 0, 1, 1], [], []>} : vector<28x32xbf16>, vector<32x8xbf16>, vector<28x8xf32> -> vector<28x8xf32>
    %302 = arith.addf %289, %295 : vector<28x8xf32>
    %303 = arith.addf %302, %298 : vector<28x8xf32>
    %304 = arith.addf %274, %303 : vector<28x8xf32>
    %305 = arith.addf %292, %295 : vector<28x8xf32>
    %306 = arith.addf %305, %298 : vector<28x8xf32>
    %307 = arith.addf %277, %306 : vector<28x8xf32>
    %308 = arith.addf %292, %295 : vector<28x8xf32>
    %309 = arith.addf %308, %301 : vector<28x8xf32>
    %310 = arith.addf %280, %309 : vector<28x8xf32>
    %c0_275 = arith.constant 0 : index
    %c2_276 = arith.constant 2 : index
    %c0_277 = arith.constant 0 : index
    %311 = vector.load %arg10[%c0_275, %c2_276, %c0_277] : memref<3x30x32xbf16, #tpu.memory_space<vmem>>, vector<1x28x32xbf16>
    %312 = vector.shape_cast %311 : vector<1x28x32xbf16> to vector<28x32xbf16>
    %c1_278 = arith.constant 1 : index
    %c2_279 = arith.constant 2 : index
    %c0_280 = arith.constant 0 : index
    %313 = vector.load %arg10[%c1_278, %c2_279, %c0_280] : memref<3x30x32xbf16, #tpu.memory_space<vmem>>, vector<1x28x32xbf16>
    %314 = vector.shape_cast %313 : vector<1x28x32xbf16> to vector<28x32xbf16>
    %c2_281 = arith.constant 2 : index
    %c2_282 = arith.constant 2 : index
    %c0_283 = arith.constant 0 : index
    %315 = vector.load %arg10[%c2_281, %c2_282, %c0_283] : memref<3x30x32xbf16, #tpu.memory_space<vmem>>, vector<1x28x32xbf16>
    %316 = vector.shape_cast %315 : vector<1x28x32xbf16> to vector<28x32xbf16>
    %c0_284 = arith.constant 0 : index
    %c2_285 = arith.constant 2 : index
    %c0_286 = arith.constant 0 : index
    %c0_287 = arith.constant 0 : index
    %317 = vector.load %arg6[%c0_284, %c2_285, %c0_286, %c0_287] : memref<3x3x32x8xbf16, #tpu.memory_space<vmem>>, vector<1x1x32x8xbf16>
    %318 = vector.shape_cast %317 : vector<1x1x32x8xbf16> to vector<32x8xbf16>
    %cst_288 = arith.constant dense<0.000000e+00> : vector<28x8xf32>
    %319 = tpu.matmul %312, %318, %cst_288 {dimension_numbers = #tpu.dot_dimension_numbers<[1], [0], [0], [1], [0, 0, 1, 1], [], []>} : vector<28x32xbf16>, vector<32x8xbf16>, vector<28x8xf32> -> vector<28x8xf32>
    %c0_289 = arith.constant 0 : index
    %c2_290 = arith.constant 2 : index
    %c0_291 = arith.constant 0 : index
    %c0_292 = arith.constant 0 : index
    %320 = vector.load %arg6[%c0_289, %c2_290, %c0_291, %c0_292] : memref<3x3x32x8xbf16, #tpu.memory_space<vmem>>, vector<1x1x32x8xbf16>
    %321 = vector.shape_cast %320 : vector<1x1x32x8xbf16> to vector<32x8xbf16>
    %cst_293 = arith.constant dense<0.000000e+00> : vector<28x8xf32>
    %322 = tpu.matmul %314, %321, %cst_293 {dimension_numbers = #tpu.dot_dimension_numbers<[1], [0], [0], [1], [0, 0, 1, 1], [], []>} : vector<28x32xbf16>, vector<32x8xbf16>, vector<28x8xf32> -> vector<28x8xf32>
    %c1_294 = arith.constant 1 : index
    %c2_295 = arith.constant 2 : index
    %c0_296 = arith.constant 0 : index
    %c0_297 = arith.constant 0 : index
    %323 = vector.load %arg6[%c1_294, %c2_295, %c0_296, %c0_297] : memref<3x3x32x8xbf16, #tpu.memory_space<vmem>>, vector<1x1x32x8xbf16>
    %324 = vector.shape_cast %323 : vector<1x1x32x8xbf16> to vector<32x8xbf16>
    %cst_298 = arith.constant dense<0.000000e+00> : vector<28x8xf32>
    %325 = tpu.matmul %314, %324, %cst_298 {dimension_numbers = #tpu.dot_dimension_numbers<[1], [0], [0], [1], [0, 0, 1, 1], [], []>} : vector<28x32xbf16>, vector<32x8xbf16>, vector<28x8xf32> -> vector<28x8xf32>
    %c2_299 = arith.constant 2 : index
    %c2_300 = arith.constant 2 : index
    %c0_301 = arith.constant 0 : index
    %c0_302 = arith.constant 0 : index
    %326 = vector.load %arg6[%c2_299, %c2_300, %c0_301, %c0_302] : memref<3x3x32x8xbf16, #tpu.memory_space<vmem>>, vector<1x1x32x8xbf16>
    %327 = vector.shape_cast %326 : vector<1x1x32x8xbf16> to vector<32x8xbf16>
    %cst_303 = arith.constant dense<0.000000e+00> : vector<28x8xf32>
    %328 = tpu.matmul %314, %327, %cst_303 {dimension_numbers = #tpu.dot_dimension_numbers<[1], [0], [0], [1], [0, 0, 1, 1], [], []>} : vector<28x32xbf16>, vector<32x8xbf16>, vector<28x8xf32> -> vector<28x8xf32>
    %c2_304 = arith.constant 2 : index
    %c2_305 = arith.constant 2 : index
    %c0_306 = arith.constant 0 : index
    %c0_307 = arith.constant 0 : index
    %329 = vector.load %arg6[%c2_304, %c2_305, %c0_306, %c0_307] : memref<3x3x32x8xbf16, #tpu.memory_space<vmem>>, vector<1x1x32x8xbf16>
    %330 = vector.shape_cast %329 : vector<1x1x32x8xbf16> to vector<32x8xbf16>
    %cst_308 = arith.constant dense<0.000000e+00> : vector<28x8xf32>
    %331 = tpu.matmul %316, %330, %cst_308 {dimension_numbers = #tpu.dot_dimension_numbers<[1], [0], [0], [1], [0, 0, 1, 1], [], []>} : vector<28x32xbf16>, vector<32x8xbf16>, vector<28x8xf32> -> vector<28x8xf32>
    %332 = arith.addf %319, %325 : vector<28x8xf32>
    %333 = arith.addf %332, %328 : vector<28x8xf32>
    %334 = arith.addf %304, %333 : vector<28x8xf32>
    %335 = arith.addf %322, %325 : vector<28x8xf32>
    %336 = arith.addf %335, %328 : vector<28x8xf32>
    %337 = arith.addf %307, %336 : vector<28x8xf32>
    %338 = arith.addf %322, %325 : vector<28x8xf32>
    %339 = arith.addf %338, %331 : vector<28x8xf32>
    %340 = arith.addf %310, %339 : vector<28x8xf32>
    %c0_309 = arith.constant 0 : index
    %c0_310 = arith.constant 0 : index
    %341 = vector.load %arg7[%c0_309, %c0_310] : memref<1x8xf32, #tpu.memory_space<vmem>>, vector<1x8xf32>
    %342 = vector.broadcast %341 : vector<1x8xf32> to vector<28x8xf32>
    %343 = arith.addf %334, %342 : vector<28x8xf32>
    %cst_311 = arith.constant 0.000000e+00 : f32
    %344 = vector.broadcast %cst_311 : f32 to vector<28x8xf32>
    %345 = arith.cmpf ogt, %343, %344 : vector<28x8xf32>
    %346 = math.exp %343 : vector<28x8xf32>
    %cst_312 = arith.constant 1.000000e+00 : f32
    %347 = vector.broadcast %cst_312 : f32 to vector<28x8xf32>
    %348 = arith.subf %346, %347 : vector<28x8xf32>
    %cst_313 = arith.constant 1.67326319 : f32
    %349 = vector.broadcast %cst_313 : f32 to vector<28x8xf32>
    %350 = arith.mulf %349, %348 : vector<28x8xf32>
    %351 = arith.select %345, %343, %350 : vector<28x8xi1>, vector<28x8xf32>
    %cst_314 = arith.constant 1.05070102 : f32
    %352 = vector.broadcast %cst_314 : f32 to vector<28x8xf32>
    %353 = arith.mulf %352, %351 : vector<28x8xf32>
    %354 = vector.broadcast %341 : vector<1x8xf32> to vector<28x8xf32>
    %355 = arith.addf %337, %354 : vector<28x8xf32>
    %cst_315 = arith.constant 0.000000e+00 : f32
    %356 = vector.broadcast %cst_315 : f32 to vector<28x8xf32>
    %357 = arith.cmpf ogt, %355, %356 : vector<28x8xf32>
    %358 = math.exp %355 : vector<28x8xf32>
    %cst_316 = arith.constant 1.000000e+00 : f32
    %359 = vector.broadcast %cst_316 : f32 to vector<28x8xf32>
    %360 = arith.subf %358, %359 : vector<28x8xf32>
    %cst_317 = arith.constant 1.67326319 : f32
    %361 = vector.broadcast %cst_317 : f32 to vector<28x8xf32>
    %362 = arith.mulf %361, %360 : vector<28x8xf32>
    %363 = arith.select %357, %355, %362 : vector<28x8xi1>, vector<28x8xf32>
    %cst_318 = arith.constant 1.05070102 : f32
    %364 = vector.broadcast %cst_318 : f32 to vector<28x8xf32>
    %365 = arith.mulf %364, %363 : vector<28x8xf32>
    %366 = vector.broadcast %341 : vector<1x8xf32> to vector<28x8xf32>
    %367 = arith.addf %340, %366 : vector<28x8xf32>
    %cst_319 = arith.constant 0.000000e+00 : f32
    %368 = vector.broadcast %cst_319 : f32 to vector<28x8xf32>
    %369 = arith.cmpf ogt, %367, %368 : vector<28x8xf32>
    %370 = math.exp %367 : vector<28x8xf32>
    %cst_320 = arith.constant 1.000000e+00 : f32
    %371 = vector.broadcast %cst_320 : f32 to vector<28x8xf32>
    %372 = arith.subf %370, %371 : vector<28x8xf32>
    %cst_321 = arith.constant 1.67326319 : f32
    %373 = vector.broadcast %cst_321 : f32 to vector<28x8xf32>
    %374 = arith.mulf %373, %372 : vector<28x8xf32>
    %375 = arith.select %369, %367, %374 : vector<28x8xi1>, vector<28x8xf32>
    %cst_322 = arith.constant 1.05070102 : f32
    %376 = vector.broadcast %cst_322 : f32 to vector<28x8xf32>
    %377 = arith.mulf %376, %375 : vector<28x8xf32>
    %c0_323 = arith.constant 0 : index
    %c0_324 = arith.constant 0 : index
    %c0_325 = arith.constant 0 : index
    %c0_326 = arith.constant 0 : index
    %378 = vector.load %arg8[%c0_323, %c0_324, %c0_325, %c0_326] : memref<1x28x28x8xf32, #tpu.memory_space<vmem>>, vector<1x1x28x8xf32>
    %379 = vector.shape_cast %378 : vector<1x1x28x8xf32> to vector<28x8xf32>
    %380 = vector.shape_cast %353 : vector<28x8xf32> to vector<1x1x28x8xf32>
    tpu.vector_store %arg8[%c0_323, %c0_324, %c0_325, %c0_326], %380 {strides = array<i32>} : memref<1x28x28x8xf32, #tpu.memory_space<vmem>>, vector<1x1x28x8xf32>,
    %381 = vector.shape_cast %365 : vector<28x8xf32> to vector<1x28x8xf32>
    %382 = vector.shape_cast %381 : vector<1x28x8xf32> to vector<1x28x8xf32>
    %383 = vector.broadcast %382 : vector<1x28x8xf32> to vector<26x28x8xf32>
    %c0_327 = arith.constant 0 : index
    %c1_328 = arith.constant 1 : index
    %c0_329 = arith.constant 0 : index
    %c0_330 = arith.constant 0 : index
    %384 = vector.load %arg8[%c0_327, %c1_328, %c0_329, %c0_330] : memref<1x28x28x8xf32, #tpu.memory_space<vmem>>, vector<1x26x28x8xf32>
    %385 = vector.shape_cast %384 : vector<1x26x28x8xf32> to vector<26x28x8xf32>
    %386 = vector.shape_cast %383 : vector<26x28x8xf32> to vector<1x26x28x8xf32>
    tpu.vector_store %arg8[%c0_327, %c1_328, %c0_329, %c0_330], %386 {strides = array<i32>} : memref<1x28x28x8xf32, #tpu.memory_space<vmem>>, vector<1x26x28x8xf32>,
    %c0_331 = arith.constant 0 : index
    %c27 = arith.constant 27 : index
    %c0_332 = arith.constant 0 : index
    %c0_333 = arith.constant 0 : index
    %387 = vector.load %arg8[%c0_331, %c27, %c0_332, %c0_333] : memref<1x28x28x8xf32, #tpu.memory_space<vmem>>, vector<1x1x28x8xf32>
    %388 = vector.shape_cast %387 : vector<1x1x28x8xf32> to vector<28x8xf32>
    %389 = vector.shape_cast %377 : vector<28x8xf32> to vector<1x1x28x8xf32>
    tpu.vector_store %arg8[%c0_331, %c27, %c0_332, %c0_333], %389 {strides = array<i32>} : memref<1x28x28x8xf32, #tpu.memory_space<vmem>>, vector<1x1x28x8xf32>,
    return
  }
  func.func @transform_0(%arg0: i32) -> (i32, i32, i32) {
    %c0_i32 = arith.constant 0 : i32
    %c0_i32_0 = arith.constant 0 : i32
    %c0_i32_1 = arith.constant 0 : i32
    return %arg0, %c0_i32, %c0_i32_0 : i32, i32, i32
  }
  func.func @transform_1(%arg0: i32) -> (i32, i32, i32, i32) {
    %c0_i32 = arith.constant 0 : i32
    %c0_i32_0 = arith.constant 0 : i32
    %c0_i32_1 = arith.constant 0 : i32
    %c0_i32_2 = arith.constant 0 : i32
    %c0_i32_3 = arith.constant 0 : i32
    return %c0_i32, %c0_i32_0, %c0_i32_1, %c0_i32_2 : i32, i32, i32, i32
  }
  func.func @transform_2(%arg0: i32) -> (i32, i32) {
    %c0_i32 = arith.constant 0 : i32
    %c0_i32_0 = arith.constant 0 : i32
    %c0_i32_1 = arith.constant 0 : i32
    return %c0_i32, %c0_i32_0 : i32, i32
  }
  func.func @transform_3(%arg0: i32) -> (i32, i32, i32, i32) {
    %c0_i32 = arith.constant 0 : i32
    %c0_i32_0 = arith.constant 0 : i32
    %c0_i32_1 = arith.constant 0 : i32
    %c0_i32_2 = arith.constant 0 : i32
    %c0_i32_3 = arith.constant 0 : i32
    return %c0_i32, %c0_i32_0, %c0_i32_1, %c0_i32_2 : i32, i32, i32, i32
  }
  func.func @transform_4(%arg0: i32) -> (i32, i32) {
    %c0_i32 = arith.constant 0 : i32
    %c0_i32_0 = arith.constant 0 : i32
    %c0_i32_1 = arith.constant 0 : i32
    return %c0_i32, %c0_i32_0 : i32, i32
  }
  func.func @transform_5(%arg0: i32) -> (i32, i32, i32, i32) {
    %c0_i32 = arith.constant 0 : i32
    %c0_i32_0 = arith.constant 0 : i32
    %c0_i32_1 = arith.constant 0 : i32
    %c0_i32_2 = arith.constant 0 : i32
    %c0_i32_3 = arith.constant 0 : i32
    return %c0_i32, %c0_i32_0, %c0_i32_1, %c0_i32_2 : i32, i32, i32, i32
  }
  func.func @transform_6(%arg0: i32) -> (i32, i32) {
    %c0_i32 = arith.constant 0 : i32
    %c0_i32_0 = arith.constant 0 : i32
    %c0_i32_1 = arith.constant 0 : i32
    return %c0_i32, %c0_i32_0 : i32, i32
  }
  func.func @transform_7(%arg0: i32) -> (i32, i32, i32, i32) {
    %c0_i32 = arith.constant 0 : i32
    %c0_i32_0 = arith.constant 0 : i32
    %c0_i32_1 = arith.constant 0 : i32
    %c0_i32_2 = arith.constant 0 : i32
    return %arg0, %c0_i32, %c0_i32_0, %c0_i32_1 : i32, i32, i32, i32
  }
}

</mosaic_0001>

<bundles_post_ra>
// kernel: _lambda_.1
= control target key start
LH: loop header
LB: loop body
LE: loop exit
PB: predicated region body
PF: predicated region fallthrough
CT: control target
= control target key end

     0   :  { %s4483_s24 = smov 0   ;;  %s5704_s0 = inlined_call_operand.vmem [shape: bf16[2,34,128], index: 0, kind: input, shape index: {}]   ;;  %s5705_s1 = inlined_call_operand.vmem [shape: bf16[3,3,128,64], index: 1, kind: input, shape index: {}]   ;;  %s5706_s2 = inlined_call_operand.vmem [shape: f32[1,64], index: 2, kind: input, shape index: {}]   ;;  %s5707_s3 = inlined_call_operand.vmem [shape: bf16[3,3,64,32], index: 3, kind: input, shape index: {}]   ;;  %s5708_s4 = inlined_call_operand.vmem [shape: f32[1,32], index: 4, kind: input, shape index: {}]   ;;  %s5709_s5 = inlined_call_operand.vmem [shape: bf16[3,3,32,8], index: 5, kind: input, shape index: {}]   ;;  %s5710_s6 = inlined_call_operand.vmem [shape: f32[1,8], index: 6, kind: input, shape index: {}]   ;;  %s5711_s7 = inlined_call_operand.vmem [shape: f32[2,28,28,8], index: 7, kind: output, shape index: {}]  }
   0x1 LB: > { %s3196_s25 = sadd.s32 4294967295, %s4441_s24   ;;  %p3200_p0 = scmp.ge.s32.totalorder %s4441_s24, 1  ;;  %s4441_s24 = sphi %s4483_s24, %s17_s24  }
   0x2   : > { %p237_p1 = scmp.lt.s32.totalorder %s4441_s24, 3 }
   0x4   : > { %p238_p2 = pnand %p3200_p0, %p237_p1 }
   0x5   : > { %p269_p3 = scmp.lt.s32.totalorder (!%p238_p2), %s3196_s25, 1 }
   0x6   : > { %241 = sbr.rel (%p238_p2) target bundleno = 916 (0x394), region = 48 }
   0xb   : > { %v4166_v0 = vld [vmem:[%s5705_s1 + $0xf8] sm:$0xff]  ;;  %v4165_v4 = vld [vmem:[%s5705_s1 + $0xf0] sm:$0xff]  ;;  %s5713_s25 = smov (!%p269_p3, %s3196_s25), 1  ;;  %v4164_v8 = vld [vmem:[%s5705_s1 + $0xe8] sm:$0xff]  ;;  %vm619_vm0 = vsmask.f32 7424 }
   0xc   : > { %v4174_v1 = vld [vmem:[%s5705_s1 + $0x1b8] sm:$0xff]  ;;  %377 = vmatpush.bf16.msra.mxu0 %v4166_v0  ;;  %v4173_v5 = vld [vmem:[%s5705_s1 + $0x1b0] sm:$0xff]  ;;  %v4172_v9 = vld [vmem:[%s5705_s1 + $0x1a8] sm:$0xff]  ;;  %s4335_s29 = smul.u32 20, %s5713_s25  ;;  %vm918_vm1 = vcmask 1046528   ;;  %vm1204_vm3 = vcmask 519168  }
   0xd   : > { %v4158_v2 = vld [vmem:[%s5705_s1 + $0x38] sm:$0xff]  ;;  %461 = vmatpush.bf16.msra.mxu1 %v4174_v1  ;;  %v4157_v6 = vld [vmem:[%s5705_s1 + $0x30] sm:$0xff]  ;;  %v4156_v10 = vld [vmem:[%s5705_s1 + $0x28] sm:$0xff]  ;;  %vm1354_vm6 = vcmask 523264   ;;  %s4336_s16 = smul.u32 896, %s5713_s25 }
   0xe   : > { %v4191_v3 = vld [vmem:[%s5705_s1 + $0x138] sm:$0xff]  ;;  %536 = vmatpush.bf16.msra.mxu2 %v4158_v2  ;;  %v4190_v7 = vld [vmem:[%s5705_s1 + $0x130] sm:$0xff]  ;;  %v4189_v11 = vld [vmem:[%s5705_s1 + $0x128] sm:$0xff]  ;;  %s4545_s17 = scalar_lea.vmem %s5704_s0, %s4335_s29 }
   0xf   : > { %690 = vmatpush.bf16.msra.mxu3 %v4191_v3  ;;  %v4163_v12 = vld [vmem:[%s5705_s1 + $0xe0] sm:$0xff]  ;;  %v4162_v16 = vld [vmem:[%s5705_s1 + $0xd8] sm:$0xff]  ;;  %v4161_v21 = vld [vmem:[%s5705_s1 + $0xd0] sm:$0xff]  ;;  %s5419_s20 = scalar_lea.vmem %s5711_s7, %s4336_s16 }
  0x10   : > { %378 = vmatpush.bf16.msra.mxu0 %v4165_v4  ;;  %v4171_v13 = vld [vmem:[%s5705_s1 + $0x1a0] sm:$0xff]  ;;  %v4170_v17 = vld [vmem:[%s5705_s1 + $0x198] sm:$0xff]  ;;  %v4169_v22 = vld [vmem:[%s5705_s1 + $0x190] sm:$0xff] }
  0x11   : > { %462 = vmatpush.bf16.msra.mxu1 %v4173_v5  ;;  %v4155_v14 = vld [vmem:[%s5705_s1 + $0x20] sm:$0xff]  ;;  %v4154_v18 = vld [vmem:[%s5705_s1 + $0x18] sm:$0xff]  ;;  %v4153_v23 = vld [vmem:[%s5705_s1 + $0x10] sm:$0xff] }
  0x12   : > { %537 = vmatpush.bf16.msra.mxu2 %v4157_v6  ;;  %v4188_v15 = vld [vmem:[%s5705_s1 + $0x120] sm:$0xff]  ;;  %v4187_v19 = vld [vmem:[%s5705_s1 + $0x118] sm:$0xff]  ;;  %v4186_v24 = vld [vmem:[%s5705_s1 + $0x110] sm:$0xff] }
  0x13   : > { %691 = vmatpush.bf16.msra.mxu3 %v4190_v7  ;;  %v4279_v20 = vld [vmem:[%s4545_s17] sm:$0xff]   ;;  %v4573_v25 = vld [vmem:[%s4545_s17 + $0x8] sm:$0xff]  ;;  %v4199_v40 = vld [vmem:[%s5705_s1 + $0x1f8] sm:$0xff] }
  0x14   : > { %379 = vmatpush.bf16.msra.mxu0 %v4164_v8  ;;  %v623_v26 = vshll.u32 %v4279_v20, 16  ;;  %v4160_v27 = vld [vmem:[%s5705_s1 + $0xc8] sm:$0xff]  ;;  %v621_v31 = vshrl.u32 %v4279_v20, 16  ;;  %v628_v33 = vshll.u32 %v4573_v25, 16  ;;  %v4159_v34 = vld [vmem:[%s5705_s1 + $0xc0] sm:$0xff]  ;;  %v4183_v41 = vld [vmem:[%s5705_s1 + $0x78] sm:$0xff] }
  0x15   : > { %463 = vmatpush.bf16.msra.mxu1 %v4172_v9  ;;  %v4168_v28 = vld [vmem:[%s5705_s1 + $0x188] sm:$0xff]  ;;  %v4167_v35 = vld [vmem:[%s5705_s1 + $0x180] sm:$0xff]  ;;  %v571_v42 = vld [vmem:[%s4545_s17 + $0x10] sm:$0x1]  ;;  %v632_v57 = vshrl.u32 %v4573_v25, 16 }
  0x16   : > { %538 = vmatpush.bf16.msra.mxu2 %v4156_v10  ;;  %v4152_v29 = vld [vmem:[%s5705_s1 + $0x8] sm:$0xff]  ;;  %v625_v32 = vrot.slane %v623_v26, 1  ;;  %v4151_v36 = vld [vmem:[%s5705_s1] sm:$0xff]  ;;  %v630_v39 = vrot.slane %v628_v33, 1  ;;  %v4215_v45 = vld [vmem:[%s5705_s1 + $0x178] sm:$0xff]  ;;  %v615_v47 = vunpack.c.l.b16 %v571_v42 }
  0x17   : > { %692 = vmatpush.bf16.msra.mxu3 %v4189_v11  ;;  %v4185_v30 = vld [vmem:[%s5705_s1 + $0x108] sm:$0xff]  ;;  %v4184_v37 = vld [vmem:[%s5705_s1 + $0x100] sm:$0xff]  ;;  %v4223_v46 = vld [vmem:[%s5705_s1 + $0x238] sm:$0xff] }
  0x18   : > { %380 = vmatpush.bf16.msra.mxu0 %v4163_v12  ;;  %v626_v38 = vor.u32 %v625_v32, %v621_v31  ;;  %v4149_v43 = vld [vmem:[%s4545_s17] sm:$0xff]  ;;  %v4198_v48 = vld [vmem:[%s5705_s1 + $0x1f0] sm:$0xff]  ;;  %v4630_v52 = vpack.c.b16 %v615_v47, %v615_v47  ;;  %v4197_v53 = vld [vmem:[%s5705_s1 + $0x1e8] sm:$0xff]  ;;  %v634_v63 = vor.u32 %v632_v57, %v630_v39 }
  0x19   : > { %464 = vmatpush.bf16.msra.mxu1 %v4171_v13  ;;  %v4182_v49 = vld [vmem:[%s5705_s1 + $0x70] sm:$0xff]  ;;  %v4181_v54 = vld [vmem:[%s5705_s1 + $0x68] sm:$0xff]  ;;  %v4196_v59 = vld [vmem:[%s5705_s1 + $0x1e0] sm:$0xff] }
  0x1a   : > { %539 = vmatpush.bf16.msra.mxu2 %v4155_v14  ;;  %v4609_v44 = vsel %vm619_vm0, %v626_v38, %v630_v39  ;;  %v4214_v50 = vld [vmem:[%s5705_s1 + $0x170] sm:$0xff]  ;;  %v4213_v55 = vld [vmem:[%s5705_s1 + $0x168] sm:$0xff]  ;;  %v636_v58 = vshll.u32 %v4630_v52, 16  ;;  %v4180_v60 = vld [vmem:[%s5705_s1 + $0x60] sm:$0xff] }
  0x1b   : > { %693 = vmatpush.bf16.msra.mxu3 %v4188_v15  ;;  %v4222_v51 = vld [vmem:[%s5705_s1 + $0x230] sm:$0xff]  ;;  %v4221_v56 = vld [vmem:[%s5705_s1 + $0x228] sm:$0xff]  ;;  %v4212_v61 = vld [vmem:[%s5705_s1 + $0x160] sm:$0xff] }
  0x1c   : > { %381 = vmatpush.bf16.msra.mxu0 %v4162_v16  ;;  %v4220_v62 = vld [vmem:[%s5705_s1 + $0x220] sm:$0xff]  ;;  %v638_v0 = vrot.slane %v636_v58, 1  ;;  %v4195_v1 = vld [vmem:[%s5705_s1 + $0x1d8] sm:$0xff]  ;;  %v4150_v3 = vld [vmem:[%s4545_s17 + $0x8] sm:$0xff] }
  0x1d   : > { %465 = vmatpush.bf16.msra.mxu1 %v4170_v17  ;;  %v4179_v2 = vld [vmem:[%s5705_s1 + $0x58] sm:$0xff]  ;;  %v4194_v7 = vld [vmem:[%s5705_s1 + $0x1d0] sm:$0xff]  ;;  %v4193_v11 = vld [vmem:[%s5705_s1 + $0x1c8] sm:$0xff] }
  0x1e   : > { %540 = vmatpush.bf16.msra.mxu2 %v4154_v18  ;;  %v4666_v4 = vsel %vm619_vm0, %v634_v63, %v638_v0  ;;  %v4211_v5 = vld [vmem:[%s5705_s1 + $0x158] sm:$0xff]  ;;  %v4178_v8 = vld [vmem:[%s5705_s1 + $0x50] sm:$0xff]  ;;  %v4177_v12 = vld [vmem:[%s5705_s1 + $0x48] sm:$0xff] }
  0x1f   : > { %694 = vmatpush.bf16.msra.mxu3 %v4187_v19  ;;  %v4219_v6 = vld [vmem:[%s5705_s1 + $0x218] sm:$0xff]  ;;  %v4210_v9 = vld [vmem:[%s5705_s1 + $0x150] sm:$0xff]  ;;  %v4306_v13 = vld [vmem:[%s4545_s17] sm:$0xf0] }
  0x20   : > { %382 = vmatpush.bf16.msra.mxu0 %v4161_v21  ;;  %v4218_v10 = vld [vmem:[%s5705_s1 + $0x210] sm:$0xff]  ;;  %v4307_v14 = vld [vmem:[%s4545_s17] sm:$0xe]  ;;  %v4209_v15 = vld [vmem:[%s5705_s1 + $0x148] sm:$0xff] }
  0x21   : > { %466 = vmatpush.bf16.msra.mxu1 %v4169_v22  ;;  %v4217_v16 = vld [vmem:[%s5705_s1 + $0x208] sm:$0xff]  ;;  %v4308_v17 = vor.u32 %v4307_v14, %v4306_v13  ;;  %v4192_v18 = vld [vmem:[%s5705_s1 + $0x1c0] sm:$0xff]  ;;  %v4207_v20 = vld [vmem:[%s5705_s1 + $0xb8] sm:$0xff] }
  0x22   : > { %541 = vmatpush.bf16.msra.mxu2 %v4153_v23  ;;  %v4176_v19 = vld [vmem:[%s5705_s1 + $0x40] sm:$0xff]  ;;  %v4202_v32 = vld [vmem:[%s5705_s1 + $0x90] sm:$0xff]  ;;  %v4201_v33 = vld [vmem:[%s5705_s1 + $0x88] sm:$0xff] }
  0x23   : > { %695 = vmatpush.bf16.msra.mxu3 %v4186_v24  ;;  %v4208_v21 = vld [vmem:[%s5705_s1 + $0x140] sm:$0xff]  ;;  %v919_v23 = vrot.slane %v4308_v17, 1  ;;  %v920_v24 = vrot.slane %v4573_v25, 1  ;;  %v4205_v25 = vld [vmem:[%s5705_s1 + $0xa8] sm:$0xff] }
  0x24   : > { %383 = vmatpush.bf16.msra.mxu0 %v4160_v27  ;;  %v4216_v22 = vld [vmem:[%s5705_s1 + $0x200] sm:$0xff]  ;;  %v4206_v27 = vld [vmem:[%s5705_s1 + $0xb0] sm:$0xff]  ;;  %v4803_v63 = vld [vmem:[%s5707_s3 + $0x8] sm:$0xff] }
  0x25   : > { %467 = vmatpush.bf16.msra.mxu1 %v4168_v28  ;;  %v921_v26 = vsel %vm918_vm1, %v919_v23, %v920_v24  ;;  %v4204_v28 = vld [vmem:[%s5705_s1 + $0xa0] sm:$0xff] }
  0x26   : > { %542 = vmatpush.bf16.msra.mxu2 %v4152_v29  ;;  %v922_v29 = vrot.slane %v4630_v52, 1 }
  0x27   : > { %696 = vmatpush.bf16.msra.mxu3 %v4185_v30  ;;  %v4203_v30 = vld [vmem:[%s5705_s1 + $0x98] sm:$0xff] }
  0x28   : > { %384 = vmatpush.bf16.msra.mxu0 %v4159_v34  ;;  %v923_v31 = vsel %vm918_vm1, %v920_v24, %v922_v29  ;;  %v4200_v34 = vld [vmem:[%s5705_s1 + $0x80] sm:$0xff] }
  0x29   : > { %468 = vmatpush.bf16.msra.mxu1 %v4167_v35 }
  0x2a   : > { %543 = vmatpush.bf16.msra.mxu2 %v4151_v36 }
  0x2b   : > { %697 = vmatpush.bf16.msra.mxu3 %v4184_v37  ;;  %385 = vmatmul.bf16.vlgmr.msra.gmra.mxu0 %v4149_v43 }
  0x2c   : > { %774 = vmatpush.bf16.msrb.mxu0 %v4199_v40  ;;  %469 = vmatmul.bf16.vlgmr.msra.gmra.mxu1 %v4149_v43 }
  0x2d   : > { %849 = vmatpush.bf16.msrb.mxu1 %v4183_v41  ;;  %544 = vmatmul.bf16.vlgmr.msra.gmra.mxu2 %v4149_v43 }
  0x2e   : > { %698 = vmatmul.bf16.vlgmr.msra.gmra.mxu3 %v4609_v44  ;;  %974 = vmatpush.bf16.msrb.mxu2 %v4215_v45 }
  0x2f   : > { %1058 = vmatpush.bf16.msrb.mxu3 %v4223_v46 }
  0x30   : > { %775 = vmatpush.bf16.msrb.mxu0 %v4198_v48 }
  0x31   : > { %850 = vmatpush.bf16.msrb.mxu1 %v4182_v49 }
  0x32   : > { %975 = vmatpush.bf16.msrb.mxu2 %v4214_v50 }
  0x33   : > { %1059 = vmatpush.bf16.msrb.mxu3 %v4222_v51  ;;  %v4776_v51 = vld [vmem:[%s5707_s3 + $0x18] sm:$0xff] }
  0x34   : > { %776 = vmatpush.bf16.msrb.mxu0 %v4197_v53  ;;  %v4782_v53 = vld [vmem:[%s5707_s3 + $0x10] sm:$0xff] }
  0x35   : > { %851 = vmatpush.bf16.msrb.mxu1 %v4181_v54 }
  0x36   : > { %976 = vmatpush.bf16.msrb.mxu2 %v4213_v55 }
  0x37   : > { %1060 = vmatpush.bf16.msrb.mxu3 %v4221_v56 }
  0x38   : > { %777 = vmatpush.bf16.msrb.mxu0 %v4196_v59 }
  0x39   : > { %852 = vmatpush.bf16.msrb.mxu1 %v4180_v60 }
  0x3a   : > { %977 = vmatpush.bf16.msrb.mxu2 %v4212_v61  ;;  %v4796_v61 = vld [vmem:[%s5706_s2] ss:$0 sm:$0xff] }
  0x3b   : > { %1061 = vmatpush.bf16.msrb.mxu3 %v4220_v62  ;;  %390 = vmatmul.bf16.gmra.mxu0 %v4150_v3 }
  0x3c   : > { %778 = vmatpush.bf16.msrb.mxu0 %v4195_v1  ;;  %474 = vmatmul.bf16.gmra.mxu1 %v4150_v3 }
  0x3d   : > { %853 = vmatpush.bf16.msrb.mxu1 %v4179_v2  ;;  %549 = vmatmul.bf16.gmra.mxu2 %v4150_v3  ;;  %v4812_v3 = vld [vmem:[%s5707_s3] sm:$0xff] }
  0x3e   : > { %703 = vmatmul.bf16.gmra.mxu3 %v4666_v4  ;;  %978 = vmatpush.bf16.msrb.mxu2 %v4211_v5 }
  0x3f   : > { %1062 = vmatpush.bf16.msrb.mxu3 %v4219_v6 }
  0x40   : > { %779 = vmatpush.bf16.msrb.mxu0 %v4194_v7 }
  0x41   : > { %854 = vmatpush.bf16.msrb.mxu1 %v4178_v8 }
  0x42   : > { %979 = vmatpush.bf16.msrb.mxu2 %v4210_v9 }
  0x43   : > { %1063 = vmatpush.bf16.msrb.mxu3 %v4218_v10 }
  0x44   : > { %780 = vmatpush.bf16.msrb.mxu0 %v4193_v11 }
  0x45   : > { %855 = vmatpush.bf16.msrb.mxu1 %v4177_v12 }
  0x46   : > { %980 = vmatpush.bf16.msrb.mxu2 %v4209_v15 }
  0x47   : > { %1064 = vmatpush.bf16.msrb.mxu3 %v4217_v16 }
  0x48   : > { %781 = vmatpush.bf16.msrb.mxu0 %v4192_v18 }
  0x49   : > { %856 = vmatpush.bf16.msrb.mxu1 %v4176_v19 }
  0x4a   : > { %981 = vmatpush.bf16.msrb.mxu2 %v4208_v21 }
  0x4b   : > { %1065 = vmatpush.bf16.msrb.mxu3 %v4216_v22  ;;  %782 = vmatmul.bf16.vlgmr.msrb.gmra.mxu0 %v4609_v44 }
  0x4c   : > { %1133 = vmatpush.bf16.msra.mxu0 %v4207_v20  ;;  %857 = vmatmul.bf16.vlgmr.msrb.gmra.mxu1 %v4609_v44 }
  0x4d   : > { %982 = vmatmul.bf16.vlgmr.msrb.gmra.mxu2 %v921_v26 }
  0x4e   : > { %1066 = vmatmul.bf16.vlgmr.msrb.gmra.mxu3 %v921_v26 }
  0x4f   : > { %4327 = vmatpush.bf16.msra.mxu3 %v4207_v20 }
  0x50   : > { %1134 = vmatpush.bf16.msra.mxu0 %v4206_v27 }
  0x53   : > { %4328 = vmatpush.bf16.msra.mxu3 %v4206_v27 }
  0x54   : > { %1135 = vmatpush.bf16.msra.mxu0 %v4205_v25 }
  0x57   : > { %4329 = vmatpush.bf16.msra.mxu3 %v4205_v25 }
  0x58   : > { %1136 = vmatpush.bf16.msra.mxu0 %v4204_v28 }
  0x5b   : > { %4330 = vmatpush.bf16.msra.mxu3 %v4204_v28  ;;  %787 = vmatmul.bf16.gmra.mxu0 %v4666_v4 }
  0x5c   : > { %1137 = vmatpush.bf16.msra.mxu0 %v4203_v30  ;;  %862 = vmatmul.bf16.gmra.mxu1 %v4666_v4 }
  0x5d   : > { %987 = vmatmul.bf16.gmra.mxu2 %v923_v31 }
  0x5e   : > { %1071 = vmatmul.bf16.gmra.mxu3 %v923_v31 }
  0x5f   : > { %4331 = vmatpush.bf16.msra.mxu3 %v4203_v30 }
  0x60   : > { %1138 = vmatpush.bf16.msra.mxu0 %v4202_v32 }
  0x63   : > { %4332 = vmatpush.bf16.msra.mxu3 %v4202_v32 }
  0x64   : > { %1139 = vmatpush.bf16.msra.mxu0 %v4201_v33 }
  0x67   : > { %4333 = vmatpush.bf16.msra.mxu3 %v4201_v33 }
  0x68   : > { %1140 = vmatpush.bf16.msra.mxu0 %v4200_v34 }
  0x6b   : > { %4334 = vmatpush.bf16.msra.mxu3 %v4200_v34  ;;  %1141 = vmatmul.bf16.vlgmr.msra.gmra.mxu0 %v921_v26 }
  0x6c   : > { %1511 = vmatpush.bf16.msrb.mxu0 %v4776_v51 }
  0x6e   : > { %1146 = vmatmul.bf16.vlgmr.msra.gmra.mxu3 %v923_v31 }
  0x70   : > { %1512 = vmatpush.bf16.msrb.mxu0 %v4782_v53 }
  0x74   : > { %1513 = vmatpush.bf16.msrb.mxu0 %v4803_v63 }
  0x78   : > { %1514 = vmatpush.bf16.msrb.mxu0 %v4812_v3 }
  0xa8   : > { %v4745_v35 = vpop.f32.mrf.mxu0 }
  0xa9   : > { %v4747_v36 = vpop.f32.mrf.mxu1 }
  0xaa   : > { %v480_v55 = vadd.f32 %v4747_v36, %v4745_v35 }
  0xb0   : > { %v545_v37 = vpop.f32.mrf.mxu2  ;;  %v4749_v39 = vpop.f32.mrf.mxu0 }
  0xb1   : > { %v699_v38 = vpop.f32.mrf.mxu3  ;;  %v4751_v40 = vpop.f32.mrf.mxu1  ;;  %v546_v25 = vadd.f32 %v545_v37, %v4745_v35 }
  0xb2   : > { %v481_v4 = vadd.f32 %v4751_v40, %v4749_v39 }
  0xb8   : > { %v4753_v41 = vpop.f32.mrf.mxu2  ;;  %v4757_v43 = vpop.f32.mrf.mxu0 }
  0xb9   : > { %v4755_v42 = vpop.f32.mrf.mxu3  ;;  %v4759_v44 = vpop.f32.mrf.mxu1 }
  0xba   : > { %v482_v16 = vadd.f32 %v4759_v44, %v4757_v43 }
  0xc0   : > { %v4761_v45 = vpop.f32.mrf.mxu2  ;;  %v4765_v47 = vpop.f32.mrf.mxu0 }
  0xc1   : > { %v4763_v46 = vpop.f32.mrf.mxu3  ;;  %v4767_v48 = vpop.f32.mrf.mxu1 }
  0xc2   : > { %v483_v34 = vadd.f32 %v4767_v48, %v4765_v47 }
  0xc8   : > { %v4769_v49 = vpop.f32.mrf.mxu2  ;;  %v783_v52 = vpop.f32.mrf.mxu0 }
  0xc9   : > { %v4771_v50 = vpop.f32.mrf.mxu3  ;;  %v793_v54 = vadd.f32 %v783_v52, %v699_v38  ;;  %v858_v56 = vpop.f32.mrf.mxu1 }
  0xca   : > { %v859_v28 = vadd.f32 %v858_v56, %v699_v38 }
  0xcb   : > { %v797_v59 = vadd.f32 %v793_v54, %v480_v55 }
  0xcc   : > { %v868_v35 = vadd.f32 %v859_v28, %v783_v52  ;;  %v876_v52 = vadd.f32 %v859_v28, %v546_v25 }
  0xd0   : > { %v4787_v57 = vpop.f32.mrf.mxu2  ;;  %v4798_v62 = vpop.f32.mrf.mxu0 }
  0xd1   : > { %v4789_v58 = vpop.f32.mrf.mxu3  ;;  %v794_v2 = vadd.f32 %v4798_v62, %v4755_v42  ;;  %v860_v9 = vpop.f32.mrf.mxu1 }
  0xd2   : > { %v1077_v60 = vadd.f32 %v4789_v58, %v4787_v57 }
  0xd3   : > { %v798_v8 = vadd.f32 %v794_v2, %v481_v4 }
  0xd4   : > { %v1081_v0 = vadd.f32 %v1077_v60, %v797_v59  ;;  %v555_v59 = vadd.f32 %v546_v25, %v4747_v36  ;;  %v4851_v60 = vadd.f32 %v4753_v41, %v4749_v39  ;;  %v4235_v36 = vld [vmem:[%s5707_s3 + $0xd8] sm:$0xff]  ;;  %v551_v39 = vadd.f32 %v4761_v45, %v4757_v43  ;;  %v4234_v43 = vld [vmem:[%s5707_s3 + $0xd0] sm:$0xff] }
  0xd5   : > { %1452 = vmatpush.bf16.msrb.mxu3 %v4235_v36  ;;  %1417 = vmatpush.bf16.msra.mxu2 %v4235_v36 }
  0xd6   : > { %v1168_v1 = vadd.f32 %v4796_v61, %v1081_v0  ;;  %v556_v45 = vadd.f32 %v4851_v60, %v4751_v40 }
  0xd8   : > { %v1176_v5 = vmul.f32 1.442695, %v1168_v1  ;;  %v4817_v6 = vpop.f32.mrf.mxu2  ;;  %v788_v11 = vpop.f32.mrf.mxu0  ;;  %vm1172_vm2 = vcmp.gt.f32.partialorder %v1168_v1, 0.0 }
  0xd9   : > { %v4819_v7 = vpop.f32.mrf.mxu3  ;;  %v795_v14 = vadd.f32 %v788_v11, %v4763_v46  ;;  %v863_v26 = vpop.f32.mrf.mxu1  ;;  %1453 = vmatpush.bf16.msrb.mxu3 %v4234_v43  ;;  %1418 = vmatpush.bf16.msra.mxu2 %v4234_v43 }
  0xda   : > { %4348 = vpow2.f32 %v1176_v5  ;;  %v1078_v10 = vadd.f32 %v4819_v7, %v4817_v6  ;;  %v864_v5 = vadd.f32 %v863_v26, %v4763_v46  ;;  %v861_v46 = vadd.f32 %v860_v9, %v4755_v42 }
  0xdb   : > { %v799_v21 = vadd.f32 %v795_v14, %v482_v16  ;;  %v557_v42 = vadd.f32 %v551_v39, %v4759_v44  ;;  %v553_v9 = vadd.f32 %v4769_v49, %v4765_v47 }
  0xdc   : > { %v1082_v12 = vadd.f32 %v1078_v10, %v798_v8  ;;  %v4231_v10 = vld [vmem:[%s5707_s3 + $0x78] sm:$0xff]  ;;  %v869_v47 = vadd.f32 %v861_v46, %v4798_v62  ;;  %v878_v49 = vadd.f32 %v864_v5, %v551_v39 }
  0xdd   : > { %1365 = vmatpush.bf16.msra.mxu1 %v4231_v10 }
  0xde   : > { %v1169_v13 = vadd.f32 %v4796_v61, %v1082_v12  ;;  %v872_v12 = vadd.f32 %v868_v35, %v555_v59  ;;  %v877_v59 = vadd.f32 %v861_v46, %v4851_v60  ;;  %v873_v36 = vadd.f32 %v869_v47, %v556_v45 }
  0xdf   : > { %v558_v60 = vadd.f32 %v553_v9, %v4767_v48  ;;  %v4247_v48 = vld [vmem:[%s5707_s3 + $0xf8] sm:$0xff] }
  0xe0   : > { %v4349_v15 = vpop.eup %4348  ;;  %v1178_v17 = vmul.f32 1.442695, %v1169_v13  ;;  %v4827_v19 = vpop.f32.mrf.mxu2  ;;  %vm1173_vm4 = vcmp.gt.f32.partialorder %v1169_v13, 0.0  ;;  %1735 = vmatpush.bf16.msra.mxu0 %v4247_v48 }
  0xe1   : > { %v3631_v18 = vadd.f32 -1.0, %v4349_v15  ;;  %v4829_v20 = vpop.f32.mrf.mxu3  ;;  %v4833_v23 = vpop.f32.mrf.mxu0 }
  0xe2   : > { %4350 = vpow2.f32 %v1178_v17  ;;  %v1079_v22 = vadd.f32 %v4829_v20, %v4827_v19  ;;  %v796_v32 = vadd.f32 %v4833_v23, %v4771_v50 }
  0xe3   : > { %v1188_v24 = vmul.f32 1.6732632, %v3631_v18 }
  0xe4   : > { %v1083_v27 = vadd.f32 %v1079_v22, %v799_v21  ;;  %v800_v0 = vadd.f32 %v796_v32, %v483_v34  ;;  %v870_v21 = vadd.f32 %v864_v5, %v788_v11 }
  0xe5   : > { %v1192_v29 = vsel %vm1172_vm2, %v1168_v1, %v1188_v24  ;;  %vm2220_vm2 = vcmask 257024  }
  0xe6   : > { %v1196_v30 = vmul.f32 1.050701, %v1192_v29  ;;  %v4837_v31 = vadd.f32 %v4796_v61, %v1083_v27  ;;  %v4230_v27 = vld [vmem:[%s5707_s3 + $0x70] sm:$0xff]  ;;  %v874_v32 = vadd.f32 %v870_v21, %v557_v42 }
  0xe7   : > { %1366 = vmatpush.bf16.msra.mxu1 %v4230_v27 }
  0xe8   : > { %v4351_v33 = vpop.eup %4350  ;;  %v1200_v54 = vpack.c.bf16 %v1196_v30, %v1196_v30  ;;  %v1180_v55 = vmul.f32 1.442695, %v4837_v31  ;;  %v4845_v38 = vpop.f32.mrf.mxu2  ;;  %vm1174_vm5 = vcmp.gt.f32.partialorder %v4837_v31, 0.0 }
  0xe9   : > { %v3632_v37 = vadd.f32 -1.0, %v4351_v33  ;;  %v4847_v56 = vpop.f32.mrf.mxu3  ;;  %v1142_v2 = vpop.f32.mrf.mxu0 }
  0xea   : > { %1205 = vst.msk [vmem:[#allocation2] sm:$0xf] %vm1204_vm3, %v1200_v54  ;;  %4352 = vpow2.f32 %v1180_v55  ;;  %v1080_v1 = vadd.f32 %v4847_v56, %v4845_v38  ;;  %v1143_v8 = vadd.f32 %v1142_v2, %v4787_v57  ;;  %v865_v57 = vpop.f32.mrf.mxu1  ;;  %v4232_v2 = vld [vmem:[%s5707_s3 + $0xc0] sm:$0xff] }
  0xeb   : > { %v1189_v4 = vmul.f32 1.6732632, %v3632_v37  ;;  %v866_v11 = vadd.f32 %v865_v57, %v4771_v50  ;;  %v4233_v50 = vld [vmem:[%s5707_s3 + $0xc8] sm:$0xff] }
  0xec   : > { %v1084_v41 = vadd.f32 %v1080_v1, %v800_v0  ;;  %v1152_v15 = vadd.f32 %v1143_v8, %v4789_v58  ;;  %v1160_v16 = vadd.f32 %v1143_v8, %v876_v52  ;;  %1454 = vmatpush.bf16.msrb.mxu3 %v4233_v50  ;;  %1419 = vmatpush.bf16.msra.mxu2 %v4233_v50 }
  0xed   : > { %v1193_v14 = vsel %vm1173_vm4, %v1169_v13, %v1189_v4  ;;  %v871_v37 = vadd.f32 %v866_v11, %v4833_v23  ;;  %v4228_v23 = vld [vmem:[%s5707_s3 + $0x60] sm:$0xff]  ;;  %v879_v39 = vadd.f32 %v866_v11, %v553_v9 }
  0xee   : > { %v1197_v17 = vmul.f32 1.050701, %v1193_v14  ;;  %v4869_v18 = vadd.f32 %v4796_v61, %v1084_v41  ;;  %v1156_v13 = vadd.f32 %v1152_v15, %v872_v12  ;;  %v4877_v58 = vadd.f32 %v4796_v61, %v1160_v16 }
  0xef   : > { %v875_v16 = vadd.f32 %v871_v37, %v558_v60 }
  0xf0   : > { %v4353_v22 = vpop.eup %4352  ;;  %v1201_v24 = vpack.c.bf16 %v1197_v17, %v1197_v17  ;;  %v1182_v26 = vmul.f32 1.442695, %v4869_v18  ;;  %v4888_v25 = vadd.f32 %v4796_v61, %v1156_v13  ;;  %v1258_v44 = vmul.f32 1.442695, %v4877_v58  ;;  %1455 = vmatpush.bf16.msrb.mxu3 %v4232_v2  ;;  %1420 = vmatpush.bf16.msra.mxu2 %v4232_v2  ;;  %v4246_v13 = vld [vmem:[%s5707_s3 + $0xf0] sm:$0xff] }
  0xf1   : > { %v3633_v40 = vadd.f32 -1.0, %v4353_v22  ;;  %v1147_v28 = vpop.f32.mrf.mxu3  ;;  %v1144_v30 = vpop.f32.mrf.mxu0  ;;  %vm1175_vm7 = vcmp.gt.f32.partialorder %v4869_v18, 0.0  ;;  %vm1254_vm8 = vcmp.gt.f32.partialorder %v4877_v58, 0.0  ;;  %1736 = vmatpush.bf16.msra.mxu0 %v4246_v13 }
  0xf2   : > { %1206 = vst.msk [vmem:[#allocation2 + $0x4] sm:$0xf] %vm1204_vm3, %v1201_v24  ;;  %4354 = vpow2.f32 %v1182_v26  ;;  %v1148_v29 = vadd.f32 %v1147_v28, %v4827_v19  ;;  %v1217_v34 = vmul.f32 1.442695, %v4888_v25  ;;  %v1145_v55 = vadd.f32 %v1144_v30, %v4817_v6  ;;  %v4229_v19 = vld [vmem:[%s5707_s3 + $0x68] sm:$0xff] }
  0xf3   : > { %v1190_v33 = vmul.f32 1.6732632, %v3633_v40  ;;  %4356 = vpow2.f32 %v1258_v44  ;;  %1367 = vmatpush.bf16.msra.mxu1 %v4229_v19  ;;  %vm1213_vm9 = vcmp.gt.f32.partialorder %v4888_v25, 0.0 }
  0xf4   : > { %v1154_v62 = vadd.f32 %v1148_v29, %v4829_v20  ;;  %v1162_v54 = vadd.f32 %v1148_v29, %v878_v49  ;;  %4358 = vpow2.f32 %v1217_v34  ;;  %v1153_v6 = vadd.f32 %v1145_v55, %v4819_v7  ;;  %1693 = vmatpush.bf16.msra.mxu3 %v4247_v48 }
  0xf5   : > { %v1194_v35 = vsel %vm1174_vm5, %v4837_v31, %v1190_v33  ;;  %v1161_v52 = vadd.f32 %v1145_v55, %v877_v59 }
  0xf6   : > { %v1198_v0 = vmul.f32 1.050701, %v1194_v35  ;;  %v1158_v1 = vadd.f32 %v1154_v62, %v874_v32  ;;  %v4908_v20 = vadd.f32 %v4796_v61, %v1162_v54  ;;  %v1157_v10 = vadd.f32 %v1153_v6, %v873_v36 }
  0xf7   : > { %v4923_v12 = vadd.f32 %v4796_v61, %v1161_v52  ;;  %1368 = vmatpush.bf16.msra.mxu1 %v4228_v23 }
  0xf8   : > { %v4355_v31 = vpop.eup %4354  ;;  %v1202_v4 = vpack.c.bf16 %v1198_v0, %v1198_v0  ;;  %v4919_v5 = vadd.f32 %v4796_v61, %v1158_v1  ;;  %v1262_v7 = vmul.f32 1.442695, %v4908_v20  ;;  %v4936_v45 = vadd.f32 %v4796_v61, %v1157_v10  ;;  %1694 = vmatpush.bf16.msra.mxu3 %v4246_v13 }
  0xf9   : > { %v4357_v8 = vpop.eup %4356  ;;  %v3634_v41 = vadd.f32 -1.0, %v4355_v31  ;;  %v1149_v14 = vpop.f32.mrf.mxu3  ;;  %v4925_v15 = vld [vmem:[#allocation2] sm:$0xff]   ;;  %v1260_v21 = vmul.f32 1.442695, %v4923_v12  ;;  %vm1256_vm10 = vcmp.gt.f32.partialorder %v4908_v20, 0.0  ;;  %vm1255_vm13 = vcmp.gt.f32.partialorder %v4923_v12, 0.0 }
  0xfa   : > { %1207 = vst.msk [vmem:[#allocation2 + $0x8] sm:$0xf] %vm1204_vm3, %v1202_v4  ;;  %v3639_v46 = vadd.f32 -1.0, %v4357_v8  ;;  %v1221_v17 = vmul.f32 1.442695, %v4919_v5  ;;  %4360 = vpow2.f32 %v1262_v7  ;;  %3713 = vmatmul.msk.bf16.vlgmr.msrb.gmra.mxu0 %vm1354_vm6, %v4925_v15  ;;  %v4359_v57 = vpop.eup %4358  ;;  %v1150_v9 = vadd.f32 %v1149_v14, %v4845_v38 }
  0xfb   : > { %v1191_v43 = vmul.f32 1.6732632, %v3634_v41  ;;  %v3635_v22 = vadd.f32 -1.0, %v4359_v57  ;;  %1538 = vmatpush.bf16.msrb.mxu1 %v4776_v51  ;;  %v1219_v26 = vmul.f32 1.442695, %v4936_v45  ;;  %v4245_v51 = vld [vmem:[%s5707_s3 + $0xe8] sm:$0xff] }
  0xfc   : > { %v1270_v42 = vmul.f32 1.6732632, %v3639_v46  ;;  %4362 = vpow2.f32 %v1221_v17  ;;  %v1155_v44 = vadd.f32 %v1150_v9, %v4847_v56  ;;  %v1163_v38 = vadd.f32 %v1150_v9, %v879_v39  ;;  %1737 = vmatpush.bf16.msra.mxu0 %v4245_v51  ;;  %1695 = vmatpush.bf16.msra.mxu3 %v4245_v51  ;;  %v4242_v41 = vld [vmem:[%s5707_s3 + $0x90] sm:$0xff] }
  0xfd   : > { %v1195_v24 = vsel %vm1175_vm7, %v4869_v18, %v1191_v43  ;;  %4364 = vpow2.f32 %v1260_v21  ;;  %v1229_v40 = vmul.f32 1.6732632, %v3635_v22  ;;  %vm1215_vm11 = vcmp.gt.f32.partialorder %v4919_v5, 0.0  ;;  %v4241_v43 = vld [vmem:[%s5707_s3 + $0x88] sm:$0xff] }
  0xfe   : > { %v1199_v27 = vmul.f32 1.050701, %v1195_v24  ;;  %v1274_v11 = vsel %vm1254_vm8, %v4877_v58, %v1270_v42  ;;  %4366 = vpow2.f32 %v1219_v26  ;;  %v1159_v29 = vadd.f32 %v1155_v44, %v875_v16 }
  0xff   : > { %v1278_v28 = vmul.f32 1.050701, %v1274_v11  ;;  %v1233_v49 = vsel %vm1213_vm9, %v4888_v25, %v1229_v40  ;;  %1539 = vmatpush.bf16.msrb.mxu1 %v4782_v53  ;;  %v4956_v50 = vadd.f32 %v4796_v61, %v1163_v38  ;;  %v4244_v53 = vld [vmem:[%s5707_s3 + $0xe0] sm:$0xff]  ;;  %vm1214_vm12 = vcmp.gt.f32.partialorder %v4936_v45, 0.0 }
 0x100   : > { %v4361_v18 = vpop.eup %4360  ;;  %v1203_v47 = vpack.c.bf16 %v1199_v27, %v1199_v27  ;;  %v1237_v58 = vmul.f32 1.050701, %v1233_v49  ;;  %v4960_v33 = vadd.f32 %v4796_v61, %v1159_v29  ;;  %1738 = vmatpush.bf16.msra.mxu0 %v4244_v53  ;;  %1696 = vmatpush.bf16.msra.mxu3 %v4244_v53  ;;  %v1755_v60 = vshll.u32 %v4925_v15, 16  ;;  %v4239_v49 = vld [vmem:[%s5707_s3 + $0x38] sm:$0xff]  ;;  %v4258_v29 = vld [vmem:[%s5707_s3 + $0x110] sm:$0xff]  ;;  %v4256_v53 = vld [vmem:[%s5707_s3 + $0x100] sm:$0xff] }
 0x101   : > { %v1282_v56 = vpack.c.bf16 %v1278_v28, %v1278_v28  ;;  %v3641_v30 = vadd.f32 -1.0, %v4361_v18  ;;  %v1264_v61 = vmul.f32 1.442695, %v4956_v50  ;;  %v1753_v21 = vshrl.u32 %v4925_v15, 16  ;;  %v4240_v15 = vld [vmem:[%s5707_s3 + $0x80] sm:$0xff]  ;;  %v4255_v18 = vld [vmem:[%s5707_s3 + $0xb8] sm:$0xff] }
 0x102   : > { %v4363_v32 = vpop.eup %4362  ;;  %1208 = vst.msk [vmem:[#allocation2 + $0xc] sm:$0xf] %vm1204_vm3, %v1203_v47  ;;  %v1241_v62 = vpack.c.bf16 %v1237_v58, %v1237_v58  ;;  %v1223_v19 = vmul.f32 1.442695, %v4960_v33  ;;  %v1757_v17 = vrot.slane %v1755_v60, 1  ;;  %vm1216_vm14 = vcmp.gt.f32.partialorder %v4960_v33, 0.0 }
 0x103   : > { %v4365_v34 = vpop.eup %4364  ;;  %1287 = vst.msk [vmem:[#allocation2 + $0x20] sm:$0xf] %vm1204_vm3, %v1282_v56  ;;  %v3637_v25 = vadd.f32 -1.0, %v4363_v32  ;;  %v1272_v54 = vmul.f32 1.6732632, %v3641_v30  ;;  %1540 = vmatpush.bf16.msrb.mxu1 %v4803_v63  ;;  %vm1257_vm15 = vcmp.gt.f32.partialorder %v4956_v50, 0.0 }
 0x104   : > { %v3640_v55 = vadd.f32 -1.0, %v4365_v34  ;;  %v4367_v59 = vpop.eup %4366  ;;  %1246 = vst.msk [vmem:[#allocation2 + $0x10] sm:$0xf] %vm1204_vm3, %v1241_v62  ;;  %4368 = vpow2.f32 %v1223_v19  ;;  %v1758_v9 = vor.u32 %v1757_v17, %v1753_v21  ;;  %v4259_v47 = vld [vmem:[%s5707_s3 + $0x118] sm:$0xff]  ;;  %v4254_v58 = vld [vmem:[%s5707_s3 + $0xb0] sm:$0xff]  ;;  %v4257_v32 = vld [vmem:[%s5707_s3 + $0x108] sm:$0xff] }
 0x105   : > { %v1231_v35 = vmul.f32 1.6732632, %v3637_v25  ;;  %v1276_v37 = vsel %vm1256_vm10, %v4908_v20, %v1272_v54  ;;  %v3636_v1 = vadd.f32 -1.0, %v4367_v59  ;;  %4370 = vpow2.f32 %v1264_v61  ;;  %v4243_v20 = vld [vmem:[%s5707_s3 + $0x98] sm:$0xff]  ;;  %1972 = vmatpush.bf16.msrb.mxu0 %v4259_v47 }
 0x106   : > { %v1280_v0 = vmul.f32 1.050701, %v1276_v37  ;;  %v1271_v6 = vmul.f32 1.6732632, %v3640_v55  ;;  %1641 = vmatpush.bf16.msrb.mxu2 %v4243_v20  ;;  %v4236_v20 = vld [vmem:[%s5707_s3 + $0x20] sm:$0xff] }
 0x107   : > { %v1235_v2 = vsel %vm1215_vm11, %v4919_v5, %v1231_v35  ;;  %v1230_v52 = vmul.f32 1.6732632, %v3636_v1  ;;  %1541 = vmatpush.bf16.msrb.mxu1 %v4812_v3  ;;  %v4430_v5 = vld [vmem:[#allocation2 + $0x8] sm:$0xf]   ;;  %v4238_v1 = vld [vmem:[%s5707_s3 + $0x30] sm:$0xff]  ;;  %vm2287_vm11 = vcmask 261120  }
 0x108   : > { %v1239_v63 = vmul.f32 1.050701, %v1235_v2  ;;  %v1284_v36 = vpack.c.bf16 %v1280_v0, %v1280_v0  ;;  %v1275_v23 = vsel %vm1255_vm13, %v4923_v12, %v1271_v6  ;;  %v4253_v6 = vld [vmem:[%s5707_s3 + $0xa8] sm:$0xff] }
 0x109   : > { %v1279_v31 = vmul.f32 1.050701, %v1275_v23  ;;  %v4982_v4 = vld [vmem:[#allocation2 + $0x8] sm:$0xff]   ;;  %v1234_v39 = vsel %vm1214_vm12, %v4936_v45, %v1230_v52  ;;  %1973 = vmatpush.bf16.msrb.mxu0 %v4258_v29 }
 0x10a   : > { %v4437_v7 = vld [vmem:[#allocation2 + $0x8] sm:$0x70]  ;;  %v1243_v8 = vpack.c.bf16 %v1239_v63, %v1239_v63  ;;  %1289 = vst.msk [vmem:[#allocation2 + $0x28] sm:$0xf] %vm1204_vm3, %v1284_v36  ;;  %v1238_v3 = vmul.f32 1.050701, %v1234_v39  ;;  %v4369_v12 = vpop.eup %4368  ;;  %1642 = vmatpush.bf16.msrb.mxu2 %v4242_v41 }
 0x10b   : > { %v1283_v10 = vpack.c.bf16 %v1279_v31, %v1279_v31  ;;  %v4431_v14 = vor.u32 %v4437_v7, %v4430_v5  ;;  %v4371_v48 = vpop.eup %4370  ;;  %v3638_v46 = vadd.f32 -1.0, %v4369_v12  ;;  %v1760_v13 = vshll.u32 %v4982_v4, 16  ;;  %v4237_v63 = vld [vmem:[%s5707_s3 + $0x28] sm:$0xff]  ;;  %v4252_v36 = vld [vmem:[%s5707_s3 + $0xa0] sm:$0xff]  ;;  %v4251_v41 = vld [vmem:[%s5707_s3 + $0x58] sm:$0xff] }
 0x10c   : > { %1248 = vst.msk [vmem:[#allocation2 + $0x18] sm:$0xf] %vm1204_vm3, %v1243_v8  ;;  %v1242_v16 = vpack.c.bf16 %v1238_v3, %v1238_v3  ;;  %v3642_v57 = vadd.f32 -1.0, %v4371_v48  ;;  %v4250_v3 = vld [vmem:[%s5707_s3 + $0x50] sm:$0xff]  ;;  %v1764_v21 = vshrl.u32 %v4982_v4, 16 }
 0x10d   : > { %1288 = vst.msk [vmem:[#allocation2 + $0x24] sm:$0xf] %vm1204_vm3, %v1283_v10  ;;  %3714 = vmatmul.msk.bf16.gmra.mxu0 %vm1354_vm6, %v4431_v14  ;;  %v1232_v45 = vmul.f32 1.6732632, %v3638_v46  ;;  %v5003_v24 = vrot.slane %v1760_v13, 1 }
 0x10e   : > { %1247 = vst.msk [vmem:[#allocation2 + $0x14] sm:$0xf] %vm1204_vm3, %v1242_v16  ;;  %v1273_v22 = vmul.f32 1.6732632, %v3642_v57  ;;  %1643 = vmatpush.bf16.msrb.mxu2 %v4241_v43  ;;  %1974 = vmatpush.bf16.msrb.mxu0 %v4257_v32  ;;  %v4310_v12 = vld [vmem:[#allocation2 + $0x10] sm:$0xe] }
 0x10f   : > { %v1236_v42 = vsel %vm1216_vm14, %v4960_v33, %v1232_v45  ;;  %v5011_v11 = vsel %vm619_vm0, %v1758_v9, %v5003_v24  ;;  %v4249_v57 = vld [vmem:[%s5707_s3 + $0x48] sm:$0xff]  ;;  %v4248_v45 = vld [vmem:[%s5707_s3 + $0x40] sm:$0xff]  ;;  %v1766_v13 = vor.u32 %v1764_v21, %v5003_v24  ;;  %vm2224_vm14 = vcmask 256000  }
 0x110   : > { %v1240_v26 = vmul.f32 1.050701, %v1236_v42  ;;  %v1277_v27 = vsel %vm1257_vm15, %v4956_v50, %v1273_v22  ;;  %v4315_v42 = vld [vmem:[#allocation2] sm:$0xf0]  ;;  %v4313_v9 = vld [vmem:[#allocation2 + $0x20] sm:$0xe] }
 0x111   : > { %v1281_v40 = vmul.f32 1.050701, %v1277_v27  ;;  %v4422_v34 = vld [vmem:[#allocation2 + $0x28] sm:$0xf]  }
 0x112   : > { %v1244_v44 = vpack.c.bf16 %v1240_v26, %v1240_v26  ;;  %1644 = vmatpush.bf16.msrb.mxu2 %v4240_v15  ;;  %1975 = vmatpush.bf16.msrb.mxu0 %v4256_v53  ;;  %v4316_v26 = vld [vmem:[#allocation2] sm:$0xe] }
 0x113   : > { %v1285_v38 = vpack.c.bf16 %v1281_v40, %v1281_v40  ;;  %v4435_v50 = vld [vmem:[#allocation2 + $0x18] sm:$0xf]   ;;  %v4317_v15 = vor.u32 %v4316_v26, %v4315_v42 }
 0x114   : > { %v4291_v28 = vld [vmem:[#allocation2 + $0x20] sm:$0xff]   ;;  %1249 = vst.msk [vmem:[#allocation2 + $0x1c] sm:$0xf] %vm1204_vm3, %v1244_v44 }
 0x115   : > { %3695 = vmatmul.msk.bf16.vlgmr.msrb.gmra.mxu3 %vm1354_vm6, %v4291_v28  ;;  %v4287_v51 = vld [vmem:[#allocation2 + $0x10] sm:$0xff]   ;;  %1290 = vst.msk [vmem:[#allocation2 + $0x2c] sm:$0xf] %vm1204_vm3, %v1285_v38  ;;  %v1713_v56 = vshll.u32 %v4291_v28, 16  ;;  %v1711_v55 = vshrl.u32 %v4291_v28, 16  ;;  %v2021_v28 = vrot.slane %v4317_v15, 1 }
 0x116   : > { %3667 = vmatmul.msk.bf16.vlgmr.msra.gmra.mxu1 %vm1354_vm6, %v4287_v51  ;;  %3693 = vmatmul.msk.bf16.vlgmr.msra.gmra.mxu2 %vm1354_vm6, %v4287_v51  ;;  %v1595_v2 = vshll.u32 %v4287_v51, 16  ;;  %v1593_v31 = vshrl.u32 %v4287_v51, 16  ;;  %v4309_v10 = vld [vmem:[#allocation2 + $0x10] sm:$0xf0]  ;;  %v4312_v22 = vld [vmem:[#allocation2 + $0x20] sm:$0xf0] }
 0x117   : > { %1920 = vmatpush.bf16.msrb.mxu3 %v4255_v18  ;;  %1801 = vmatpush.bf16.msra.mxu1 %v4239_v49  ;;  %v1715_v54 = vrot.slane %v1713_v56, 1  ;;  %v4311_v14 = vor.u32 %v4310_v12, %v4309_v10  ;;  %v4314_v27 = vor.u32 %v4313_v9, %v4312_v22 }
 0x118   : > { %1828 = vmatpush.bf16.msra.mxu2 %v4239_v49  ;;  %v1597_v23 = vrot.slane %v1595_v2, 1 }
 0x119   : > { %v1716_v59 = vor.u32 %v1715_v54, %v1711_v55  ;;  %v1883_v17 = vrot.slane %v4311_v14, 1  ;;  %v1990_v44 = vrot.slane %v4314_v27, 1 }
 0x11a   : > { %v1598_v5 = vor.u32 %v1597_v23, %v1593_v31 }
 0x11b   : > { %v5033_v30 = vld [vmem:[#allocation2 + $0x18] sm:$0xff]   ;;  %1921 = vmatpush.bf16.msrb.mxu3 %v4254_v58  ;;  %1802 = vmatpush.bf16.msra.mxu1 %v4238_v1 }
 0x11c   : > { %v5038_v33 = vld [vmem:[#allocation2 + $0x28] sm:$0xff]   ;;  %v4438_v25 = vld [vmem:[#allocation2 + $0x18] sm:$0x70]  ;;  %1829 = vmatpush.bf16.msra.mxu2 %v4238_v1  ;;  %v1600_v52 = vshll.u32 %v5033_v30, 16  ;;  %v1604_v48 = vshrl.u32 %v5033_v30, 16  ;;  %v1884_v16 = vrot.slane %v5033_v30, 1 }
 0x11d   : > { %v4432_v62 = vld [vmem:[#allocation2 + $0x28] sm:$0x70]  ;;  %v1718_v19 = vshll.u32 %v5038_v33, 16  ;;  %v4436_v37 = vor.u32 %v4438_v25, %v4435_v50  ;;  %v1722_v7 = vshrl.u32 %v5038_v33, 16  ;;  %v1991_v40 = vrot.slane %v5038_v33, 1 }
 0x11e   : > { %v4423_v61 = vor.u32 %v4432_v62, %v4422_v34  ;;  %v1602_v60 = vrot.slane %v1600_v52, 1  ;;  %v1885_v43 = vsel %vm918_vm1, %v1883_v17, %v1884_v16 }
 0x11f   : > { %v1720_v35 = vrot.slane %v1718_v19, 1  ;;  %1922 = vmatpush.bf16.msrb.mxu3 %v4253_v6  ;;  %1803 = vmatpush.bf16.msra.mxu1 %v4237_v63  ;;  %v1992_v24 = vsel %vm918_vm1, %v1990_v44, %v1991_v40 }
 0x120   : > { %1830 = vmatpush.bf16.msra.mxu2 %v4237_v63  ;;  %v1603_v8 = vsel %vm619_vm0, %v1598_v5, %v1602_v60  ;;  %v1606_v46 = vor.u32 %v1604_v48, %v1602_v60 }
 0x121   : > { %v1721_v0 = vsel %vm619_vm0, %v1716_v59, %v1720_v35  ;;  %v1724_v39 = vor.u32 %v1722_v7, %v1720_v35 }
 0x122   : > { %3777 = vmatmul.msk.bf16.vlgmr.msra.gmra.mxu0 %vm1354_vm6, %v1721_v0 }
 0x123   : > { %1923 = vmatpush.bf16.msrb.mxu3 %v4252_v36  ;;  %1804 = vmatpush.bf16.msra.mxu1 %v4236_v20 }
 0x124   : > { %1831 = vmatpush.bf16.msra.mxu2 %v4236_v20 }
 0x125   : > { %3696 = vmatmul.msk.bf16.gmra.mxu3 %vm1354_vm6, %v4423_v61 }
 0x126   : > { %3668 = vmatmul.msk.bf16.gmra.mxu1 %vm1354_vm6, %v4436_v37  ;;  %3694 = vmatmul.msk.bf16.gmra.mxu2 %vm1354_vm6, %v4436_v37 }
 0x132   : > { %3778 = vmatmul.msk.bf16.gmra.mxu0 %vm1354_vm6, %v1724_v39 }
 0x135   : > { %3775 = vmatmul.msk.bf16.vlgmr.msra.gmra.mxu3 %vm1354_vm6, %v1603_v8 }
 0x136   : > { %3715 = vmatmul.msk.bf16.vlgmr.msrb.gmra.mxu1 %vm1354_vm6, %v4287_v51  ;;  %3749 = vmatmul.msk.bf16.vlgmr.msrb.gmra.mxu2 %vm1354_vm6, %v1603_v8 }
 0x137   : > { %2003 = vmatpush.bf16.msrb.mxu1 %v4259_v47  ;;  %2085 = vmatpush.bf16.msra.mxu3 %v4251_v41 }
 0x138   : > { %2058 = vmatpush.bf16.msrb.mxu2 %v4251_v41 }
 0x13b   : > { %2004 = vmatpush.bf16.msrb.mxu1 %v4258_v29  ;;  %2086 = vmatpush.bf16.msra.mxu3 %v4250_v3 }
 0x13c   : > { %2059 = vmatpush.bf16.msrb.mxu2 %v4250_v3 }
 0x13f   : > { %2005 = vmatpush.bf16.msrb.mxu1 %v4257_v32  ;;  %2087 = vmatpush.bf16.msra.mxu3 %v4249_v57 }
 0x140   : > { %2060 = vmatpush.bf16.msrb.mxu2 %v4249_v57 }
 0x142   : > { %3857 = vmatmul.msk.bf16.vlgmr.msrb.gmra.mxu0 %vm1354_vm6, %v1885_v43 }
 0x143   : > { %2006 = vmatpush.bf16.msrb.mxu1 %v4256_v53  ;;  %2088 = vmatpush.bf16.msra.mxu3 %v4248_v45 }
 0x144   : > { %2061 = vmatpush.bf16.msrb.mxu2 %v4248_v45 }
 0x145   : > { %3776 = vmatmul.msk.bf16.gmra.mxu3 %vm1354_vm6, %v1606_v46 }
 0x146   : > { %3716 = vmatmul.msk.bf16.gmra.mxu1 %vm1354_vm6, %v4436_v37  ;;  %3750 = vmatmul.msk.bf16.gmra.mxu2 %vm1354_vm6, %v1606_v46 }
 0x152   : > { %3858 = vmatmul.msk.bf16.gmra.mxu0 %vm1354_vm6, %v1884_v16 }
 0x155   : > { %3831 = vmatmul.msk.bf16.vlgmr.msrb.gmra.mxu3 %vm1354_vm6, %v1885_v43 }
 0x156   : > { %3795 = vmatmul.msk.bf16.vlgmr.msra.gmra.mxu1 %vm1354_vm6, %v5011_v11  ;;  %3797 = vmatmul.msk.bf16.vlgmr.msra.gmra.mxu2 %vm1354_vm6, %v1603_v8  ;;  %v2022_v11 = vrot.slane %v4982_v4, 1 }
 0x158   : > { %v2023_v38 = vsel %vm918_vm1, %v2021_v28, %v2022_v11 }
 0x165   : > { %3832 = vmatmul.msk.bf16.gmra.mxu3 %vm1354_vm6, %v1884_v16 }
 0x166   : > { %3796 = vmatmul.msk.bf16.gmra.mxu1 %vm1354_vm6, %v1766_v13  ;;  %3798 = vmatmul.msk.bf16.gmra.mxu2 %vm1354_vm6, %v1606_v46 }
 0x175   : > { %3879 = vmatmul.msk.bf16.vlgmr.msra.gmra.mxu3 %vm1354_vm6, %v1885_v43 }
 0x176   : > { %3859 = vmatmul.msk.bf16.vlgmr.msrb.gmra.mxu1 %vm1354_vm6, %v1992_v24  ;;  %3877 = vmatmul.msk.bf16.vlgmr.msrb.gmra.mxu2 %vm1354_vm6, %v2023_v38 }
 0x177   : > { %v1516_v51 = vpop.f32.mrf.mxu0 }
 0x17f   : > { %v5110_v58 = vpop.f32.mrf.mxu0 }
 0x185   : > { %3880 = vmatmul.msk.bf16.gmra.mxu3 %vm1354_vm6, %v1884_v16 }
 0x186   : > { %3860 = vmatmul.msk.bf16.gmra.mxu1 %vm1354_vm6, %v1991_v40  ;;  %3878 = vmatmul.msk.bf16.gmra.mxu2 %vm1354_vm6, %v2022_v11 }
 0x18a   : > { %v1521_v32 = vpop.f32.mrf.mxu0 }
 0x192   : > { %v5124_v52 = vpop.f32.mrf.mxu0 }
 0x193   : > { %v1370_v4 = vpop.f32.mrf.mxu1 }
 0x194   : > { %v1517_v47 = vadd.f32 %v1516_v51, %v1370_v4 }
 0x198   : > { %v1457_v18 = vpop.f32.mrf.mxu3 }
 0x199   : > { %v1422_v49 = vpop.f32.mrf.mxu2 }
 0x19a   : > { %v1526_v29 = vadd.f32 %v1517_v47, %v1422_v49 }
 0x19b   : > { %v5112_v56 = vpop.f32.mrf.mxu1 }
 0x19f   : > { %v1740_v8 = vpop.f32.mrf.mxu0 }
 0x1a0   : > { %v5114_v30 = vpop.f32.mrf.mxu3 }
 0x1a1   : > { %v5116_v50 = vpop.f32.mrf.mxu2 }
 0x1a3   : > { %v1375_v33 = vpop.f32.mrf.mxu1 }
 0x1a4   : > { %v1522_v34 = vadd.f32 %v1521_v32, %v1375_v33 }
 0x1a7   : > { %v1742_v12 = vpop.f32.mrf.mxu0 }
 0x1a8   : > { %v1462_v62 = vpop.f32.mrf.mxu3 }
 0x1a9   : > { %v1427_v25 = vpop.f32.mrf.mxu2 }
 0x1aa   : > { %v1528_v54 = vadd.f32 %v1522_v34, %v1427_v25 }
 0x1ab   : > { %v5118_v53 = vpop.f32.mrf.mxu1 }
 0x1af   : > { %v1745_v13 = vpop.f32.mrf.mxu0 }
 0x1b0   : > { %v5120_v55 = vpop.f32.mrf.mxu3 }
 0x1b1   : > { %v5122_v19 = vpop.f32.mrf.mxu2 }
 0x1b3   : > { %v1543_v61 = vpop.f32.mrf.mxu1 }
 0x1b4   : > { %v1544_v59 = vadd.f32 %v1543_v61, %v1370_v4 }
 0x1b6   : > { %v1553_v35 = vadd.f32 %v1544_v59, %v1422_v49  ;;  %v1561_v37 = vadd.f32 %v1544_v59, %v1457_v18  ;;  %v5147_v59 = vld [vmem:[%s5708_s4] ss:$0 sm:$0xff] }
 0x1b7   : > { %v5138_v11 = vpop.f32.mrf.mxu0 }
 0x1b8   : > { %v1698_v0 = vpop.f32.mrf.mxu3 }
 0x1b9   : > { %v1646_v1 = vpop.f32.mrf.mxu2 }
 0x1bb   : > { %v1545_v6 = vpop.f32.mrf.mxu1 }
 0x1bf   : > { %v1977_v18 = vpop.f32.mrf.mxu0 }
 0x1c0   : > { %v1700_v2 = vpop.f32.mrf.mxu3 }
 0x1c1   : > { %v1648_v63 = vpop.f32.mrf.mxu2 }
 0x1c3   : > { %v1548_v36 = vpop.f32.mrf.mxu1 }
 0x1c4   : > { %v1549_v23 = vadd.f32 %v1548_v36, %v1375_v33 }
 0x1c6   : > { %v1555_v20 = vadd.f32 %v1549_v23, %v1427_v25  ;;  %v5126_v31 = vadd.f32 %v1549_v23, %v1462_v62 }
 0x1c8   : > { %v1703_v60 = vpop.f32.mrf.mxu3 }
 0x1c9   : > { %v1651_v5 = vpop.f32.mrf.mxu2 }
 0x1cb   : > { %v5128_v7 = vpop.f32.mrf.mxu1 }
 0x1d0   : > { %v5130_v39 = vpop.f32.mrf.mxu3 }
 0x1d1   : > { %v5132_v41 = vpop.f32.mrf.mxu2 }
 0x1d3   : > { %v1806_v3 = vpop.f32.mrf.mxu1 }
 0x1d4   : > { %v1807_v10 = vadd.f32 %v1806_v3, %v1646_v1 }
 0x1d6   : > { %v1816_v14 = vadd.f32 %v1807_v10, %v1698_v0 }
 0x1d8   : > { %v1925_v48 = vpop.f32.mrf.mxu3  ;;  %v1820_v16 = vadd.f32 %v1816_v14, %v1526_v29 }
 0x1d9   : > { %v1833_v46 = vpop.f32.mrf.mxu2 }
 0x1da   : > { %v1834_v17 = vadd.f32 %v1833_v46, %v1646_v1  ;;  %v1546_v1 = vadd.f32 %v1545_v6, %v5112_v56 }
 0x1db   : > { %v1808_v57 = vpop.f32.mrf.mxu1 }
 0x1dc   : > { %v1843_v43 = vadd.f32 %v1834_v17, %v1698_v0  ;;  %v1851_v47 = vadd.f32 %v1834_v17, %v1740_v8  ;;  %v1809_v34 = vadd.f32 %v1808_v57, %v1648_v63  ;;  %v1519_v0 = vadd.f32 %v5110_v58, %v5112_v56 }
 0x1dd   : > { %v1524_v56 = vadd.f32 %v5124_v52, %v5118_v53  ;;  %v1554_v6 = vadd.f32 %v1546_v1, %v5116_v50  ;;  %v1562_v14 = vadd.f32 %v1546_v1, %v5114_v30 }
 0x1de   : > { %v1847_v45 = vadd.f32 %v1843_v43, %v1553_v35  ;;  %v1855_v33 = vadd.f32 %v1851_v47, %v1561_v37  ;;  %v1527_v37 = vadd.f32 %v1519_v0, %v5116_v50 }
 0x1e0   : > { %v1927_v21 = vpop.f32.mrf.mxu3 }
 0x1e1   : > { %v1835_v22 = vpop.f32.mrf.mxu2 }
 0x1e2   : > { %v1836_v25 = vadd.f32 %v1835_v22, %v1648_v63  ;;  %v4265_v63 = vld [vmem:[%s5709_s5 + $0x68] sm:$0xff] }
 0x1e3   : > { %v1811_v42 = vpop.f32.mrf.mxu1  ;;  %2371 = vmatpush.bf16.msra.mxu2 %v4265_v63  ;;  %2336 = vmatpush.bf16.msra.mxu1 %v4265_v63 }
 0x1e4   : > { %v1812_v9 = vadd.f32 %v1811_v42, %v1651_v5  ;;  %v1844_v8 = vadd.f32 %v1836_v25, %v1700_v2  ;;  %v1852_v46 = vadd.f32 %v1836_v25, %v1742_v12  ;;  %v4263_v12 = vld [vmem:[%s5709_s5 + $0x38] sm:$0xff]  ;;  %v4260_v25 = vld [vmem:[%s5709_s5] sm:$0xff] }
 0x1e5   : > { %2300 = vmatpush.bf16.msra.mxu0 %v4263_v12 }
 0x1e6   : > { %v1818_v26 = vadd.f32 %v1812_v9, %v1703_v60  ;;  %v1848_v42 = vadd.f32 %v1844_v8, %v1554_v6 }
 0x1e8   : > { %v5134_v27 = vpop.f32.mrf.mxu3  ;;  %v5136_v15 = vadd.f32 %v1818_v26, %v1528_v54 }
 0x1e9   : > { %v1838_v40 = vpop.f32.mrf.mxu2 }
 0x1ea   : > { %v1839_v44 = vadd.f32 %v1838_v40, %v1651_v5  ;;  %v1979_v5 = vpop.f32.mrf.mxu0 }
 0x1eb   : > { %v1813_v24 = vpop.f32.mrf.mxu1 }
 0x1ec   : > { %v1845_v28 = vadd.f32 %v1839_v44, %v1703_v60  ;;  %v1817_v60 = vadd.f32 %v1809_v34, %v1700_v2  ;;  %v1814_v2 = vadd.f32 %v1813_v24, %v5132_v41  ;;  %v1853_v26 = vadd.f32 %v1839_v44, %v1745_v13  ;;  %v4264_v13 = vld [vmem:[%s5709_s5 + $0x60] sm:$0xff]  ;;  %v4262_v44 = vld [vmem:[%s5709_s5 + $0x30] sm:$0xff] }
 0x1ed   : > { %2372 = vmatpush.bf16.msra.mxu2 %v4264_v13  ;;  %2337 = vmatpush.bf16.msra.mxu1 %v4264_v13 }
 0x1ee   : > { %v5140_v38 = vadd.f32 %v1845_v28, %v1555_v20  ;;  %v1821_v22 = vadd.f32 %v1817_v60, %v1527_v37  ;;  %v1819_v28 = vadd.f32 %v1814_v2, %v5130_v39  ;;  %2301 = vmatpush.bf16.msra.mxu0 %v4262_v44 }
 0x1f0   : > { %v5142_v51 = vpop.f32.mrf.mxu3 }
 0x1f1   : > { %v1840_v4 = vpop.f32.mrf.mxu2 }
 0x1f2   : > { %v1841_v52 = vadd.f32 %v1840_v4, %v5132_v41  ;;  %v1856_v41 = vadd.f32 %v1852_v46, %v1562_v14 }
 0x1f3   : > { %v2008_v49 = vpop.f32.mrf.mxu1 }
 0x1f4   : > { %v1854_v47 = vadd.f32 %v1841_v52, %v5138_v11  ;;  %v1857_v11 = vadd.f32 %v1853_v26, %v5126_v31  ;;  %v4269_v26 = vld [vmem:[%s5709_s5 + $0x48] sm:$0xff] }
 0x1f5   : > { %2528 = vmatpush.bf16.msrb.mxu1 %v4269_v26 }
 0x1f8   : > { %v2090_v29 = vpop.f32.mrf.mxu3 }
 0x1f9   : > { %v2091_v32 = vadd.f32 %v2090_v29, %v1925_v48  ;;  %v2063_v62 = vpop.f32.mrf.mxu2 }
 0x1fa   : > { %v2064_v35 = vadd.f32 %v2063_v62, %v1925_v48 }
 0x1fb   : > { %v2100_v54 = vadd.f32 %v2091_v32, %v1977_v18  ;;  %v2108_v61 = vadd.f32 %v2091_v32, %v2008_v49  ;;  %v2010_v43 = vpop.f32.mrf.mxu1  ;;  %v1529_v49 = vadd.f32 %v1524_v56, %v5122_v19 }
 0x1fc   : > { %v2073_v20 = vadd.f32 %v2064_v35, %v1977_v18  ;;  %v1846_v18 = vadd.f32 %v1841_v52, %v5130_v39 }
 0x1fd   : > { %v2104_v36 = vadd.f32 %v2100_v54, %v1847_v45  ;;  %v2112_v23 = vadd.f32 %v2108_v61, %v1855_v33  ;;  %v1982_v61 = vpop.f32.mrf.mxu0 }
 0x1fe   : > { %v2077_v58 = vadd.f32 %v2073_v20, %v1820_v16  ;;  %v1551_v16 = vadd.f32 %v5128_v7, %v5118_v53  ;;  %v4261_v7 = vld [vmem:[%s5709_s5 + $0x8] sm:$0xff] }
 0x1ff   : > { %v5157_v3 = vadd.f32 %v5147_v59, %v2104_v36  ;;  %v5160_v10 = vadd.f32 %v5147_v59, %v2112_v23  ;;  %2418 = vmatpush.bf16.msrb.mxu3 %v4261_v7  ;;  %2445 = vmatpush.bf16.msrb.mxu0 %v4261_v7 }
 0x200   : > { %v2092_v48 = vpop.f32.mrf.mxu3  ;;  %v5173_v50 = vadd.f32 %v5147_v59, %v2077_v58  ;;  %v1556_v29 = vadd.f32 %v1551_v16, %v5122_v19  ;;  %v1564_v39 = vadd.f32 %v1551_v16, %v5120_v55  ;;  %v5201_v19 = vadd.f32 %v1819_v28, %v1529_v49 }
 0x201   : > { %v2160_v17 = vmul.f32 1.442695, %v5157_v3  ;;  %v2192_v57 = vmul.f32 1.442695, %v5160_v10  ;;  %v2093_v30 = vadd.f32 %v2092_v48, %v1927_v21  ;;  %v2065_v45 = vpop.f32.mrf.mxu2  ;;  %vm2156_vm3 = vcmp.gt.f32.partialorder %v5157_v3, 0.0 }
 0x202   : > { %v2066_v9 = vadd.f32 %v2065_v45, %v1927_v21  ;;  %v2128_v40 = vmul.f32 1.442695, %v5173_v50  ;;  %v5210_v1 = vadd.f32 %v1846_v18, %v1556_v29  ;;  %v5212_v36 = vadd.f32 %v1854_v47, %v1564_v39 }
 0x203   : > { %4372 = vpow2.f32 %v2160_v17  ;;  %v2101_v53 = vadd.f32 %v2093_v30, %v1979_v5  ;;  %v2109_v24 = vadd.f32 %v2093_v30, %v2010_v43  ;;  %2419 = vmatpush.bf16.msrb.mxu3 %v4260_v25  ;;  %vm2188_vm4 = vcmp.gt.f32.partialorder %v5160_v10, 0.0  ;;  %2446 = vmatpush.bf16.msrb.mxu0 %v4260_v25 }
 0x204   : > { %4374 = vpow2.f32 %v2192_v57  ;;  %v2074_v4 = vadd.f32 %v2066_v9, %v1979_v5  ;;  %v2013_v5 = vpop.f32.mrf.mxu1  ;;  %vm2124_vm5 = vcmp.gt.f32.partialorder %v5173_v50, 0.0 }
 0x205   : > { %4376 = vpow2.f32 %v2128_v40  ;;  %v2105_v21 = vadd.f32 %v2101_v53, %v1848_v42  ;;  %v2113_v32 = vadd.f32 %v2109_v24, %v1856_v41  ;;  %v1984_v28 = vpop.f32.mrf.mxu0 }
 0x206   : > { %v2078_v33 = vadd.f32 %v2074_v4, %v1821_v22 }
 0x207   : > { %v5196_v34 = vadd.f32 %v5147_v59, %v2105_v21  ;;  %v5204_v35 = vadd.f32 %v5147_v59, %v2113_v32 }
 0x208   : > { %v2095_v62 = vpop.f32.mrf.mxu3  ;;  %v5207_v55 = vadd.f32 %v5147_v59, %v2078_v33 }
 0x209   : > { %v4373_v54 = vpop.eup %4372  ;;  %v2096_v31 = vadd.f32 %v2095_v62, %v5134_v27  ;;  %v2162_v20 = vmul.f32 1.442695, %v5196_v34  ;;  %v2068_v37 = vpop.f32.mrf.mxu2  ;;  %v2194_v63 = vmul.f32 1.442695, %v5204_v35  ;;  %vm2157_vm6 = vcmp.gt.f32.partialorder %v5196_v34, 0.0 }
 0x20a   : > { %v4375_v0 = vpop.eup %4374  ;;  %v3885_v23 = vadd.f32 -1.0, %v4373_v54  ;;  %v2130_v56 = vmul.f32 1.442695, %v5207_v55  ;;  %v2069_v57 = vadd.f32 %v2068_v37, %v5134_v27  ;;  %vm2189_vm7 = vcmp.gt.f32.partialorder %v5204_v35, 0.0 }
 0x20b   : > { %v3889_v60 = vadd.f32 -1.0, %v4375_v0  ;;  %v4377_v8 = vpop.eup %4376  ;;  %4378 = vpow2.f32 %v2162_v20  ;;  %v2102_v6 = vadd.f32 %v2096_v31, %v1982_v61  ;;  %v2110_v46 = vadd.f32 %v2096_v31, %v2013_v5 }
 0x20c   : > { %v2172_v58 = vmul.f32 1.6732632, %v3885_v23  ;;  %v3881_v48 = vadd.f32 -1.0, %v4377_v8  ;;  %4380 = vpow2.f32 %v2194_v63  ;;  %v2015_v39 = vpop.f32.mrf.mxu1  ;;  %vm2125_vm8 = vcmp.gt.f32.partialorder %v5207_v55, 0.0 }
 0x20d   : > { %v2204_v14 = vmul.f32 1.6732632, %v3889_v60  ;;  %4382 = vpow2.f32 %v2130_v56  ;;  %v2106_v17 = vadd.f32 %v2102_v6, %v5140_v38  ;;  %v2114_v30 = vadd.f32 %v2110_v46, %v1857_v11 }
 0x20e   : > { %v2176_v2 = vsel %vm2156_vm3, %v5157_v3, %v2172_v58  ;;  %v2140_v52 = vmul.f32 1.6732632, %v3881_v48  ;;  %v2075_v3 = vadd.f32 %v2069_v57, %v1982_v61 }
 0x20f   : > { %v2180_v43 = vmul.f32 1.050701, %v2176_v2  ;;  %v2208_v16 = vsel %vm2188_vm4, %v5160_v10, %v2204_v14  ;;  %v5227_v12 = vadd.f32 %v5147_v59, %v2106_v17  ;;  %v5231_v27 = vadd.f32 %v5147_v59, %v2114_v30  ;;  %v4271_v10 = vld [vmem:[%s5709_s5 + $0x78] sm:$0xff] }
 0x210   : > { %v2212_v45 = vmul.f32 1.050701, %v2208_v16  ;;  %v2097_v22 = vpop.f32.mrf.mxu3  ;;  %v2144_v38 = vsel %vm2124_vm5, %v5173_v50, %v2140_v52  ;;  %v2079_v18 = vadd.f32 %v2075_v3, %v5136_v15  ;;  %2564 = vmatpush.bf16.msrb.mxu2 %v4271_v10  ;;  %2606 = vmatpush.bf16.msra.mxu3 %v4271_v10 }
 0x211   : > { %v2226_v42 = vpack.c.bf16 %v2180_v43, %v2180_v43  ;;  %v2098_v9 = vadd.f32 %v2097_v22, %v5142_v51  ;;  %v4379_v40 = vpop.eup %4378  ;;  %v2148_v7 = vmul.f32 1.050701, %v2144_v38  ;;  %v2164_v50 = vmul.f32 1.442695, %v5227_v12  ;;  %v2070_v47 = vpop.f32.mrf.mxu2 }
 0x212   : > { %v2235_v53 = vpack.c.bf16 %v2212_v45, %v2212_v45  ;;  %v4381_v41 = vpop.eup %4380  ;;  %v3886_v24 = vadd.f32 -1.0, %v4379_v40  ;;  %v2196_v4 = vmul.f32 1.442695, %v5231_v27  ;;  %v5248_v33 = vadd.f32 %v5147_v59, %v2079_v18 }
 0x213   : > { %2231 = vst.msk [vmem:[#allocation3 + $0x10] sm:$0xf] %vm2220_vm2, %v2226_v42  ;;  %v4383_v21 = vpop.eup %4382  ;;  %v2216_v13 = vpack.c.bf16 %v2148_v7, %v2148_v7  ;;  %v3890_v44 = vadd.f32 -1.0, %v4381_v41  ;;  %4384 = vpow2.f32 %v2164_v50  ;;  %v2103_v49 = vadd.f32 %v2098_v9, %v1984_v28 }
 0x214   : > { %2240 = vst.msk [vmem:[#allocation3 + $0x20] sm:$0xf] %vm2220_vm2, %v2235_v53  ;;  %v2173_v29 = vmul.f32 1.6732632, %v3886_v24  ;;  %v3882_v32 = vadd.f32 -1.0, %v4383_v21  ;;  %4386 = vpow2.f32 %v2196_v4  ;;  %v2111_v62 = vadd.f32 %v2098_v9, %v2015_v39  ;;  %v4275_v39 = vld [vmem:[%s5709_s5 + $0x58] sm:$0xff] }
 0x215   : > { %2221 = vst.msk [vmem:[#allocation3] sm:$0xf] %vm2220_vm2, %v2216_v13  ;;  %v2205_v15 = vmul.f32 1.6732632, %v3890_v44  ;;  %v2107_v11 = vadd.f32 %v2103_v49, %v5210_v1  ;;  %v2071_v25 = vadd.f32 %v2070_v47, %v5142_v51  ;;  %v2132_v31 = vmul.f32 1.442695, %v5248_v33 }
 0x216   : > { %v2177_v54 = vsel %vm2157_vm6, %v5196_v34, %v2173_v29  ;;  %v2141_v61 = vmul.f32 1.6732632, %v3882_v32  ;;  %v2115_v20 = vadd.f32 %v2111_v62, %v5212_v36  ;;  %vm2158_vm9 = vcmp.gt.f32.partialorder %v5227_v12, 0.0 }
 0x217   : > { %v2181_v0 = vmul.f32 1.050701, %v2177_v54  ;;  %v2209_v23 = vsel %vm2189_vm7, %v5204_v35, %v2205_v15  ;;  %v5263_v1 = vadd.f32 %v5147_v59, %v2107_v11  ;;  %4388 = vpow2.f32 %v2132_v31  ;;  %v4267_v15 = vld [vmem:[%s5709_s5 + $0x18] sm:$0xff] }
 0x218   : > { %v2213_v51 = vmul.f32 1.050701, %v2209_v23  ;;  %v2145_v37 = vsel %vm2125_vm8, %v5207_v55, %v2141_v61  ;;  %v2076_v34 = vadd.f32 %v2071_v25, %v1984_v28  ;;  %v2187_v35 = vadd.f32 %v5147_v59, %v2115_v20  ;;  %v4270_v55 = vld [vmem:[%s5709_s5 + $0x70] sm:$0xff] }
 0x219   : > { %v4385_v60 = vpop.eup %4384  ;;  %v2227_v63 = vpack.c.bf16 %v2181_v0, %v2181_v0  ;;  %v2149_v5 = vmul.f32 1.050701, %v2145_v37  ;;  %v2166_v8 = vmul.f32 1.442695, %v5263_v1  ;;  %2565 = vmatpush.bf16.msrb.mxu2 %v4270_v55  ;;  %2607 = vmatpush.bf16.msra.mxu3 %v4270_v55  ;;  %vm2190_vm10 = vcmp.gt.f32.partialorder %v5231_v27, 0.0  ;;  %v4266_v55 = vld [vmem:[%s5709_s5 + $0x10] sm:$0xff] }
 0x21a   : > { %v4387_v58 = vpop.eup %4386  ;;  %v2236_v56 = vpack.c.bf16 %v2213_v51, %v2213_v51  ;;  %v3887_v6 = vadd.f32 -1.0, %v4385_v60  ;;  %v2080_v36 = vadd.f32 %v2076_v34, %v5201_v19  ;;  %v4268_v19 = vld [vmem:[%s5709_s5 + $0x40] sm:$0xff]  ;;  %v2198_v57 = vmul.f32 1.442695, %v2187_v35 }
 0x21b   : > { %2232 = vst.msk [vmem:[#allocation3 + $0x14] sm:$0xf] %vm2220_vm2, %v2227_v63  ;;  %v2217_v14 = vpack.c.bf16 %v2149_v5, %v2149_v5  ;;  %v3891_v48 = vadd.f32 -1.0, %v4387_v58  ;;  %4390 = vpow2.f32 %v2166_v8  ;;  %2529 = vmatpush.bf16.msrb.mxu1 %v4268_v19  ;;  %vm2126_vm12 = vcmp.gt.f32.partialorder %v5248_v33, 0.0 }
 0x21c   : > { %2241 = vst.msk [vmem:[#allocation3 + $0x24] sm:$0xf] %vm2220_vm2, %v2236_v56  ;;  %v2174_v46 = vmul.f32 1.6732632, %v3887_v6  ;;  %v2123_v2 = vadd.f32 %v5147_v59, %v2080_v36  ;;  %4392 = vpow2.f32 %v2198_v57  ;;  %vm2159_vm13 = vcmp.gt.f32.partialorder %v5263_v1, 0.0 }
 0x21d   : > { %2222 = vst.msk [vmem:[#allocation3 + $0x4] sm:$0xf] %vm2220_vm2, %v2217_v14  ;;  %v2206_v17 = vmul.f32 1.6732632, %v3891_v48  ;;  %v4389_v43 = vpop.eup %4388  ;;  %vm2191_vm15 = vcmp.gt.f32.partialorder %v2187_v35, 0.0  ;;  %v4274_v14 = vld [vmem:[%s5709_s5 + $0x50] sm:$0xff] }
 0x21e   : > { %v2178_v16 = vsel %vm2158_vm9, %v5227_v12, %v2174_v46  ;;  %v2134_v52 = vmul.f32 1.442695, %v2123_v2  ;;  %v3883_v45 = vadd.f32 -1.0, %v4389_v43  ;;  %vm2127_vm3 = vcmp.gt.f32.partialorder %v2123_v2, 0.0  ;;  %v4277_v46 = vld [vmem:[%s5709_s5 + $0x88] sm:$0xff] }
 0x21f   : > { %v2182_v30 = vmul.f32 1.050701, %v2178_v16  ;;  %v2210_v59 = vsel %vm2190_vm10, %v5231_v27, %v2206_v17  ;;  %v4276_v17 = vld [vmem:[%s5709_s5 + $0x80] sm:$0xff] }
 0x220   : > { %v2214_v3 = vmul.f32 1.050701, %v2210_v59  ;;  %4394 = vpow2.f32 %v2134_v52  ;;  %v2142_v38 = vmul.f32 1.6732632, %v3883_v45 }
 0x221   : > { %v4391_v22 = vpop.eup %4390  ;;  %v2228_v42 = vpack.c.bf16 %v2182_v30, %v2182_v30 }
 0x222   : > { %v2237_v9 = vpack.c.bf16 %v2214_v3, %v2214_v3  ;;  %v3888_v10 = vadd.f32 -1.0, %v4391_v22  ;;  %v5284_v12 = vld [vmem:[#allocation3 + $0x10] sm:$0xff]   ;;  %v2146_v26 = vsel %vm2126_vm12, %v5248_v33, %v2142_v38  ;;  %v4393_v7 = vpop.eup %4392 }
 0x223   : > { %2233 = vst.msk [vmem:[#allocation3 + $0x18] sm:$0xf] %vm2220_vm2, %v2228_v42  ;;  %3905 = vmatmul.msk.bf16.vlgmr.msra.gmra.mxu0 %vm2287_vm11, %v5284_v12  ;;  %3919 = vmatmul.msk.bf16.vlgmr.msra.gmra.mxu1 %vm2287_vm11, %v5284_v12  ;;  %v5292_v27 = vld [vmem:[#allocation3 + $0x20] sm:$0xff]   ;;  %v2150_v40 = vmul.f32 1.050701, %v2146_v26  ;;  %v3892_v4 = vadd.f32 -1.0, %v4393_v7 }
 0x224   : > { %2242 = vst.msk [vmem:[#allocation3 + $0x28] sm:$0xf] %vm2220_vm2, %v2237_v9  ;;  %v2175_v53 = vmul.f32 1.6732632, %v3888_v10  ;;  %3921 = vmatmul.msk.bf16.vlgmr.msra.gmra.mxu2 %vm2287_vm11, %v5292_v27  ;;  %v5298_v50 = vld [vmem:[#allocation3] sm:$0xff]   ;;  %2687 = vmatpush.bf16.msra.mxu1 %v4267_v15  ;;  %v2492_v48 = vshll.u32 %v5284_v12, 16 }
 0x225   : > { %v2218_v28 = vpack.c.bf16 %v2150_v40, %v2150_v40  ;;  %3931 = vmatmul.msk.bf16.vlgmr.msrb.gmra.mxu3 %vm2287_vm11, %v5298_v50  ;;  %v2207_v21 = vmul.f32 1.6732632, %v3892_v4  ;;  %2759 = vmatpush.bf16.msra.mxu2 %v4275_v39  ;;  %v2582_v43 = vshll.u32 %v5292_v27, 16  ;;  %v2490_v16 = vshrl.u32 %v5284_v12, 16  ;;  %v4273_v10 = vld [vmem:[%s5709_s5 + $0x28] sm:$0xff] }
 0x226   : > { %v4395_v41 = vpop.eup %4394  ;;  %v2179_v24 = vsel %vm2159_vm13, %v5263_v1, %v2175_v53  ;;  %2660 = vmatpush.bf16.msra.mxu0 %v4267_v15  ;;  %2795 = vmatpush.bf16.msrb.mxu3 %v4277_v46  ;;  %v2494_v57 = vrot.slane %v2492_v48, 1  ;;  %v2580_v22 = vshrl.u32 %v5292_v27, 16  ;;  %vm3029_vm13 = vcmask 60416  }
 0x227   : > { %v2183_v18 = vmul.f32 1.050701, %v2179_v24  ;;  %v3884_v47 = vadd.f32 -1.0, %v4395_v41  ;;  %2223 = vst.msk [vmem:[#allocation3 + $0x8] sm:$0xf] %vm2220_vm2, %v2218_v28  ;;  %v2211_v49 = vsel %vm2191_vm15, %v2187_v35, %v2207_v21  ;;  %v2584_v45 = vrot.slane %v2582_v43, 1 }
 0x228   : > { %v2215_v29 = vmul.f32 1.050701, %v2211_v49  ;;  %2688 = vmatpush.bf16.msra.mxu1 %v4266_v55  ;;  %v2495_v59 = vor.u32 %v2494_v57, %v2490_v16  ;;  %v4272_v28 = vld [vmem:[%s5709_s5 + $0x20] sm:$0xff]  ;;  %v2624_v24 = vshll.u32 %v5298_v50, 16  ;;  %v2622_v21 = vshrl.u32 %v5298_v50, 16 }
 0x229   : > { %v2229_v13 = vpack.c.bf16 %v2183_v18, %v2183_v18  ;;  %v2143_v44 = vmul.f32 1.6732632, %v3884_v47  ;;  %2760 = vmatpush.bf16.msra.mxu2 %v4274_v14  ;;  %v2585_v38 = vor.u32 %v2584_v45, %v2580_v22  ;;  %v4318_v47 = vld [vmem:[#allocation3 + $0x10] sm:$0xf0] }
 0x22a   : > { %v2238_v11 = vpack.c.bf16 %v2215_v29, %v2215_v29  ;;  %v2250_v25 = vld [vmem:[#allocation3 + $0x18] sm:$0xf]  ;;  %2661 = vmatpush.bf16.msra.mxu0 %v4266_v55  ;;  %2796 = vmatpush.bf16.msrb.mxu3 %v4276_v17  ;;  %v2626_v18 = vrot.slane %v2624_v24, 1 }
 0x22b   : > { %2234 = vst.msk [vmem:[#allocation3 + $0x1c] sm:$0x7] %vm2224_vm14, %v2229_v13  ;;  %v2147_v32 = vsel %vm2127_vm3, %v2123_v2, %v2143_v44  ;;  %v2271_v61 = vunpack.c.l.b16 %v2250_v25  ;;  %v2254_v23 = vld [vmem:[#allocation3 + $0x28] sm:$0xf]  ;;  %v4319_v44 = vld [vmem:[#allocation3 + $0x10] sm:$0xe] }
 0x22c   : > { %v2151_v33 = vmul.f32 1.050701, %v2147_v32  ;;  %2243 = vst.msk [vmem:[#allocation3 + $0x2c] sm:$0x7] %vm2224_vm14, %v2238_v11  ;;  %v2355_v34 = vunpack.c.l.b16 %v2254_v23  ;;  %v2627_v49 = vor.u32 %v2626_v18, %v2622_v21  ;;  %v4320_v29 = vor.u32 %v4319_v44, %v4318_v47  ;;  %v4324_v25 = vld [vmem:[#allocation3] sm:$0xf0] }
 0x22e   : > { %v2219_v62 = vpack.c.bf16 %v2151_v33, %v2151_v33  ;;  %v2246_v1 = vld [vmem:[#allocation3 + $0x8] sm:$0xf]  ;;  %v2732_v39 = vrot.slane %v4320_v29, 1 }
 0x22f   : > { %v2390_v8 = vunpack.c.l.b16 %v2246_v1 }
 0x230   : > { %2225 = vst.msk [vmem:[#allocation3 + $0xc] sm:$0x7] %vm2224_vm14, %v2219_v62  ;;  %v4321_v62 = vld [vmem:[#allocation3 + $0x20] sm:$0xf0] }
 0x232   : > { %v2251_v54 = vld [vmem:[#allocation3 + $0x1c] sm:$0x3] }
 0x233   : > { %v2272_v31 = vunpack.c.l.b16 %v2251_v54  ;;  %v2475_v0 = vld [vmem:[#allocation3 + $0x1c] sm:$0x7]  ;;  %v2255_v37 = vld [vmem:[#allocation3 + $0x2c] sm:$0x3]  ;;  %v4322_v54 = vld [vmem:[#allocation3 + $0x20] sm:$0xe] }
 0x234   : > { %v2488_v51 = vunpack.c.l.b16 %v2475_v0  ;;  %v2356_v60 = vunpack.c.l.b16 %v2255_v37  ;;  %v2476_v5 = vld [vmem:[#allocation3 + $0x2c] sm:$0x7] }
 0x235   : > { %v2274_v20 = vpack.c.b16 %v2272_v31, %v2271_v61  ;;  %v2578_v36 = vunpack.c.l.b16 %v2476_v5  ;;  %v4323_v31 = vor.u32 %v4322_v54, %v4321_v62 }
 0x236   : > { %v2358_v56 = vpack.c.b16 %v2356_v60, %v2355_v34  ;;  %v2489_v6 = vpack.c.b16 %v2488_v51, %v2271_v61  ;;  %v4325_v61 = vld [vmem:[#allocation3] sm:$0xe] }
 0x237   : > { %3906 = vmatmul.msk.bf16.gmra.mxu0 %vm2287_vm11, %v2274_v20  ;;  %3920 = vmatmul.msk.bf16.gmra.mxu1 %vm2287_vm11, %v2274_v20  ;;  %v2247_v63 = vld [vmem:[#allocation3 + $0xc] sm:$0x3]  ;;  %v5327_v19 = vpack.c.b16 %v2578_v36, %v2355_v34  ;;  %v4326_v0 = vor.u32 %v4325_v61, %v4324_v25  ;;  %v2811_v1 = vrot.slane %v4323_v31, 1 }
 0x238   : > { %v2391_v58 = vunpack.c.l.b16 %v2247_v63  ;;  %3922 = vmatmul.msk.bf16.gmra.mxu2 %vm2287_vm11, %v2358_v56  ;;  %v2497_v2 = vshll.u32 %v2489_v6, 16  ;;  %v2474_v26 = vld [vmem:[#allocation3 + $0xc] sm:$0x7]  ;;  %v2733_v32 = vrot.slane %v2489_v6, 1 }
 0x239   : > { %v2587_v30 = vshll.u32 %v5327_v19, 16  ;;  %v2620_v40 = vunpack.c.l.b16 %v2474_v26  ;;  %v2591_v53 = vshrl.u32 %v5327_v19, 16  ;;  %v2812_v23 = vrot.slane %v5327_v19, 1 }
 0x23a   : > { %v2393_v35 = vpack.c.b16 %v2391_v58, %v2390_v8  ;;  %v2499_v52 = vrot.slane %v2497_v2, 1  ;;  %v2734_v15 = vsel %vm918_vm1, %v2732_v39, %v2733_v32  ;;  %v2842_v51 = vrot.slane %v4326_v0, 1 }
 0x23b   : > { %v2589_v42 = vrot.slane %v2587_v30, 1  ;;  %v2621_v7 = vpack.c.b16 %v2620_v40, %v2390_v8  ;;  %v2813_v37 = vsel %vm918_vm1, %v2811_v1, %v2812_v23 }
 0x23c   : > { %3932 = vmatmul.msk.bf16.gmra.mxu3 %vm2287_vm11, %v2393_v35  ;;  %v2500_v3 = vsel %vm619_vm0, %v2495_v59, %v2499_v52 }
 0x23d   : > { %v2590_v9 = vsel %vm619_vm0, %v2585_v38, %v2589_v42  ;;  %v2593_v41 = vor.u32 %v2591_v53, %v2589_v42  ;;  %v2629_v4 = vshll.u32 %v2621_v7, 16  ;;  %v2633_v11 = vshrl.u32 %v2621_v7, 16 }
 0x23f   : > { %v2631_v13 = vrot.slane %v2629_v4, 1 }
 0x241   : > { %v2632_v33 = vsel %vm619_vm0, %v2627_v49, %v2631_v13  ;;  %v2635_v50 = vor.u32 %v2633_v11, %v2631_v13 }
 0x247   : > { %3933 = vmatmul.msk.bf16.vlgmr.msrb.gmra.mxu0 %vm2287_vm11, %v5284_v12  ;;  %3951 = vmatmul.msk.bf16.vlgmr.msrb.gmra.mxu1 %vm2287_vm11, %v2500_v3  ;;  %v2501_v12 = vshrl.u32 %v2489_v6, 16 }
 0x248   : > { %2826 = vmatpush.bf16.msrb.mxu0 %v4277_v46  ;;  %3965 = vmatmul.msk.bf16.vlgmr.msrb.gmra.mxu2 %vm2287_vm11, %v2500_v3 }
 0x249   : > { %2896 = vmatpush.bf16.msrb.mxu2 %v4273_v10  ;;  %2869 = vmatpush.bf16.msrb.mxu1 %v4273_v10  ;;  %v2503_v27 = vor.u32 %v2501_v12, %v2499_v52 }
 0x24c   : > { %3967 = vmatmul.msk.bf16.vlgmr.msra.gmra.mxu3 %vm2287_vm11, %v2590_v9  ;;  %2827 = vmatpush.bf16.msrb.mxu0 %v4276_v17 }
 0x24d   : > { %2897 = vmatpush.bf16.msrb.mxu2 %v4272_v28  ;;  %2870 = vmatpush.bf16.msrb.mxu1 %v4272_v28 }
 0x257   : > { %3934 = vmatmul.msk.bf16.gmra.mxu0 %vm2287_vm11, %v2274_v20  ;;  %3952 = vmatmul.msk.bf16.gmra.mxu1 %vm2287_vm11, %v2503_v27  ;;  %v2843_v20 = vrot.slane %v2621_v7, 1 }
 0x258   : > { %3966 = vmatmul.msk.bf16.gmra.mxu2 %vm2287_vm11, %v2503_v27 }
 0x259   : > { %v2844_v34 = vsel %vm918_vm1, %v2842_v51, %v2843_v20  ;;  %vm3025_vm1 = vcmask 64512  }
 0x25c   : > { %3968 = vmatmul.msk.bf16.gmra.mxu3 %vm2287_vm11, %v2593_v41 }
 0x267   : > { %3977 = vmatmul.msk.bf16.vlgmr.msra.gmra.mxu0 %vm2287_vm11, %v2632_v33  ;;  %3979 = vmatmul.msk.bf16.vlgmr.msra.gmra.mxu1 %vm2287_vm11, %v2500_v3 }
 0x268   : > { %3997 = vmatmul.msk.bf16.vlgmr.msra.gmra.mxu2 %vm2287_vm11, %v2734_v15 }
 0x26c   : > { %4011 = vmatmul.msk.bf16.vlgmr.msrb.gmra.mxu3 %vm2287_vm11, %v2734_v15 }
 0x277   : > { %3978 = vmatmul.msk.bf16.gmra.mxu0 %vm2287_vm11, %v2635_v50  ;;  %3980 = vmatmul.msk.bf16.gmra.mxu1 %vm2287_vm11, %v2503_v27 }
 0x278   : > { %3998 = vmatmul.msk.bf16.gmra.mxu2 %vm2287_vm11, %v2733_v32 }
 0x27c   : > { %4012 = vmatmul.msk.bf16.gmra.mxu3 %vm2287_vm11, %v2733_v32 }
 0x287   : > { %4013 = vmatmul.msk.bf16.vlgmr.msrb.gmra.mxu0 %vm2287_vm11, %v2813_v37  ;;  %4023 = vmatmul.msk.bf16.vlgmr.msrb.gmra.mxu1 %vm2287_vm11, %v2844_v34 }
 0x288   : > { %4025 = vmatmul.msk.bf16.vlgmr.msrb.gmra.mxu2 %vm2287_vm11, %v2734_v15 }
 0x297   : > { %4014 = vmatmul.msk.bf16.gmra.mxu0 %vm2287_vm11, %v2812_v23  ;;  %4024 = vmatmul.msk.bf16.gmra.mxu1 %vm2287_vm11, %v2843_v20 }
 0x298   : > { %4026 = vmatmul.msk.bf16.gmra.mxu2 %vm2287_vm11, %v2733_v32 }
 0x2a0   : > { %v2303_v60 = vpop.f32.mrf.mxu0  ;;  %v2339_v63 = vpop.f32.mrf.mxu1 }
 0x2a7   : > { %v2374_v58 = vpop.f32.mrf.mxu2 }
 0x2a8   : > { %v2421_v5 = vpop.f32.mrf.mxu3  ;;  %v2305_v56 = vpop.f32.mrf.mxu0 }
 0x2a9   : > { %v2422_v8 = vadd.f32 %v2421_v5, %v2303_v60  ;;  %v2341_v6 = vpop.f32.mrf.mxu1 }
 0x2ab   : > { %v5375_v35 = vadd.f32 %v2422_v8, %v2339_v63 }
 0x2af   : > { %v2376_v2 = vpop.f32.mrf.mxu2 }
 0x2b0   : > { %v2423_v36 = vpop.f32.mrf.mxu3 }
 0x2b1   : > { %v2424_v14 = vadd.f32 %v2423_v36, %v2305_v56 }
 0x2b3   : > { %v5377_v48 = vadd.f32 %v2424_v14, %v2341_v6 }
 0x2b4   : > { %v2308_v55 = vpop.f32.mrf.mxu0  ;;  %v2344_v46 = vpop.f32.mrf.mxu1 }
 0x2bb   : > { %v2379_v57 = vpop.f32.mrf.mxu2 }
 0x2bc   : > { %v2310_v19 = vpop.f32.mrf.mxu0  ;;  %v2346_v17 = vpop.f32.mrf.mxu1 }
 0x2bf   : > { %v2426_v43 = vpop.f32.mrf.mxu3 }
 0x2c0   : > { %v2427_v16 = vadd.f32 %v2426_v43, %v2308_v55 }
 0x2c2   : > { %v2433_v52 = vadd.f32 %v2427_v16, %v2344_v46 }
 0x2c3   : > { %v2381_v3 = vpop.f32.mrf.mxu2 }
 0x2c4   : > { %v2448_v30 = vpop.f32.mrf.mxu0  ;;  %v2531_v59 = vpop.f32.mrf.mxu1 }
 0x2c5   : > { %v2449_v45 = vadd.f32 %v2448_v30, %v2303_v60 }
 0x2c7   : > { %v2428_v22 = vpop.f32.mrf.mxu3  ;;  %v2458_v42 = vadd.f32 %v2449_v45, %v2339_v63  ;;  %v2466_v38 = vadd.f32 %v2449_v45, %v2374_v58 }
 0x2c8   : > { %v2429_v9 = vadd.f32 %v2428_v22, %v2310_v19 }
 0x2ca   : > { %v2434_v10 = vadd.f32 %v2429_v9, %v2346_v17 }
 0x2cb   : > { %v2567_v40 = vpop.f32.mrf.mxu2 }
 0x2cc   : > { %v2450_v26 = vpop.f32.mrf.mxu0  ;;  %v5379_v12 = vpop.f32.mrf.mxu1 }
 0x2cd   : > { %v2451_v27 = vadd.f32 %v2450_v26, %v2305_v56 }
 0x2cf   : > { %v2459_v53 = vadd.f32 %v2451_v27, %v2341_v6  ;;  %v2467_v7 = vadd.f32 %v2451_v27, %v2376_v2  ;;  %v2609_v21 = vpop.f32.mrf.mxu3 }
 0x2d3   : > { %v2569_v4 = vpop.f32.mrf.mxu2 }
 0x2d4   : > { %v2453_v41 = vpop.f32.mrf.mxu0  ;;  %v2536_v28 = vpop.f32.mrf.mxu1 }
 0x2d5   : > { %v2454_v24 = vadd.f32 %v2453_v41, %v2308_v55 }
 0x2d7   : > { %v2460_v18 = vadd.f32 %v2454_v24, %v2344_v46  ;;  %v2468_v47 = vadd.f32 %v2454_v24, %v2379_v57  ;;  %v2611_v50 = vpop.f32.mrf.mxu3 }
 0x2db   : > { %v2572_v29 = vpop.f32.mrf.mxu2 }
 0x2dc   : > { %v2455_v13 = vpop.f32.mrf.mxu0  ;;  %v2538_v44 = vpop.f32.mrf.mxu1 }
 0x2dd   : > { %v2456_v49 = vadd.f32 %v2455_v13, %v2310_v19 }
 0x2df   : > { %v2461_v32 = vadd.f32 %v2456_v49, %v2346_v17  ;;  %v2469_v33 = vadd.f32 %v2456_v49, %v2381_v3  ;;  %v2614_v34 = vpop.f32.mrf.mxu3 }
 0x2e3   : > { %v2574_v62 = vpop.f32.mrf.mxu2 }
 0x2e4   : > { %v2663_v39 = vpop.f32.mrf.mxu0  ;;  %v2690_v15 = vpop.f32.mrf.mxu1 }
 0x2e5   : > { %v2691_v11 = vadd.f32 %v2690_v15, %v2531_v59  ;;  %v2664_v3 = vadd.f32 %v2663_v39, %v2531_v59 }
 0x2e7   : > { %v2700_v25 = vadd.f32 %v2691_v11, %v2567_v40  ;;  %v2708_v54 = vadd.f32 %v2691_v11, %v2609_v21  ;;  %v2616_v17 = vpop.f32.mrf.mxu3  ;;  %v2673_v27 = vadd.f32 %v2664_v3, %v2567_v40 }
 0x2e9   : > { %v2704_v61 = vadd.f32 %v2700_v25, %v2458_v42  ;;  %v5381_v31 = vadd.f32 %v2708_v54, %v2466_v38  ;;  %v2677_v24 = vadd.f32 %v2673_v27, %v5375_v35 }
 0x2eb   : > { %v2762_v1 = vpop.f32.mrf.mxu2 }
 0x2ec   : > { %v2665_v0 = vpop.f32.mrf.mxu0  ;;  %v2692_v23 = vpop.f32.mrf.mxu1 }
 0x2ed   : > { %v2693_v20 = vadd.f32 %v2692_v23, %v5379_v12 }
 0x2ef   : > { %v2701_v51 = vadd.f32 %v2693_v20, %v2569_v4  ;;  %v2709_v37 = vadd.f32 %v2693_v20, %v2611_v50 }
 0x2f1   : > { %v5384_v60 = vadd.f32 %v2701_v51, %v2459_v53  ;;  %v5386_v63 = vadd.f32 %v2709_v37, %v2467_v7  ;;  %v2798_v53 = vpop.f32.mrf.mxu3 }
 0x2f3   : > { %v2764_v6 = vpop.f32.mrf.mxu2 }
 0x2f4   : > { %v2668_v5 = vpop.f32.mrf.mxu0  ;;  %v2695_v8 = vpop.f32.mrf.mxu1 }
 0x2f5   : > { %v2669_v58 = vadd.f32 %v2668_v5, %v2536_v28  ;;  %v2696_v56 = vadd.f32 %v2695_v8, %v2536_v28 }
 0x2f7   : > { %v2675_v36 = vadd.f32 %v2669_v58, %v2572_v29  ;;  %v2702_v14 = vadd.f32 %v2696_v56, %v2572_v29  ;;  %v2710_v55 = vadd.f32 %v2696_v56, %v2614_v34 }
 0x2f9   : > { %v5388_v46 = vadd.f32 %v2675_v36, %v2433_v52  ;;  %v5390_v2 = vadd.f32 %v2702_v14, %v2460_v18  ;;  %v5392_v19 = vadd.f32 %v2710_v55, %v2468_v47  ;;  %v2666_v18 = vadd.f32 %v2665_v0, %v5379_v12  ;;  %v2800_v29 = vpop.f32.mrf.mxu3 }
 0x2fb   : > { %v5394_v45 = vpop.f32.mrf.mxu2  ;;  %v2674_v21 = vadd.f32 %v2666_v18, %v2569_v4 }
 0x2fc   : > { %v2670_v57 = vpop.f32.mrf.mxu0  ;;  %v2697_v43 = vpop.f32.mrf.mxu1 }
 0x2fd   : > { %v2671_v16 = vadd.f32 %v2670_v57, %v2538_v44  ;;  %v2698_v30 = vadd.f32 %v2697_v43, %v2538_v44  ;;  %v2678_v35 = vadd.f32 %v2674_v21, %v5377_v48 }
 0x2ff   : > { %v2676_v22 = vadd.f32 %v2671_v16, %v2574_v62  ;;  %v2703_v42 = vadd.f32 %v2698_v30, %v2574_v62  ;;  %v2711_v38 = vadd.f32 %v2698_v30, %v2616_v17 }
 0x301   : > { %v5396_v9 = vadd.f32 %v2676_v22, %v2434_v10  ;;  %v5398_v26 = vadd.f32 %v2703_v42, %v2461_v32  ;;  %v5400_v52 = vadd.f32 %v2711_v38, %v2469_v33  ;;  %v5409_v10 = vld [vmem:[%s5710_s6] ss:$0 sm:$0xff]  ;;  %v2803_v27 = vpop.f32.mrf.mxu3 }
 0x303   : > { %v5402_v28 = vpop.f32.mrf.mxu2 }
 0x304   : > { %v2872_v7 = vpop.f32.mrf.mxu1  ;;  %v2829_v20 = vpop.f32.mrf.mxu0 }
 0x305   : > { %v2873_v41 = vadd.f32 %v2872_v7, %v2762_v1 }
 0x307   : > { %v2882_v59 = vadd.f32 %v2873_v41, %v2798_v53 }
 0x309   : > { %v2886_v47 = vadd.f32 %v2882_v59, %v2677_v24 }
 0x30b   : > { %v2929_v13 = vadd.f32 %v5409_v10, %v2886_v47  ;;  %v2899_v32 = vpop.f32.mrf.mxu2 }
 0x30c   : > { %v2874_v40 = vpop.f32.mrf.mxu1  ;;  %v2900_v12 = vadd.f32 %v2899_v32, %v2762_v1  ;;  %v2831_v16 = vpop.f32.mrf.mxu0 }
 0x30d   : > { %v2937_v44 = vmul.f32 1.442695, %v2929_v13  ;;  %v2875_v49 = vadd.f32 %v2874_v40, %v2764_v6  ;;  %vm2933_vm0 = vcmp.gt.f32.partialorder %v2929_v13, 0.0 }
 0x30e   : > { %v2909_v39 = vadd.f32 %v2900_v12, %v2798_v53  ;;  %v2917_v1 = vadd.f32 %v2900_v12, %v2829_v20 }
 0x30f   : > { %4396 = vpow2.f32 %v2937_v44  ;;  %v2883_v33 = vadd.f32 %v2875_v49, %v2800_v29 }
 0x310   : > { %v2913_v11 = vadd.f32 %v2909_v39, %v2704_v61  ;;  %v2921_v5 = vadd.f32 %v2917_v1, %v5381_v31 }
 0x311   : > { %v2887_v15 = vadd.f32 %v2883_v33, %v2678_v35 }
 0x312   : > { %v2961_v4 = vadd.f32 %v5409_v10, %v2913_v11  ;;  %v2993_v14 = vadd.f32 %v5409_v10, %v2921_v5 }
 0x313   : > { %v2930_v50 = vadd.f32 %v5409_v10, %v2887_v15  ;;  %v2901_v0 = vpop.f32.mrf.mxu2 }
 0x314   : > { %v2969_v23 = vmul.f32 1.442695, %v2961_v4  ;;  %v2902_v48 = vadd.f32 %v2901_v0, %v2764_v6  ;;  %vm2965_vm4 = vcmp.gt.f32.partialorder %v2961_v4, 0.0  ;;  %v3001_v3 = vmul.f32 1.442695, %v2993_v14  ;;  %v2877_v22 = vpop.f32.mrf.mxu1  ;;  %v2834_v18 = vpop.f32.mrf.mxu0 }
 0x315   : > { %v4397_v62 = vpop.eup %4396  ;;  %v2939_v25 = vmul.f32 1.442695, %v2930_v50  ;;  %vm2934_vm2 = vcmp.gt.f32.partialorder %v2930_v50, 0.0  ;;  %v2878_v38 = vadd.f32 %v2877_v22, %v5394_v45  ;;  %vm2997_vm5 = vcmp.gt.f32.partialorder %v2993_v14, 0.0 }
 0x316   : > { %v4027_v54 = vadd.f32 -1.0, %v4397_v62  ;;  %v2910_v37 = vadd.f32 %v2902_v48, %v2800_v29  ;;  %v2918_v49 = vadd.f32 %v2902_v48, %v2831_v16 }
 0x317   : > { %4398 = vpow2.f32 %v2939_v25  ;;  %v2884_v53 = vadd.f32 %v2878_v38, %v2803_v27 }
 0x318   : > { %v2949_v51 = vmul.f32 1.6732632, %v4027_v54  ;;  %4400 = vpow2.f32 %v2969_v23  ;;  %v2914_v58 = vadd.f32 %v2910_v37, %v5384_v60  ;;  %v2805_v54 = vpop.f32.mrf.mxu3 }
 0x319   : > { %4402 = vpow2.f32 %v3001_v3  ;;  %v2888_v7 = vadd.f32 %v2884_v53, %v5388_v46 }
 0x31a   : > { %v2953_v61 = vsel %vm2933_vm0, %v2929_v13, %v2949_v51  ;;  %v2962_v57 = vadd.f32 %v5409_v10, %v2914_v58 }
 0x31b   : > { %v2957_v34 = vmul.f32 1.050701, %v2953_v61  ;;  %v2904_v41 = vpop.f32.mrf.mxu2 }
 0x31c   : > { %v2971_v42 = vmul.f32 1.442695, %v2962_v57  ;;  %v2905_v24 = vadd.f32 %v2904_v41, %v5394_v45  ;;  %vm2966_vm6 = vcmp.gt.f32.partialorder %v2962_v57, 0.0  ;;  %v2879_v62 = vpop.f32.mrf.mxu1  ;;  %v2836_v48 = vpop.f32.mrf.mxu0 }
 0x31d   : > { %3026 = vst.msk [vmem:[%s5419_s20] sm:$0xff] %vm3025_vm1, %v2957_v34  ;;  %v4399_v8 = vpop.eup %4398  ;;  %v2880_v25 = vadd.f32 %v2879_v62, %v5402_v28 }
 0x31e   : > { %v4401_v56 = vpop.eup %4400  ;;  %v4028_v6 = vadd.f32 -1.0, %v4399_v8  ;;  %4404 = vpow2.f32 %v2971_v42  ;;  %v2911_v46 = vadd.f32 %v2905_v24, %v2803_v27  ;;  %v2919_v47 = vadd.f32 %v2905_v24, %v2834_v18 }
 0x31f   : > { %v4031_v36 = vadd.f32 -1.0, %v4401_v56  ;;  %v4403_v59 = vpop.eup %4402  ;;  %v2885_v0 = vadd.f32 %v2880_v25, %v2805_v54 }
 0x320   : > { %v2950_v55 = vmul.f32 1.6732632, %v4028_v6  ;;  %v2915_v45 = vadd.f32 %v2911_v46, %v5390_v2  ;;  %v5456_v13 = vadd.f32 %v2919_v47, %v5392_v19  ;;  %v4035_v40 = vadd.f32 -1.0, %v4403_v59 }
 0x321   : > { %v2981_v17 = vmul.f32 1.6732632, %v4031_v36  ;;  %v2922_v19 = vadd.f32 %v2918_v49, %v5386_v63  ;;  %v2931_v63 = vadd.f32 %v5409_v10, %v2888_v7  ;;  %v2889_v23 = vadd.f32 %v2885_v0, %v5396_v9 }
 0x322   : > { %v2954_v43 = vsel %vm2934_vm2, %v2930_v50, %v2950_v55  ;;  %v3013_v29 = vmul.f32 1.6732632, %v4035_v40  ;;  %v2963_v15 = vadd.f32 %v5409_v10, %v2915_v45 }
 0x323   : > { %v2985_v31 = vsel %vm2965_vm4, %v2961_v4, %v2981_v17  ;;  %v2958_v60 = vmul.f32 1.050701, %v2954_v43  ;;  %v2994_v12 = vadd.f32 %v5409_v10, %v2922_v19  ;;  %v2941_v50 = vmul.f32 1.442695, %v2931_v63  ;;  %v2906_v20 = vpop.f32.mrf.mxu2 }
 0x324   : > { %v2989_v30 = vmul.f32 1.050701, %v2985_v31  ;;  %v4405_v21 = vpop.eup %4404  ;;  %v3017_v32 = vsel %vm2997_vm5, %v2993_v14, %v3013_v29  ;;  %v2973_v4 = vmul.f32 1.442695, %v2963_v15  ;;  %v2907_v51 = vadd.f32 %v2906_v20, %v5402_v28 }
 0x325   : > { %3027 = vst.msk [vmem:[%s5419_s20 + $0x8] sm:$0xff] %vm3025_vm1, %v2958_v60  ;;  %v4032_v44 = vadd.f32 -1.0, %v4405_v21  ;;  %v3021_v33 = vmul.f32 1.050701, %v3017_v32  ;;  %v3003_v11 = vmul.f32 1.442695, %v2994_v12  ;;  %v2932_v31 = vadd.f32 %v5409_v10, %v2889_v23 }
 0x326   : > { %4039 = vst.msk [vmem:[%s5419_s20 + $0x20] sm:$0xff] %vm3025_vm1, %v2989_v30  ;;  %v2912_v9 = vadd.f32 %v2907_v51, %v2805_v54  ;;  %v2920_v61 = vadd.f32 %v2907_v51, %v2836_v48  ;;  %vm2998_vm7 = vcmp.gt.f32.partialorder %v2994_v12, 0.0  ;;  %vm2935_vm8 = vcmp.gt.f32.partialorder %v2931_v63, 0.0 }
 0x327   : > { %4043 = vst.msk [vmem:[%s5419_s20 + $0x40] sm:$0xff] %vm3025_vm1, %v2989_v30  ;;  %v2982_v2 = vmul.f32 1.6732632, %v4032_v44  ;;  %4406 = vpow2.f32 %v3003_v11  ;;  %vm2967_vm9 = vcmp.gt.f32.partialorder %v2963_v15, 0.0  ;;  %v2943_v3 = vmul.f32 1.442695, %v2932_v31 }
 0x328   : > { %4047 = vst.msk [vmem:[%s5419_s20 + $0x60] sm:$0xff] %vm3025_vm1, %v2989_v30  ;;  %4408 = vpow2.f32 %v2941_v50  ;;  %v2916_v34 = vadd.f32 %v2912_v9, %v5398_v26  ;;  %v5534_v5 = vadd.f32 %v2920_v61, %v5400_v52  ;;  %vm2936_vm11 = vcmp.gt.f32.partialorder %v2932_v31, 0.0 }
 0x329   : > { %4051 = vst.msk [vmem:[%s5419_s20 + $0x80] sm:$0xff] %vm3025_vm1, %v2989_v30  ;;  %v2986_v35 = vsel %vm2966_vm6, %v2962_v57, %v2982_v2  ;;  %4410 = vpow2.f32 %v2973_v4  ;;  %v2995_v57 = vadd.f32 %v5409_v10, %v5456_v13 }
 0x32a   : > { %4055 = vst.msk [vmem:[%s5419_s20 + $0xa0] sm:$0xff] %vm3025_vm1, %v2989_v30  ;;  %v5487_v39 = vmul.f32 1.050701, %v2986_v35  ;;  %v2964_v60 = vadd.f32 %v5409_v10, %v2916_v34  ;;  %v2996_v13 = vadd.f32 %v5409_v10, %v5534_v5 }
 0x32b   : > { %4059 = vst.msk [vmem:[%s5419_s20 + $0xc0] sm:$0xff] %vm3025_vm1, %v2989_v30  ;;  %vm2999_vm10 = vcmp.gt.f32.partialorder %v2995_v57, 0.0 }
 0x32c   : > { %4063 = vst.msk [vmem:[%s5419_s20 + $0xe0] sm:$0xff] %vm3025_vm1, %v2989_v30  ;;  %v2975_v22 = vmul.f32 1.442695, %v2964_v60  ;;  %vm2968_vm12 = vcmp.gt.f32.partialorder %v2964_v60, 0.0  ;;  %v3007_v49 = vmul.f32 1.442695, %v2996_v13 }
 0x32d   : > { %4067 = vst.msk [vmem:[%s5419_s20 + $0x100] sm:$0xff] %vm3025_vm1, %v2989_v30  ;;  %v4407_v1 = vpop.eup %4406  ;;  %vm3000_vm14 = vcmp.gt.f32.partialorder %v2996_v13, 0.0 }
 0x32e   : > { %4071 = vst.msk [vmem:[%s5419_s20 + $0x120] sm:$0xff] %vm3025_vm1, %v2989_v30  ;;  %v4409_v37 = vpop.eup %4408  ;;  %v4036_v8 = vadd.f32 -1.0, %v4407_v1 }
 0x32f   : > { %4075 = vst.msk [vmem:[%s5419_s20 + $0x140] sm:$0xff] %vm3025_vm1, %v2989_v30  ;;  %v4411_v28 = vpop.eup %4410  ;;  %v4029_v58 = vadd.f32 -1.0, %v4409_v37 }
 0x330   : > { %4079 = vst.msk [vmem:[%s5419_s20 + $0x160] sm:$0xff] %vm3025_vm1, %v2989_v30  ;;  %v4033_v56 = vadd.f32 -1.0, %v4411_v28  ;;  %v3014_v26 = vmul.f32 1.6732632, %v4036_v8 }
 0x331   : > { %4083 = vst.msk [vmem:[%s5419_s20 + $0x180] sm:$0xff] %vm3025_vm1, %v2989_v30  ;;  %v2951_v52 = vmul.f32 1.6732632, %v4029_v58 }
 0x332   : > { %4087 = vst.msk [vmem:[%s5419_s20 + $0x1a0] sm:$0xff] %vm3025_vm1, %v2989_v30  ;;  %v2983_v6 = vmul.f32 1.6732632, %v4033_v56  ;;  %v3018_v36 = vsel %vm2998_vm7, %v2994_v12, %v3014_v26 }
 0x333   : > { %4091 = vst.msk [vmem:[%s5419_s20 + $0x1c0] sm:$0xff] %vm3025_vm1, %v2989_v30  ;;  %v2955_v14 = vsel %vm2935_vm8, %v2931_v63, %v2951_v52  ;;  %v3022_v17 = vmul.f32 1.050701, %v3018_v36 }
 0x334   : > { %4095 = vst.msk [vmem:[%s5419_s20 + $0x1e0] sm:$0xff] %vm3025_vm1, %v2989_v30  ;;  %v2987_v55 = vsel %vm2967_vm9, %v2963_v15, %v2983_v6  ;;  %v2959_v43 = vmul.f32 1.050701, %v2955_v14 }
 0x335   : > { %4099 = vst.msk [vmem:[%s5419_s20 + $0x200] sm:$0xff] %vm3025_vm1, %v2989_v30  ;;  %v2991_v16 = vmul.f32 1.050701, %v2987_v55 }
 0x336   : > { %4103 = vst.msk [vmem:[%s5419_s20 + $0x220] sm:$0xff] %vm3025_vm1, %v2989_v30 }
 0x337   : > { %4107 = vst.msk [vmem:[%s5419_s20 + $0x240] sm:$0xff] %vm3025_vm1, %v2989_v30 }
 0x338   : > { %4111 = vst.msk [vmem:[%s5419_s20 + $0x260] sm:$0xff] %vm3025_vm1, %v2989_v30 }
 0x339   : > { %4115 = vst.msk [vmem:[%s5419_s20 + $0x280] sm:$0xff] %vm3025_vm1, %v2989_v30 }
 0x33a   : > { %4119 = vst.msk [vmem:[%s5419_s20 + $0x2a0] sm:$0xff] %vm3025_vm1, %v2989_v30 }
 0x33b   : > { %4123 = vst.msk [vmem:[%s5419_s20 + $0x2c0] sm:$0xff] %vm3025_vm1, %v2989_v30 }
 0x33c   : > { %4127 = vst.msk [vmem:[%s5419_s20 + $0x2e0] sm:$0xff] %vm3025_vm1, %v2989_v30 }
 0x33d   : > { %4131 = vst.msk [vmem:[%s5419_s20 + $0x300] sm:$0xff] %vm3025_vm1, %v2989_v30 }
 0x33e   : > { %4135 = vst.msk [vmem:[%s5419_s20 + $0x320] sm:$0xff] %vm3025_vm1, %v2989_v30 }
 0x33f   : > { %4139 = vst.msk [vmem:[%s5419_s20 + $0x340] sm:$0xff] %vm3025_vm1, %v2989_v30  ;;  %v3005_v30 = vmul.f32 1.442695, %v2995_v57 }
 0x340   : > { %4143 = vst.msk [vmem:[%s5419_s20 + $0x360] sm:$0xff] %vm3025_vm1, %v3021_v33 }
 0x341   : > { %4040 = vst.msk [vmem:[%s5419_s20 + $0x28] sm:$0xff] %vm3025_vm1, %v5487_v39  ;;  %4412 = vpow2.f32 %v3005_v30 }
 0x342   : > { %4044 = vst.msk [vmem:[%s5419_s20 + $0x48] sm:$0xff] %vm3025_vm1, %v5487_v39  ;;  %4414 = vpow2.f32 %v2943_v3 }
 0x343   : > { %4048 = vst.msk [vmem:[%s5419_s20 + $0x68] sm:$0xff] %vm3025_vm1, %v5487_v39  ;;  %4416 = vpow2.f32 %v2975_v22 }
 0x344   : > { %4052 = vst.msk [vmem:[%s5419_s20 + $0x88] sm:$0xff] %vm3025_vm1, %v5487_v39  ;;  %4418 = vpow2.f32 %v3007_v49 }
 0x345   : > { %4056 = vst.msk [vmem:[%s5419_s20 + $0xa8] sm:$0xff] %vm3025_vm1, %v5487_v39 }
 0x346   : > { %4060 = vst.msk [vmem:[%s5419_s20 + $0xc8] sm:$0xff] %vm3025_vm1, %v5487_v39 }
 0x347   : > { %4064 = vst.msk [vmem:[%s5419_s20 + $0xe8] sm:$0xff] %vm3025_vm1, %v5487_v39  ;;  %v4413_v42 = vpop.eup %4412 }
 0x348   : > { %4068 = vst.msk [vmem:[%s5419_s20 + $0x108] sm:$0xff] %vm3025_vm1, %v5487_v39  ;;  %v4415_v38 = vpop.eup %4414  ;;  %v4037_v53 = vadd.f32 -1.0, %v4413_v42 }
 0x349   : > { %4072 = vst.msk [vmem:[%s5419_s20 + $0x128] sm:$0xff] %vm3025_vm1, %v5487_v39  ;;  %v4417_v27 = vpop.eup %4416  ;;  %v4030_v7 = vadd.f32 -1.0, %v4415_v38 }
 0x34a   : > { %4076 = vst.msk [vmem:[%s5419_s20 + $0x148] sm:$0xff] %vm3025_vm1, %v5487_v39  ;;  %v4034_v41 = vadd.f32 -1.0, %v4417_v27  ;;  %v3015_v24 = vmul.f32 1.6732632, %v4037_v53  ;;  %v4419_v10 = vpop.eup %4418 }
 0x34b   : > { %4080 = vst.msk [vmem:[%s5419_s20 + $0x168] sm:$0xff] %vm3025_vm1, %v5487_v39  ;;  %v2952_v18 = vmul.f32 1.6732632, %v4030_v7  ;;  %v4038_v29 = vadd.f32 -1.0, %v4419_v10 }
 0x34c   : > { %4084 = vst.msk [vmem:[%s5419_s20 + $0x188] sm:$0xff] %vm3025_vm1, %v5487_v39  ;;  %v2984_v59 = vmul.f32 1.6732632, %v4034_v41  ;;  %v3019_v46 = vsel %vm2999_vm10, %v2995_v57, %v3015_v24 }
 0x34d   : > { %4088 = vst.msk [vmem:[%s5419_s20 + $0x1a8] sm:$0xff] %vm3025_vm1, %v5487_v39  ;;  %v2956_v47 = vsel %vm2936_vm11, %v2932_v31, %v2952_v18  ;;  %v3023_v45 = vmul.f32 1.050701, %v3019_v46  ;;  %v3016_v2 = vmul.f32 1.6732632, %v4038_v29 }
 0x34e   : > { %4092 = vst.msk [vmem:[%s5419_s20 + $0x1c8] sm:$0xff] %vm3025_vm1, %v5487_v39  ;;  %v2988_v21 = vsel %vm2968_vm12, %v2964_v60, %v2984_v59  ;;  %v2960_v40 = vmul.f32 1.050701, %v2956_v47 }
 0x34f   : > { %4096 = vst.msk [vmem:[%s5419_s20 + $0x1e8] sm:$0xff] %vm3025_vm1, %v5487_v39  ;;  %v2992_v44 = vmul.f32 1.050701, %v2988_v21  ;;  %v3020_v19 = vsel %vm3000_vm14, %v2996_v13, %v3016_v2 }
 0x350   : > { %4100 = vst.msk [vmem:[%s5419_s20 + $0x208] sm:$0xff] %vm3025_vm1, %v5487_v39  ;;  %v3024_v32 = vmul.f32 1.050701, %v3020_v19 }
 0x351   : > { %4104 = vst.msk [vmem:[%s5419_s20 + $0x228] sm:$0xff] %vm3025_vm1, %v5487_v39 }
 0x352   : > { %4108 = vst.msk [vmem:[%s5419_s20 + $0x248] sm:$0xff] %vm3025_vm1, %v5487_v39 }
 0x353   : > { %4112 = vst.msk [vmem:[%s5419_s20 + $0x268] sm:$0xff] %vm3025_vm1, %v5487_v39 }
 0x354   : > { %4116 = vst.msk [vmem:[%s5419_s20 + $0x288] sm:$0xff] %vm3025_vm1, %v5487_v39 }
 0x355   : > { %4120 = vst.msk [vmem:[%s5419_s20 + $0x2a8] sm:$0xff] %vm3025_vm1, %v5487_v39 }
 0x356   : > { %4124 = vst.msk [vmem:[%s5419_s20 + $0x2c8] sm:$0xff] %vm3025_vm1, %v5487_v39 }
 0x357   : > { %4128 = vst.msk [vmem:[%s5419_s20 + $0x2e8] sm:$0xff] %vm3025_vm1, %v5487_v39 }
 0x358   : > { %4132 = vst.msk [vmem:[%s5419_s20 + $0x308] sm:$0xff] %vm3025_vm1, %v5487_v39 }
 0x359   : > { %4136 = vst.msk [vmem:[%s5419_s20 + $0x328] sm:$0xff] %vm3025_vm1, %v5487_v39 }
 0x35a   : > { %4140 = vst.msk [vmem:[%s5419_s20 + $0x348] sm:$0xff] %vm3025_vm1, %v5487_v39 }
 0x35b   : > { %4144 = vst.msk [vmem:[%s5419_s20 + $0x368] sm:$0xff] %vm3025_vm1, %v3022_v17 }
 0x35c   : > { %3028 = vst.msk [vmem:[%s5419_s20 + $0x10] sm:$0xff] %vm3025_vm1, %v2959_v43 }
 0x35d   : > { %4041 = vst.msk [vmem:[%s5419_s20 + $0x30] sm:$0xff] %vm3025_vm1, %v2991_v16 }
 0x35e   : > { %4045 = vst.msk [vmem:[%s5419_s20 + $0x50] sm:$0xff] %vm3025_vm1, %v2991_v16 }
 0x35f   : > { %4049 = vst.msk [vmem:[%s5419_s20 + $0x70] sm:$0xff] %vm3025_vm1, %v2991_v16 }
 0x360   : > { %4053 = vst.msk [vmem:[%s5419_s20 + $0x90] sm:$0xff] %vm3025_vm1, %v2991_v16 }
 0x361   : > { %4057 = vst.msk [vmem:[%s5419_s20 + $0xb0] sm:$0xff] %vm3025_vm1, %v2991_v16 }
 0x362   : > { %4061 = vst.msk [vmem:[%s5419_s20 + $0xd0] sm:$0xff] %vm3025_vm1, %v2991_v16 }
 0x363   : > { %4065 = vst.msk [vmem:[%s5419_s20 + $0xf0] sm:$0xff] %vm3025_vm1, %v2991_v16 }
 0x364   : > { %4069 = vst.msk [vmem:[%s5419_s20 + $0x110] sm:$0xff] %vm3025_vm1, %v2991_v16 }
 0x365   : > { %4073 = vst.msk [vmem:[%s5419_s20 + $0x130] sm:$0xff] %vm3025_vm1, %v2991_v16 }
 0x366   : > { %4077 = vst.msk [vmem:[%s5419_s20 + $0x150] sm:$0xff] %vm3025_vm1, %v2991_v16 }
 0x367   : > { %4081 = vst.msk [vmem:[%s5419_s20 + $0x170] sm:$0xff] %vm3025_vm1, %v2991_v16 }
 0x368   : > { %4085 = vst.msk [vmem:[%s5419_s20 + $0x190] sm:$0xff] %vm3025_vm1, %v2991_v16 }
 0x369   : > { %4089 = vst.msk [vmem:[%s5419_s20 + $0x1b0] sm:$0xff] %vm3025_vm1, %v2991_v16 }
 0x36a   : > { %4093 = vst.msk [vmem:[%s5419_s20 + $0x1d0] sm:$0xff] %vm3025_vm1, %v2991_v16 }
 0x36b   : > { %4097 = vst.msk [vmem:[%s5419_s20 + $0x1f0] sm:$0xff] %vm3025_vm1, %v2991_v16 }
 0x36c   : > { %4101 = vst.msk [vmem:[%s5419_s20 + $0x210] sm:$0xff] %vm3025_vm1, %v2991_v16 }
 0x36d   : > { %4105 = vst.msk [vmem:[%s5419_s20 + $0x230] sm:$0xff] %vm3025_vm1, %v2991_v16 }
 0x36e   : > { %4109 = vst.msk [vmem:[%s5419_s20 + $0x250] sm:$0xff] %vm3025_vm1, %v2991_v16 }
 0x36f   : > { %4113 = vst.msk [vmem:[%s5419_s20 + $0x270] sm:$0xff] %vm3025_vm1, %v2991_v16 }
 0x370   : > { %4117 = vst.msk [vmem:[%s5419_s20 + $0x290] sm:$0xff] %vm3025_vm1, %v2991_v16 }
 0x371   : > { %4121 = vst.msk [vmem:[%s5419_s20 + $0x2b0] sm:$0xff] %vm3025_vm1, %v2991_v16 }
 0x372   : > { %4125 = vst.msk [vmem:[%s5419_s20 + $0x2d0] sm:$0xff] %vm3025_vm1, %v2991_v16 }
 0x373   : > { %4129 = vst.msk [vmem:[%s5419_s20 + $0x2f0] sm:$0xff] %vm3025_vm1, %v2991_v16 }
 0x374   : > { %4133 = vst.msk [vmem:[%s5419_s20 + $0x310] sm:$0xff] %vm3025_vm1, %v2991_v16 }
 0x375   : > { %4137 = vst.msk [vmem:[%s5419_s20 + $0x330] sm:$0xff] %vm3025_vm1, %v2991_v16 }
 0x376   : > { %4141 = vst.msk [vmem:[%s5419_s20 + $0x350] sm:$0xff] %vm3025_vm1, %v2991_v16 }
 0x377   : > { %4145 = vst.msk [vmem:[%s5419_s20 + $0x370] sm:$0xff] %vm3025_vm1, %v3023_v45 }
 0x378   : > { %3030 = vst.msk [vmem:[%s5419_s20 + $0x18] sm:$0xf] %vm3029_vm13, %v2960_v40 }
 0x379   : > { %4042 = vst.msk [vmem:[%s5419_s20 + $0x38] sm:$0xf] %vm3029_vm13, %v2992_v44 }
 0x37a   : > { %4046 = vst.msk [vmem:[%s5419_s20 + $0x58] sm:$0xf] %vm3029_vm13, %v2992_v44 }
 0x37b   : > { %4050 = vst.msk [vmem:[%s5419_s20 + $0x78] sm:$0xf] %vm3029_vm13, %v2992_v44 }
 0x37c   : > { %4054 = vst.msk [vmem:[%s5419_s20 + $0x98] sm:$0xf] %vm3029_vm13, %v2992_v44 }
 0x37d   : > { %4058 = vst.msk [vmem:[%s5419_s20 + $0xb8] sm:$0xf] %vm3029_vm13, %v2992_v44 }
 0x37e   : > { %4062 = vst.msk [vmem:[%s5419_s20 + $0xd8] sm:$0xf] %vm3029_vm13, %v2992_v44 }
 0x37f   : > { %4066 = vst.msk [vmem:[%s5419_s20 + $0xf8] sm:$0xf] %vm3029_vm13, %v2992_v44 }
 0x380   : > { %4070 = vst.msk [vmem:[%s5419_s20 + $0x118] sm:$0xf] %vm3029_vm13, %v2992_v44 }
 0x381   : > { %4074 = vst.msk [vmem:[%s5419_s20 + $0x138] sm:$0xf] %vm3029_vm13, %v2992_v44 }
 0x382   : > { %4078 = vst.msk [vmem:[%s5419_s20 + $0x158] sm:$0xf] %vm3029_vm13, %v2992_v44 }
 0x383   : > { %4082 = vst.msk [vmem:[%s5419_s20 + $0x178] sm:$0xf] %vm3029_vm13, %v2992_v44 }
 0x384   : > { %4086 = vst.msk [vmem:[%s5419_s20 + $0x198] sm:$0xf] %vm3029_vm13, %v2992_v44 }
 0x385   : > { %4090 = vst.msk [vmem:[%s5419_s20 + $0x1b8] sm:$0xf] %vm3029_vm13, %v2992_v44 }
 0x386   : > { %4094 = vst.msk [vmem:[%s5419_s20 + $0x1d8] sm:$0xf] %vm3029_vm13, %v2992_v44 }
 0x387   : > { %4098 = vst.msk [vmem:[%s5419_s20 + $0x1f8] sm:$0xf] %vm3029_vm13, %v2992_v44 }
 0x388   : > { %4102 = vst.msk [vmem:[%s5419_s20 + $0x218] sm:$0xf] %vm3029_vm13, %v2992_v44 }
 0x389   : > { %4106 = vst.msk [vmem:[%s5419_s20 + $0x238] sm:$0xf] %vm3029_vm13, %v2992_v44 }
 0x38a   : > { %4110 = vst.msk [vmem:[%s5419_s20 + $0x258] sm:$0xf] %vm3029_vm13, %v2992_v44 }
 0x38b   : > { %4114 = vst.msk [vmem:[%s5419_s20 + $0x278] sm:$0xf] %vm3029_vm13, %v2992_v44 }
 0x38c   : > { %4118 = vst.msk [vmem:[%s5419_s20 + $0x298] sm:$0xf] %vm3029_vm13, %v2992_v44 }
 0x38d   : > { %4122 = vst.msk [vmem:[%s5419_s20 + $0x2b8] sm:$0xf] %vm3029_vm13, %v2992_v44 }
 0x38e   : > { %4126 = vst.msk [vmem:[%s5419_s20 + $0x2d8] sm:$0xf] %vm3029_vm13, %v2992_v44 }
 0x38f   : > { %4130 = vst.msk [vmem:[%s5419_s20 + $0x2f8] sm:$0xf] %vm3029_vm13, %v2992_v44 }
 0x390   : > { %4134 = vst.msk [vmem:[%s5419_s20 + $0x318] sm:$0xf] %vm3029_vm13, %v2992_v44 }
 0x391   : > { %4138 = vst.msk [vmem:[%s5419_s20 + $0x338] sm:$0xf] %vm3029_vm13, %v2992_v44 }
 0x392   : > { %4142 = vst.msk [vmem:[%s5419_s20 + $0x358] sm:$0xf] %vm3029_vm13, %v2992_v44 }
 0x393   : > { %4146 = vst.msk [vmem:[%s5419_s20 + $0x378] sm:$0xf] %vm3029_vm13, %v3024_v32 }
 0x394 PF: > { %s17_s24 = sadd.s32 1, %s4441_s24  }
 0x395   : > { %p14_p4 = scmp.ge.s32.totalorder %s17_s24, 4  }
 0x397   :  { %16 = sbr.rel (!%p14_p4) target bundleno = 1 (0x1), region = 108 }

</bundles_post_ra>
